<compile_context>
chip_gen: v6e
topology: v6e:2x2x1
jax: 0.10.0
libtpu: 0.0.40
codegen_flags: <defaults>
</compile_context>

<pallas_src>
import functools

import jax
import jax.numpy as jnp
from jax.experimental import pallas as pl
from jax.experimental.pallas import tpu as pltpu

BN_EPS = 1e-5
LEAKY_SLOPE = 0.01
LANE = 128


def _round_up(x, m):
    return (x + m - 1) // m * m


# ---------------------------------------------------------------------------
# Fused kernel: leaky-relu + softmax + row-conv + col-conv + BN + ReLU
# ---------------------------------------------------------------------------
def _gat_reduce_kernel(es_ref, nbr_ref, z_ref, wcol_ref, rowc_ref, colc_ref,
                       orow_ref, ocol_ref, *, k_neighbors):
    K = k_neighbors                             # static max_neighs
    TN = es_ref.shape[0]                        # node tile
    N_all = z_ref.shape[0]                      # padded node count (z resident)

    packed = es_ref[...]                        # (TN, 3*LANE), lane-dense
    e_pre = packed[:, 0:LANE]                   # src+dst attention logits
    r0g = packed[:, LANE:2 * LANE]              # z_src . w_row[0]
    r1g = packed[:, 2 * LANE:3 * LANE]          # z_src . w_row[1]

    # leaky_relu, then softmax over the K real neighbor lanes (pad lanes masked)
    lane = jax.lax.broadcasted_iota(jnp.int32, (TN, LANE), 1)
    valid = lane < K
    e = jnp.where(e_pre >= 0.0, e_pre, LEAKY_SLOPE * e_pre)
    e = jnp.where(valid, e, -1e30)
    m = jnp.max(e, axis=-1, keepdims=True)
    p = jnp.exp(e - m)                          # pad lanes underflow to 0
    alpha = p * pl.reciprocal(jnp.sum(p, axis=-1, keepdims=True), approx=True)

    # ---- row conv: Conv2d(1,1,(2,D)) -> (N, K-1), folded BN + ReLU ---------
    t0 = alpha * r0g                            # (TN, LANE)
    t1 = alpha * r1g
    # Shift t1 left by one lane with zero fill via a tiny shift matrix on the
    # MXU (avoids unaligned lane concat): (t1 @ S)[:, j] = t1[:, j+1]
    ii = jax.lax.broadcasted_iota(jnp.int32, (LANE, LANE), 0)
    jj = jax.lax.broadcasted_iota(jnp.int32, (LANE, LANE), 1)
    shift = (ii == jj + 1).astype(jnp.float32)
    row = t0 + jnp.dot(t1, shift, preferred_element_type=jnp.float32)
    row = row * rowc_ref[0:1, :] + rowc_ref[1:2, :]     # bias+BN folded affine
    orow_ref[...] = jnp.maximum(row, 0.0)       # wrapper keeps only [:, :K-1]

    # ---- col conv: Conv2d(1,1,(K,1)) -> (N, D), folded BN + ReLU -----------
    # out_col[i] = sum_k (alpha[i,k] * w_col[k]) * z[nbr[i,k]]
    # Fold coefficients into a (TN, N_all) one-hot-weighted matrix and do a
    # single MXU matmul against the VMEM-resident z (gather-by-matmul).
    coeff = alpha * wcol_ref[...]               # (TN, LANE); zero beyond K
    nbr = nbr_ref[...]                          # (TN, LANE) int32 (lane-padded)
    ids = jax.lax.broadcasted_iota(jnp.int32, (TN, N_all), 1)
    comb = jnp.zeros((TN, N_all), jnp.float32)
    for k in range(K):                          # K is small and static
        comb = comb + jnp.where(ids == nbr[:, k:k + 1], coeff[:, k:k + 1], 0.0)
    col = jnp.dot(comb, z_ref[...], preferred_element_type=jnp.float32)
    col = col * colc_ref[0:1, :] + colc_ref[1:2, :]     # bias+BN folded affine
    ocol_ref[...] = jnp.maximum(col, 0.0)


# ---------------------------------------------------------------------------
# Wrapper
# ---------------------------------------------------------------------------
def gat_layer_forward(h, neighbors, params, *, tile_n=256):
    """h: (N, in_dim) f32; neighbors: (N, K) int32 source node ids per node."""
    N = h.shape[0]
    K = int(neighbors.shape[1])
    D = params["w_fc"].shape[1]
    assert 2 <= K <= LANE, "max_neighs must be in [2, 128]"
    assert tile_n % 8 == 0

    # --- XLA-side prep (tiny; projection matmul + 3-scalars-per-edge gather) --
    z = h @ params["w_fc"]                                        # (N, D)
    a_src = params["a_src"][0]
    a_dst = params["a_dst"][0]
    w_row = params["w_row"]                                       # (2, D)
    proj = jnp.stack([a_src, a_dst, w_row[0], w_row[1]], axis=1)  # (D, 4)
    u = z @ proj                                                  # (N, 4)
    es = u[:, 0][neighbors] + u[:, 1][:, None]                    # (N, K) logits
    r0g = u[:, 2][neighbors]                                      # (N, K)
    r1g = u[:, 3][neighbors]                                      # (N, K)

    # --- pad to lane-dense, tile-aligned shapes ---
    n_pad = _round_up(max(N, tile_n), tile_n)
    d_pad = _round_up(D, LANE)

    def pad2(x, rows, cols):
        return jnp.pad(x, ((0, rows - x.shape[0]), (0, cols - x.shape[1])))

    es_packed = jnp.concatenate(
        [pad2(es, n_pad, LANE), pad2(r0g, n_pad, LANE), pad2(r1g, n_pad, LANE)],
        axis=1).astype(jnp.float32)                               # (n_pad, 3*LANE)
    nbr_p = pad2(neighbors.astype(jnp.int32), n_pad, LANE)        # (n_pad, LANE)
    z_p = pad2(z.astype(jnp.float32), n_pad, d_pad)               # (n_pad, d_pad)
    wcol_p = pad2(params["w_col"].astype(jnp.float32), 1, LANE)   # (1, LANE)

    # Fold conv bias + eval-mode BatchNorm into one affine per branch.
    g_r, be_r, mu_r, var_r = params["bn_row"]
    g_c, be_c, mu_c, var_c = params["bn_col"]
    scale_r = g_r * jax.lax.rsqrt(var_r + BN_EPS)
    shift_r = be_r + (params["b_row"] - mu_r) * scale_r
    scale_c = g_c * jax.lax.rsqrt(var_c + BN_EPS)
    shift_c = be_c + (params["b_col"] - mu_c) * scale_c
    rowc = jnp.stack([jnp.broadcast_to(scale_r, (LANE,)),
                      jnp.broadcast_to(shift_r, (LANE,))]).astype(jnp.float32)
    colc = jnp.stack([jnp.broadcast_to(scale_c, (d_pad,)),
                      jnp.broadcast_to(shift_c, (d_pad,))]).astype(jnp.float32)

    grid = (n_pad // tile_n,)
    kernel = functools.partial(_gat_reduce_kernel, k_neighbors=K)
    out_row, out_col = pl.pallas_call(
        kernel,
        grid=grid,
        in_specs=[
            pl.BlockSpec((tile_n, 3 * LANE), lambda i: (i, 0)),   # edge scalars
            pl.BlockSpec((tile_n, LANE), lambda i: (i, 0)),       # neighbor ids
            pl.BlockSpec((n_pad, d_pad), lambda i: (0, 0)),       # z (resident)
            pl.BlockSpec((1, LANE), lambda i: (0, 0)),            # w_col
            pl.BlockSpec((2, LANE), lambda i: (0, 0)),            # row affine
            pl.BlockSpec((2, d_pad), lambda i: (0, 0)),           # col affine
        ],
        out_specs=[
            pl.BlockSpec((tile_n, LANE), lambda i: (i, 0)),       # row (padded)
            pl.BlockSpec((tile_n, d_pad), lambda i: (i, 0)),      # col
        ],
        out_shape=[
            jax.ShapeDtypeStruct((n_pad, LANE), jnp.float32),
            jax.ShapeDtypeStruct((n_pad, d_pad), jnp.float32),
        ],
        compiler_params=pltpu.CompilerParams(
            dimension_semantics=("parallel",)),
    )(es_packed, nbr_p, z_p, wcol_p, rowc, colc)

    # final th.cat((featsrow, featscol), dim=1), dropping lane / row padding
    return jnp.concatenate([out_row[:N, :K - 1], out_col[:N, :D]], axis=1)


# ---------------------------------------------------------------------------
# Pure-JAX reference (same math) for a sanity check
# ---------------------------------------------------------------------------
def reference_forward(h, neighbors, params):
    z = h @ params["w_fc"]
    z_src = z[neighbors]                                          # (N,K,D)
    e = (z_src * params["a_src"][0]).sum(-1) \
        + (z * params["a_dst"][0]).sum(-1)[:, None]
    e = jnp.where(e >= 0.0, e, LEAKY_SLOPE * e)
    alpha = jax.nn.softmax(e, axis=1)
    w = alpha[:, :, None] * z_src
    K = w.shape[1]
    t0 = (w * params["w_row"][0][None, None, :]).sum(-1)
    t1 = (w * params["w_row"][1][None, None, :]).sum(-1)
    row = t0[:, :K - 1] + t1[:, 1:] + params["b_row"]
    g, b, mu, var = params["bn_row"]
    row = jnp.maximum((row - mu) / jnp.sqrt(var + BN_EPS) * g + b, 0.0)
    col = (w * params["w_col"][0][None, :, None]).sum(1) + params["b_col"]
    g, b, mu, var = params["bn_col"]
    col = jnp.maximum((col - mu) / jnp.sqrt(var + BN_EPS) * g + b, 0.0)
    return jnp.concatenate([row, col], axis=1)


# ---------------------------------------------------------------------------
def make_params(key, in_dim, out_dim, max_neighs):
    ks = jax.random.split(key, 5)
    gain = jnp.sqrt(2.0)  # calculate_gain('relu')
    # xavier_normal_ on (out, in) weight, stored transposed for h @ W
    std_fc = gain * jnp.sqrt(2.0 / (in_dim + out_dim))
    w_fc = std_fc * jax.random.normal(ks[0], (in_dim, out_dim), jnp.float32)
    std_a = gain * jnp.sqrt(2.0 / (2 * out_dim + 1))
    a = std_a * jax.random.normal(ks[1], (2 * out_dim,), jnp.float32)
    w_row = 0.1 * jax.random.normal(ks[2], (2, out_dim), jnp.float32)
    w_col = 0.1 * jax.random.normal(ks[3], (1, max_neighs), jnp.float32)
    b_row, b_col = 0.1 * jax.random.normal(ks[4], (2,), jnp.float32)
    return {
        "w_fc": w_fc,
        "a_src": a[:out_dim][None, :],                            # (1, D)
        "a_dst": a[out_dim:][None, :],                            # (1, D)
        "w_row": w_row, "b_row": b_row,
        "w_col": w_col, "b_col": b_col,
        "bn_row": jnp.array([1.0, 0.0, 0.0, 1.0], jnp.float32),   # g,b,mean,var
        "bn_col": jnp.array([1.0, 0.0, 0.0, 1.0], jnp.float32),
    }


if __name__ == "__main__":
    # lane-dense demo shapes: D = 128, K = 8, 4 parallel grid steps of 128 rows
    N, in_dim, out_dim, K = 512, 32, 128, 8

    key = jax.random.PRNGKey(0)
    k_h, k_g, k_p = jax.random.split(key, 3)
    h = jax.random.normal(k_h, (N, in_dim), jnp.float32)
    neighbors = jax.random.randint(k_g, (N, K), 0, N, dtype=jnp.int32)
    params = make_params(k_p, in_dim, out_dim, K)

    out = gat_layer_forward(h, neighbors, params, tile_n=128)
    out = jax.block_until_ready(out)

    ref = reference_forward(h, neighbors, params)
    assert out.shape == (N, K - 1 + out_dim), out.shape
    err = float(jnp.max(jnp.abs(out - ref)))
    # tolerance accounts for the EUP approx reciprocal in the softmax
    assert jnp.allclose(out, ref, atol=2e-3, rtol=2e-3), f"mismatch (max err {err})"

    print("KERNEL_OK")
</pallas_src>

<mosaic_0001>
module attributes {stable_mosaic.version = 11 : i64} {
  func.func @_gat_reduce_kernel(%arg0: i32, %arg1: memref<128x384xf32, #tpu.memory_space<vmem>>, %arg2: memref<128x128xi32, #tpu.memory_space<vmem>>, %arg3: memref<512x128xf32, #tpu.memory_space<vmem>>, %arg4: memref<1x128xf32, #tpu.memory_space<vmem>>, %arg5: memref<2x128xf32, #tpu.memory_space<vmem>>, %arg6: memref<2x128xf32, #tpu.memory_space<vmem>>, %arg7: memref<128x128xf32, #tpu.memory_space<vmem>>, %arg8: memref<128x128xf32, #tpu.memory_space<vmem>>) attributes {dimension_semantics = [#tpu.dimension_semantics<parallel>], iteration_bounds = array<i64: 4>, scalar_prefetch = 0 : i64, scratch_operands = 0 : i64, tpu.core_type = #tpu.core_type<tc>, window_params = [{transform_indices = @transform_0, window_bounds = array<i64: 128, 384>}, {transform_indices = @transform_1, window_bounds = array<i64: 128, 128>}, {pipeline_mode = #tpu.pipeline_mode<synchronous>, transform_indices = @transform_2, window_bounds = array<i64: 512, 128>}, {pipeline_mode = #tpu.pipeline_mode<synchronous>, transform_indices = @transform_3, window_bounds = array<i64: 1, 128>}, {pipeline_mode = #tpu.pipeline_mode<synchronous>, transform_indices = @transform_4, window_bounds = array<i64: 2, 128>}, {pipeline_mode = #tpu.pipeline_mode<synchronous>, transform_indices = @transform_5, window_bounds = array<i64: 2, 128>}, {transform_indices = @transform_6, window_bounds = array<i64: 128, 128>}, {transform_indices = @transform_7, window_bounds = array<i64: 128, 128>}]} {
    %c0 = arith.constant 0 : index
    %c0_0 = arith.constant 0 : index
    %0 = vector.load %arg1[%c0, %c0_0] : memref<128x384xf32, #tpu.memory_space<vmem>>, vector<128x384xf32>
    %1 = vector.extract_strided_slice %0 {offsets = [0, 0], sizes = [128, 128], strides = [1, 1]} : vector<128x384xf32> to vector<128x128xf32>
    %2 = vector.extract_strided_slice %0 {offsets = [0, 128], sizes = [128, 128], strides = [1, 1]} : vector<128x384xf32> to vector<128x128xf32>
    %3 = vector.extract_strided_slice %0 {offsets = [0, 256], sizes = [128, 128], strides = [1, 1]} : vector<128x384xf32> to vector<128x128xf32>
    %4 = tpu.iota {dimensions = array<i32: 1>} : vector<128x128xi32>
    %c8_i32 = arith.constant 8 : i32
    %5 = vector.broadcast %c8_i32 : i32 to vector<128x128xi32>
    %6 = arith.cmpi slt, %4, %5 : vector<128x128xi32>
    %cst = arith.constant 0.000000e+00 : f32
    %7 = vector.broadcast %cst : f32 to vector<128x128xf32>
    %8 = arith.cmpf oge, %1, %7 : vector<128x128xf32>
    %cst_1 = arith.constant 0.00999999977 : f32
    %9 = vector.broadcast %cst_1 : f32 to vector<128x128xf32>
    %10 = arith.mulf %9, %1 : vector<128x128xf32>
    %11 = arith.select %8, %1, %10 : vector<128x128xi1>, vector<128x128xf32>
    %cst_2 = arith.constant -1.000000e+30 : f32
    %12 = vector.broadcast %cst_2 : f32 to vector<128x128xf32>
    %13 = arith.select %6, %11, %12 : vector<128x128xi1>, vector<128x128xf32>
    %cst_3 = arith.constant dense<0xFF800000> : vector<128xf32>
    %14 = vector.multi_reduction <maximumf>, %13, %cst_3 [1] : vector<128x128xf32> to vector<128xf32>
    %15 = vector.shape_cast %14 : vector<128xf32> to vector<128x1xf32>
    %16 = vector.broadcast %15 : vector<128x1xf32> to vector<128x128xf32>
    %17 = arith.subf %13, %16 : vector<128x128xf32>
    %18 = math.exp %17 : vector<128x128xf32>
    %cst_4 = arith.constant dense<0.000000e+00> : vector<128xf32>
    %19 = vector.multi_reduction <add>, %18, %cst_4 [1] : vector<128x128xf32> to vector<128xf32>
    %20 = vector.shape_cast %19 : vector<128xf32> to vector<128x1xf32>
    %21 = tpu.reciprocal %20 {approx = true} : vector<128x1xf32> -> vector<128x1xf32>
    %22 = vector.broadcast %21 : vector<128x1xf32> to vector<128x128xf32>
    %23 = arith.mulf %18, %22 : vector<128x128xf32>
    %24 = arith.mulf %23, %2 : vector<128x128xf32>
    %25 = arith.mulf %23, %3 : vector<128x128xf32>
    %26 = tpu.iota {dimensions = array<i32: 0>} : vector<128x128xi32>
    %27 = tpu.iota {dimensions = array<i32: 1>} : vector<128x128xi32>
    %c1_i32 = arith.constant 1 : i32
    %28 = vector.broadcast %c1_i32 : i32 to vector<128x128xi32>
    %29 = arith.addi %27, %28 : vector<128x128xi32>
    %30 = arith.cmpi eq, %26, %29 : vector<128x128xi32>
    %31 = arith.extui %30 : vector<128x128xi1> to vector<128x128xi32>
    %32 = arith.sitofp %31 : vector<128x128xi32> to vector<128x128xf32>
    %cst_5 = arith.constant dense<0.000000e+00> : vector<128x128xf32>
    %33 = tpu.matmul %25, %32, %cst_5 {dimension_numbers = #tpu.dot_dimension_numbers<[1], [0], [0], [1], [0, 0, 1, 1], [], []>} : vector<128x128xf32>, vector<128x128xf32>, vector<128x128xf32> -> vector<128x128xf32>
    %34 = arith.addf %24, %33 : vector<128x128xf32>
    %c0_6 = arith.constant 0 : index
    %c0_7 = arith.constant 0 : index
    %35 = vector.load %arg5[%c0_6, %c0_7] : memref<2x128xf32, #tpu.memory_space<vmem>>, vector<1x128xf32>
    %36 = vector.broadcast %35 : vector<1x128xf32> to vector<128x128xf32>
    %37 = arith.mulf %34, %36 : vector<128x128xf32>
    %c1 = arith.constant 1 : index
    %c0_8 = arith.constant 0 : index
    %38 = vector.load %arg5[%c1, %c0_8] : memref<2x128xf32, #tpu.memory_space<vmem>>, vector<1x128xf32>
    %39 = vector.broadcast %38 : vector<1x128xf32> to vector<128x128xf32>
    %40 = arith.addf %37, %39 : vector<128x128xf32>
    %cst_9 = arith.constant 0.000000e+00 : f32
    %41 = vector.broadcast %cst_9 : f32 to vector<128x128xf32>
    %42 = arith.maximumf %40, %41 : vector<128x128xf32>
    %c0_10 = arith.constant 0 : index
    %c0_11 = arith.constant 0 : index
    %43 = vector.load %arg7[%c0_10, %c0_11] : memref<128x128xf32, #tpu.memory_space<vmem>>, vector<128x128xf32>
    tpu.vector_store %arg7[%c0_10, %c0_11], %42 {strides = array<i32>} : memref<128x128xf32, #tpu.memory_space<vmem>>, vector<128x128xf32>,
    %c0_12 = arith.constant 0 : index
    %c0_13 = arith.constant 0 : index
    %44 = vector.load %arg4[%c0_12, %c0_13] : memref<1x128xf32, #tpu.memory_space<vmem>>, vector<1x128xf32>
    %45 = vector.broadcast %44 : vector<1x128xf32> to vector<128x128xf32>
    %46 = arith.mulf %23, %45 : vector<128x128xf32>
    %c0_14 = arith.constant 0 : index
    %c0_15 = arith.constant 0 : index
    %47 = vector.load %arg2[%c0_14, %c0_15] : memref<128x128xi32, #tpu.memory_space<vmem>>, vector<128x128xi32>
    %48 = tpu.iota {dimensions = array<i32: 1>} : vector<128x512xi32>
    %cst_16 = arith.constant 0.000000e+00 : f32
    %49 = vector.broadcast %cst_16 : f32 to vector<128x512xf32>
    %50 = vector.extract_strided_slice %47 {offsets = [0, 0], sizes = [128, 1], strides = [1, 1]} : vector<128x128xi32> to vector<128x1xi32>
    %51 = vector.broadcast %50 : vector<128x1xi32> to vector<128x512xi32>
    %52 = arith.cmpi eq, %48, %51 : vector<128x512xi32>
    %53 = vector.extract_strided_slice %46 {offsets = [0, 0], sizes = [128, 1], strides = [1, 1]} : vector<128x128xf32> to vector<128x1xf32>
    %cst_17 = arith.constant 0.000000e+00 : f32
    %54 = vector.shape_cast %53 : vector<128x1xf32> to vector<128x1xf32>
    %55 = vector.broadcast %54 : vector<128x1xf32> to vector<128x512xf32>
    %56 = vector.broadcast %cst_17 : f32 to vector<128x512xf32>
    %57 = arith.select %52, %55, %56 : vector<128x512xi1>, vector<128x512xf32>
    %58 = arith.addf %49, %57 : vector<128x512xf32>
    %59 = vector.extract_strided_slice %47 {offsets = [0, 1], sizes = [128, 1], strides = [1, 1]} : vector<128x128xi32> to vector<128x1xi32>
    %60 = vector.broadcast %59 : vector<128x1xi32> to vector<128x512xi32>
    %61 = arith.cmpi eq, %48, %60 : vector<128x512xi32>
    %62 = vector.extract_strided_slice %46 {offsets = [0, 1], sizes = [128, 1], strides = [1, 1]} : vector<128x128xf32> to vector<128x1xf32>
    %cst_18 = arith.constant 0.000000e+00 : f32
    %63 = vector.shape_cast %62 : vector<128x1xf32> to vector<128x1xf32>
    %64 = vector.broadcast %63 : vector<128x1xf32> to vector<128x512xf32>
    %65 = vector.broadcast %cst_18 : f32 to vector<128x512xf32>
    %66 = arith.select %61, %64, %65 : vector<128x512xi1>, vector<128x512xf32>
    %67 = arith.addf %58, %66 : vector<128x512xf32>
    %68 = vector.extract_strided_slice %47 {offsets = [0, 2], sizes = [128, 1], strides = [1, 1]} : vector<128x128xi32> to vector<128x1xi32>
    %69 = vector.broadcast %68 : vector<128x1xi32> to vector<128x512xi32>
    %70 = arith.cmpi eq, %48, %69 : vector<128x512xi32>
    %71 = vector.extract_strided_slice %46 {offsets = [0, 2], sizes = [128, 1], strides = [1, 1]} : vector<128x128xf32> to vector<128x1xf32>
    %cst_19 = arith.constant 0.000000e+00 : f32
    %72 = vector.shape_cast %71 : vector<128x1xf32> to vector<128x1xf32>
    %73 = vector.broadcast %72 : vector<128x1xf32> to vector<128x512xf32>
    %74 = vector.broadcast %cst_19 : f32 to vector<128x512xf32>
    %75 = arith.select %70, %73, %74 : vector<128x512xi1>, vector<128x512xf32>
    %76 = arith.addf %67, %75 : vector<128x512xf32>
    %77 = vector.extract_strided_slice %47 {offsets = [0, 3], sizes = [128, 1], strides = [1, 1]} : vector<128x128xi32> to vector<128x1xi32>
    %78 = vector.broadcast %77 : vector<128x1xi32> to vector<128x512xi32>
    %79 = arith.cmpi eq, %48, %78 : vector<128x512xi32>
    %80 = vector.extract_strided_slice %46 {offsets = [0, 3], sizes = [128, 1], strides = [1, 1]} : vector<128x128xf32> to vector<128x1xf32>
    %cst_20 = arith.constant 0.000000e+00 : f32
    %81 = vector.shape_cast %80 : vector<128x1xf32> to vector<128x1xf32>
    %82 = vector.broadcast %81 : vector<128x1xf32> to vector<128x512xf32>
    %83 = vector.broadcast %cst_20 : f32 to vector<128x512xf32>
    %84 = arith.select %79, %82, %83 : vector<128x512xi1>, vector<128x512xf32>
    %85 = arith.addf %76, %84 : vector<128x512xf32>
    %86 = vector.extract_strided_slice %47 {offsets = [0, 4], sizes = [128, 1], strides = [1, 1]} : vector<128x128xi32> to vector<128x1xi32>
    %87 = vector.broadcast %86 : vector<128x1xi32> to vector<128x512xi32>
    %88 = arith.cmpi eq, %48, %87 : vector<128x512xi32>
    %89 = vector.extract_strided_slice %46 {offsets = [0, 4], sizes = [128, 1], strides = [1, 1]} : vector<128x128xf32> to vector<128x1xf32>
    %cst_21 = arith.constant 0.000000e+00 : f32
    %90 = vector.shape_cast %89 : vector<128x1xf32> to vector<128x1xf32>
    %91 = vector.broadcast %90 : vector<128x1xf32> to vector<128x512xf32>
    %92 = vector.broadcast %cst_21 : f32 to vector<128x512xf32>
    %93 = arith.select %88, %91, %92 : vector<128x512xi1>, vector<128x512xf32>
    %94 = arith.addf %85, %93 : vector<128x512xf32>
    %95 = vector.extract_strided_slice %47 {offsets = [0, 5], sizes = [128, 1], strides = [1, 1]} : vector<128x128xi32> to vector<128x1xi32>
    %96 = vector.broadcast %95 : vector<128x1xi32> to vector<128x512xi32>
    %97 = arith.cmpi eq, %48, %96 : vector<128x512xi32>
    %98 = vector.extract_strided_slice %46 {offsets = [0, 5], sizes = [128, 1], strides = [1, 1]} : vector<128x128xf32> to vector<128x1xf32>
    %cst_22 = arith.constant 0.000000e+00 : f32
    %99 = vector.shape_cast %98 : vector<128x1xf32> to vector<128x1xf32>
    %100 = vector.broadcast %99 : vector<128x1xf32> to vector<128x512xf32>
    %101 = vector.broadcast %cst_22 : f32 to vector<128x512xf32>
    %102 = arith.select %97, %100, %101 : vector<128x512xi1>, vector<128x512xf32>
    %103 = arith.addf %94, %102 : vector<128x512xf32>
    %104 = vector.extract_strided_slice %47 {offsets = [0, 6], sizes = [128, 1], strides = [1, 1]} : vector<128x128xi32> to vector<128x1xi32>
    %105 = vector.broadcast %104 : vector<128x1xi32> to vector<128x512xi32>
    %106 = arith.cmpi eq, %48, %105 : vector<128x512xi32>
    %107 = vector.extract_strided_slice %46 {offsets = [0, 6], sizes = [128, 1], strides = [1, 1]} : vector<128x128xf32> to vector<128x1xf32>
    %cst_23 = arith.constant 0.000000e+00 : f32
    %108 = vector.shape_cast %107 : vector<128x1xf32> to vector<128x1xf32>
    %109 = vector.broadcast %108 : vector<128x1xf32> to vector<128x512xf32>
    %110 = vector.broadcast %cst_23 : f32 to vector<128x512xf32>
    %111 = arith.select %106, %109, %110 : vector<128x512xi1>, vector<128x512xf32>
    %112 = arith.addf %103, %111 : vector<128x512xf32>
    %113 = vector.extract_strided_slice %47 {offsets = [0, 7], sizes = [128, 1], strides = [1, 1]} : vector<128x128xi32> to vector<128x1xi32>
    %114 = vector.broadcast %113 : vector<128x1xi32> to vector<128x512xi32>
    %115 = arith.cmpi eq, %48, %114 : vector<128x512xi32>
    %116 = vector.extract_strided_slice %46 {offsets = [0, 7], sizes = [128, 1], strides = [1, 1]} : vector<128x128xf32> to vector<128x1xf32>
    %cst_24 = arith.constant 0.000000e+00 : f32
    %117 = vector.shape_cast %116 : vector<128x1xf32> to vector<128x1xf32>
    %118 = vector.broadcast %117 : vector<128x1xf32> to vector<128x512xf32>
    %119 = vector.broadcast %cst_24 : f32 to vector<128x512xf32>
    %120 = arith.select %115, %118, %119 : vector<128x512xi1>, vector<128x512xf32>
    %121 = arith.addf %112, %120 : vector<128x512xf32>
    %c0_25 = arith.constant 0 : index
    %c0_26 = arith.constant 0 : index
    %122 = vector.load %arg3[%c0_25, %c0_26] : memref<512x128xf32, #tpu.memory_space<vmem>>, vector<512x128xf32>
    %cst_27 = arith.constant dense<0.000000e+00> : vector<128x128xf32>
    %123 = tpu.matmul %121, %122, %cst_27 {dimension_numbers = #tpu.dot_dimension_numbers<[1], [0], [0], [1], [0, 0, 1, 1], [], []>} : vector<128x512xf32>, vector<512x128xf32>, vector<128x128xf32> -> vector<128x128xf32>
    %c0_28 = arith.constant 0 : index
    %c0_29 = arith.constant 0 : index
    %124 = vector.load %arg6[%c0_28, %c0_29] : memref<2x128xf32, #tpu.memory_space<vmem>>, vector<1x128xf32>
    %125 = vector.broadcast %124 : vector<1x128xf32> to vector<128x128xf32>
    %126 = arith.mulf %123, %125 : vector<128x128xf32>
    %c1_30 = arith.constant 1 : index
    %c0_31 = arith.constant 0 : index
    %127 = vector.load %arg6[%c1_30, %c0_31] : memref<2x128xf32, #tpu.memory_space<vmem>>, vector<1x128xf32>
    %128 = vector.broadcast %127 : vector<1x128xf32> to vector<128x128xf32>
    %129 = arith.addf %126, %128 : vector<128x128xf32>
    %cst_32 = arith.constant 0.000000e+00 : f32
    %130 = vector.broadcast %cst_32 : f32 to vector<128x128xf32>
    %131 = arith.maximumf %129, %130 : vector<128x128xf32>
    %c0_33 = arith.constant 0 : index
    %c0_34 = arith.constant 0 : index
    %132 = vector.load %arg8[%c0_33, %c0_34] : memref<128x128xf32, #tpu.memory_space<vmem>>, vector<128x128xf32>
    tpu.vector_store %arg8[%c0_33, %c0_34], %131 {strides = array<i32>} : memref<128x128xf32, #tpu.memory_space<vmem>>, vector<128x128xf32>,
    return
  }
  func.func @transform_0(%arg0: i32) -> (i32, i32) {
    %c0_i32 = arith.constant 0 : i32
    %c0_i32_0 = arith.constant 0 : i32
    return %arg0, %c0_i32 : i32, i32
  }
  func.func @transform_1(%arg0: i32) -> (i32, i32) {
    %c0_i32 = arith.constant 0 : i32
    %c0_i32_0 = arith.constant 0 : i32
    return %arg0, %c0_i32 : i32, i32
  }
  func.func @transform_2(%arg0: i32) -> (i32, i32) {
    %c0_i32 = arith.constant 0 : i32
    %c0_i32_0 = arith.constant 0 : i32
    %c0_i32_1 = arith.constant 0 : i32
    return %c0_i32, %c0_i32_0 : i32, i32
  }
  func.func @transform_3(%arg0: i32) -> (i32, i32) {
    %c0_i32 = arith.constant 0 : i32
    %c0_i32_0 = arith.constant 0 : i32
    %c0_i32_1 = arith.constant 0 : i32
    return %c0_i32, %c0_i32_0 : i32, i32
  }
  func.func @transform_4(%arg0: i32) -> (i32, i32) {
    %c0_i32 = arith.constant 0 : i32
    %c0_i32_0 = arith.constant 0 : i32
    %c0_i32_1 = arith.constant 0 : i32
    return %c0_i32, %c0_i32_0 : i32, i32
  }
  func.func @transform_5(%arg0: i32) -> (i32, i32) {
    %c0_i32 = arith.constant 0 : i32
    %c0_i32_0 = arith.constant 0 : i32
    %c0_i32_1 = arith.constant 0 : i32
    return %c0_i32, %c0_i32_0 : i32, i32
  }
  func.func @transform_6(%arg0: i32) -> (i32, i32) {
    %c0_i32 = arith.constant 0 : i32
    %c0_i32_0 = arith.constant 0 : i32
    return %arg0, %c0_i32 : i32, i32
  }
  func.func @transform_7(%arg0: i32) -> (i32, i32) {
    %c0_i32 = arith.constant 0 : i32
    %c0_i32_0 = arith.constant 0 : i32
    return %arg0, %c0_i32 : i32, i32
  }
}

</mosaic_0001>

<bundles_post_ra>
// kernel: tpu_custom_call.1
= control target key start
LH: loop header
LB: loop body
LE: loop exit
PB: predicated region body
PF: predicated region fallthrough
CT: control target
= control target key end

     0   :  { %s9659_s0 = inlined_call_operand.hbm [shape: f32[512,384], index: 0, kind: input, shape index: {}]   ;;  %s9660_s1 = inlined_call_operand.hbm [shape: s32[512,128], index: 1, kind: input, shape index: {}]   ;;  %s9661_s2 = inlined_call_operand.hbm [shape: f32[512,128], index: 2, kind: input, shape index: {}]   ;;  %s9662_s3 = inlined_call_operand.vmem [shape: f32[1,128], index: 3, kind: input, shape index: {}]   ;;  %s9663_s4 = inlined_call_operand.vmem [shape: f32[2,128], index: 4, kind: input, shape index: {}]   ;;  %s9664_s5 = inlined_call_operand.vmem [shape: f32[2,128], index: 5, kind: input, shape index: {}]   ;;  %s9665_s6 = inlined_call_operand.hbm [shape: f32[512,128], index: 6, kind: output, shape index: {0}]   ;;  %s9666_s7 = inlined_call_operand.hbm [shape: f32[512,128], index: 7, kind: output, shape index: {1}]  }
   0x1   :  { %9871 = sst [smem:[#allocation179_spill]] %s9659_s0 }
   0x2   :  { %9872 = sst [smem:[#allocation180_spill]] %s9661_s2 }
   0x3   :  { %13 = vsyncpa [#allocation3], 0 }
   0x4   :  { %15 = vsyncpa [#allocation3 + $0x1], 0 }
   0x5   :  { %16 = vsyncpa [#allocation6], 0 }
   0x6   :  { %18 = vsyncpa [#allocation6 + $0x1], 0 }
   0x7   :  { %19 = vsyncpa [#allocation4], 0 }
   0x8   :  { %21 = vsyncpa [#allocation4 + $0x1], 0 }
   0x9   :  { %22 = vsyncpa [#allocation10], 0 }
   0xa   :  { %24 = vsyncpa [#allocation10 + $0x1], 0  ;;  %s4911_s24 = smov 0   ;;  %s4913_s25 = smov 0  }
   0xb   :  { %s4915_s26 = smov 0   ;;  %s4917_s27 = smov 0  }
   0xc LB: > { %9873 = sst [smem:[#allocation16_spill]] %s4845_s26  ;;  %s4932_s28 = sadd.s32 4294967295, %s4849_s27   ;;  %s4849_s27 = sphi %s4917_s27, %s10440_s27   ;;  %s4845_s26 = sphi %s4915_s26, %s10442_s26   ;;  %s4841_s25 = sphi %s4913_s25, %s10444_s25   ;;  %s4837_s24 = sphi %s4911_s24, %s10443_s24  }
   0xd   : > { %s4049_s29 = sadd.s32 4294967294, %s4849_s27   ;;  %p50_p0 = scmp.ne.s32.totalorder %s4841_s25, %s4837_s24 }
   0xe   : > { %p9669_p1 = scmp.eq.s32.totalorder %s4932_s28, 0  ;;  %p190_p3 = scmp.eq.s32.totalorder %s4049_s29, 3 }
   0xf   : > { %p4050_p5 = scmp.ge.s32.totalorder %s4849_s27, 1  ;;  %p223_p7 = scmp.lt.s32.totalorder %s4849_s27, 5 }
  0x10   : > { %p4941_p4 = por %p9669_p1, %p50_p0  ;;  %p4946_p6 = por %p190_p3, %p50_p0 }
  0x11   : > { %p4951_p8 = pnand %p4050_p5, %p223_p7  ;;  %s4851_s10 = smov [#allocation7]  }
  0x12   : > { %s9874_s30 = scalar_select %p4941_p4, 1, 0 }
  0x13   : > { %s9875_s8 = scalar_select %p4946_p6, 1, 0 }
  0x14   : > { %s235_s11 = sshll.u32 %s4851_s10, 4  ;;  %p4407_p9 = pneg %p4951_p8  ;;  %s236_s11 = int_to_ptr.vmem [resolvable:$true] %s235_s11 }
  0x15   : > { %s4964_s13 = sadd.s32 1, %s4849_s27   ;;  %s37_s14 = sadd.s32 1, %s4845_s26 }
  0x16   : > { %p4959_p10 = pnand %p4407_p9, %p9669_p1  ;;  %9878 = sst [smem:[#allocation17_spill]] %s4964_s13 }
  0x17   : > { %s34_s15 = ssub.s32 %s4849_s27, %s4964_s13  ;;  %s4676_s16 = scalar_lea.vmem %s236_s11, 8192 }
  0x18   : > { %p4667_p11 = pneg %p4959_p10  ;;  %p4677_p12 = scmp.ne.s32.totalorder %s236_s11, %s4676_s16 }
  0x19   : > { %p4684_p3 = scmp.lt.s32.totalorder %s236_s11, %s236_s11  ;;  %p4685_p5 = scmp.lt.s32.totalorder %s4676_s16, %s4676_s16 }
  0x1a   : > { %p4679_p13 = pnand %p4677_p12, %p4667_p11 }
  0x1b   : > { %p4686_p7 = por %p4685_p5, %p4684_p3 }
  0x1c   : > { %p4680_p0 = pneg %p4679_p13 }
  0x1e   : > { %p4687_p2 = pnand %p4686_p7, %p4680_p0 }
  0x20   : > { %4690 = shalt.err (!%p4687_p2)
}
  0x21   : > { %s9667_s17 = smov 128   ;;  %s9668_s18 = smov 8  }
  0x22   : > { %s9879_s2 = sld [smem:[#allocation180_spill]]  ;;  %p35_p2 = scmp.eq.s32.totalorder %s34_s15, 0 }
  0x23   : > { %p44_p9 = scmp.ne.s32.totalorder %s4845_s26, %s4841_s25  ;;  %p45_p11 = scmp.eq.s32.totalorder %s4849_s27, 0 }
  0x24   : > { %p4426_p12 = scmp.lt.s32.totalorder %s4849_s27, 4  ;;  %p9881_p0 = scmp.eq.s32.totalorder %s4932_s28, 3 }
  0x25   : > { %s4984_s21 = scalar_select %p35_p2, %s4845_s26, %s37_s14  }
  0x26   : > { %p46_p13 = por %p45_p11, %p44_p9  ;;  %p4988_p3 = por %p9881_p0, %p44_p9 }
  0x27   : > { %9880 = sst [smem:[#allocation18_spill]] %s4984_s21  ;;  %s4993_s23 = sand.u32 1, %s4845_s26  }
  0x28   : > { %4410 = dma.hbm_to_vmem [thread:$0]  (!%p4959_p10), %s9879_s2, 8192, %s236_s11, [#allocation6], %s9667_s17, %s9667_s17, %s9668_s18  }
  0x29   : > { %s9882_s22 = scalar_select %p4988_p3, 1, 0 }
  0x2a   : > { %s4393_s29 = smul.u32 6144, %s4849_s27  ;;  %s9883_s0 = sld [smem:[#allocation179_spill]] }
  0x2b   : > { %s4392_s10 = smul.u32 384, %s4993_s23  ;;  %p5002_p10 = pnand %p4426_p12, %p46_p13 }
  0x2c   : > { %s259_s20 = scalar_lea.sflag [#allocation3], %s4993_s23 }
  0x2d   : > { %s262_s16 = scalar_lea.vmem [#allocation2], %s4392_s10  ;;  %p4693_p7 = pneg %p5002_p10 }
  0x2e   : > { %s270_s19 = sshll.u32 %s262_s16, 4  ;;  %s5006_s19 = int_to_ptr.vmem [resolvable:$true] %s270_s19 }
  0x30   : > { %s5000_s15 = scalar_lea.hbm %s9883_s0, %s4393_s29  ;;  %s4696_s11 = scalar_lea.hbm %s9883_s0, 24576 }
  0x31   : > { %s4691_s17 = scalar_lea.hbm %s5000_s15, 6144  ;;  %p4697_p11 = scmp.lt.s32.totalorder %s5000_s15, %s9883_s0 }
  0x32   : > { %p4692_p5 = scmp.ne.s32.totalorder %s5000_s15, %s4691_s17  ;;  %p4698_p12 = scmp.lt.s32.totalorder %s4696_s11, %s4691_s17 }
  0x34   : > { %p4694_p2 = pnand %p4693_p7, %p4692_p5  ;;  %p4699_p13 = por %p4698_p12, %p4697_p11 }
  0x36   : > { %p4695_p9 = pneg %p4694_p2 }
  0x38   : > { %p4700_p0 = pnand %p4699_p13, %p4695_p9 }
  0x3a   : > { %4703 = shalt.err (!%p4700_p0)
}
  0x3b   : > { %s4704_s10 = scalar_lea.vmem %s5006_s19, 6144  ;;  %s4854_s16 = smov [#allocation2]  }
  0x3c   : > { %p4705_p1 = scmp.ne.s32.totalorder %s5006_s19, %s4704_s10  ;;  %s4709_s29 = sshll.u32 %s4854_s16, 4  ;;  %s4710_s29 = int_to_ptr.vmem [resolvable:$false] %s4709_s29 }
  0x3d   : > { %s4711_s12 = scalar_lea.vmem %s4710_s29, 12288  ;;  %p4712_p6 = scmp.lt.s32.totalorder %s5006_s19, %s4710_s29 }
  0x3e   : > { %p4707_p5 = pnand %p4705_p1, %p4693_p7  ;;  %p4713_p3 = scmp.lt.s32.totalorder %s4711_s12, %s4704_s10 }
  0x40   : > { %p4708_p2 = pneg %p4707_p5  ;;  %p4714_p4 = por %p4713_p3, %p4712_p6 }
  0x42   : > { %p4715_p11 = pnand %p4714_p4, %p4708_p2 }
  0x44   : > { %4718 = shalt.err (!%p4715_p11)
}
  0x45   : > { %s4855_s2 = smov 384   ;;  %s4856_s17 = smov 24  }
  0x46   : > { %4414 = dma.hbm_to_vmem [thread:$0]  (!%p5002_p10), %s5000_s15, 6144, %s5006_s19, %s259_s20, %s4855_s2, %s4855_s2, %s4856_s17  }
  0x47   : > { %s280_s18 = sand.u32 1, %s4849_s27   ;;  %s4056_s11 = sshll.u32 %s4993_s23, 7 }
  0x48   : > { %s4109_s16 = sshll.u32 %s4849_s27, 11  ;;  %s284_s10 = scalar_lea.vmem [#allocation5], %s4056_s11 }
  0x49   : > { %s291_s29 = sshll.u32 %s284_s10, 4  ;;  %s5041_s21 = scalar_lea.hbm %s9660_s1, %s4109_s16  ;;  %s5043_s29 = int_to_ptr.vmem [resolvable:$true] %s291_s29 }
  0x4a   : > { %s281_s26 = scalar_lea.sflag [#allocation6], %s280_s18  ;;  %s4719_s13 = scalar_lea.hbm %s5041_s21, 2048 }
  0x4b   : > { %p4720_p1 = scmp.ne.s32.totalorder %s5041_s21, %s4719_s13  ;;  %s4724_s19 = scalar_lea.hbm %s9660_s1, 8192 }
  0x4c   : > { %p4725_p3 = scmp.lt.s32.totalorder %s5041_s21, %s9660_s1  ;;  %p4726_p9 = scmp.lt.s32.totalorder %s4724_s19, %s4719_s13 }
  0x4d   : > { %p4722_p4 = pnand %p4720_p1, %p4693_p7 }
  0x4e   : > { %p4727_p12 = por %p4726_p9, %p4725_p3 }
  0x4f   : > { %p4723_p6 = pneg %p4722_p4 }
  0x51   : > { %p4728_p13 = pnand %p4727_p12, %p4723_p6 }
  0x53   : > { %4731 = shalt.err (!%p4728_p13)
}
  0x54   : > { %s4732_s2 = scalar_lea.vmem %s5043_s29, 2048  ;;  %s4857_s17 = smov [#allocation5]  }
  0x55   : > { %p4733_p0 = scmp.ne.s32.totalorder %s5043_s29, %s4732_s2  ;;  %s4737_s18 = sshll.u32 %s4857_s17, 4  ;;  %s4738_s18 = int_to_ptr.vmem [resolvable:$false] %s4737_s18 }
  0x56   : > { %s4739_s11 = scalar_lea.vmem %s4738_s18, 4096  ;;  %p4740_p11 = scmp.lt.s32.totalorder %s5043_s29, %s4738_s18 }
  0x57   : > { %p4735_p5 = pnand %p4733_p0, %p4693_p7  ;;  %p4741_p1 = scmp.lt.s32.totalorder %s4739_s11, %s4732_s2 }
  0x59   : > { %p4736_p2 = pneg %p4735_p5  ;;  %p4742_p4 = por %p4741_p1, %p4740_p11 }
  0x5b   : > { %p4743_p3 = pnand %p4742_p4, %p4736_p2 }
  0x5d   : > { %4746 = shalt.err (!%p4743_p3)
}
  0x5e   : > { %s9885_s13 = smov 8   ;;  %s9886_s16 = smov 128  }
  0x5f   : > { %4417 = dma.hbm_to_vmem [thread:$0]  (!%p5002_p10), %s5041_s21, 2048, %s5043_s29, %s281_s26, %s9886_s16, %s9886_s16, %s9885_s13  }
  0x60   : > { %303 = sbr.rel (%p4951_p8) target bundleno = 1315 (0x523), region = 44 }
  0x65   : > { %s5073_s10 = sand.u32 1, %s4841_s25   ;;  %p9887_p7 = scmp.ne.s32.totalorder %s9874_s30, 0 }
  0x66   : > { %s4394_s12 = smul.u32 384, %s5073_s10  ;;  %s306_s23 = scalar_lea.sflag [#allocation3], %s5073_s10 }
  0x68   : > { %s5077_s15 = scalar_lea.vmem [#allocation2], %s4394_s12 }
  0x69   : > { %4816 = dma.done.wait (%p9887_p7), %s306_s23, 6144  }
  0x6a   : > { %4818 = vsyncadd (%p9887_p7), %s306_s23, 4294961152  ;;  %s314_s26 = sand.u32 1, %s4932_s28   ;;  %s5085_s9 = sshll.u32 %s5073_s10, 7 }
  0x6b   : > { %s315_s21 = scalar_lea.sflag [#allocation6], %s314_s26  ;;  %s5088_s14 = scalar_lea.vmem [#allocation5], %s5085_s9 }
  0x6c   : > { %4820 = dma.done.wait (%p9887_p7), %s315_s21, 2048  }
  0x6d   : > { %4822 = vsyncadd (%p9887_p7), %s315_s21, 4294965248  ;;  %p9888_p8 = scmp.eq.s32.totalorder %s4932_s28, 0 }
  0x6f   : > { %4824 = dma.done.wait (%p9888_p8), [#allocation6], 8192   ;;  %p9889_p10 = pmov %p9888_p8 }
  0x70   : > { %v415_v0 = vlaneseq  ;;  %v4858_v1 = vmov 0   ;;  %v9679_v2 = vmov 1   ;;  %v373_v4 = vld [vmem:[%s5077_s15 + $0x30] sm:$0xff]  ;;  %v367_v5 = vld [vmem:[%s5077_s15] sm:$0xff]  ;;  %v376_v6 = vld [vmem:[%s5077_s15 + $0x48] sm:$0xff]  ;;  %s5988_s17 = scalar_lea.vmem [#allocation8], %s5085_s9 }
  0x71   : > { %4826 = vsyncadd (%p9889_p10), [#allocation6], 4294959104  ;;  %4477 = vset.pattern.permute.xlu1 %v4858_v1  ;;  %4479 = vset.pattern.permute.xlu0 %v9679_v2  ;;  %vm420_vm1 = vcmp.ge.f32.partialorder %v373_v4, 0.0  ;;  %v436_v7 = vmul.f32 0.01, %v373_v4  ;;  %vm418_vm2 = vcmp.ge.f32.partialorder %v367_v5, 0.0 }
  0x72   : > { %v5101_v3 = vand.u32 127, %v415_v0  ;;  %v434_v8 = vmul.f32 0.01, %v367_v5  ;;  %vm421_vm3 = vcmp.ge.f32.partialorder %v376_v6, 0.0  ;;  %v437_v9 = vmul.f32 0.01, %v376_v6 }
  0x73   : > { %v370_v10 = vld [vmem:[%s5077_s15 + $0x18] sm:$0xff]  ;;  %v379_v12 = vld [vmem:[%s5077_s15 + $0x60] sm:$0xff]  ;;  %v452_v13 = vsel %vm420_vm1, %v373_v4, %v436_v7  ;;  %v388_v16 = vld [vmem:[%s5077_s15 + $0xa8] sm:$0xff]  ;;  %s9497_s12 = scalar_lea.vmem [#allocation9], %s5085_s9  ;;  %s4110_s23 = sshll.u32 %s4932_s28, 11 }
  0x74   : > { %vm417_vm0 = vcmp.lt.s32.totalorder %v5101_v3, 8  ;;  %v382_v11 = vld [vmem:[%s5077_s15 + $0x78] sm:$0xff]  ;;  %v450_v14 = vsel %vm418_vm2, %v367_v5, %v434_v8  ;;  %vm419_vm4 = vcmp.ge.f32.partialorder %v370_v10, 0.0  ;;  %v435_v15 = vmul.f32 0.01, %v370_v10  ;;  %v385_v20 = vld [vmem:[%s5077_s15 + $0x90] sm:$0xff]  ;;  %s9559_s9 = scalar_lea.hbm %s9665_s6, %s4110_s23 }
  0x75   : > { %v5113_v17 = vsel %vm417_vm0, %v452_v13, -1e+30  ;;  %v5117_v18 = vsel %vm417_vm0, %v450_v14, -1e+30  ;;  %v453_v19 = vsel %vm421_vm3, %v376_v6, %v437_v9  ;;  %vm423_vm5 = vcmp.ge.f32.partialorder %v382_v11, 0.0  ;;  %v394_v30 = vld [vmem:[%s5077_s15 + $0xd8] sm:$0xff] }
  0x76   : > { %486 = vmax.xlane.f32.xlu1 %v5113_v17  ;;  %482 = vmax.xlane.f32.xlu0 %v5117_v18  ;;  %v451_v21 = vsel %vm419_vm4, %v370_v10, %v435_v15  ;;  %v439_v22 = vmul.f32 0.01, %v382_v11  ;;  %vm422_vm6 = vcmp.ge.f32.partialorder %v379_v12, 0.0  ;;  %v5124_v23 = vsel %vm417_vm0, %v453_v19, -1e+30  ;;  %v391_v31 = vld [vmem:[%s5077_s15 + $0xc0] sm:$0xff] }
  0x77   : > { %v5128_v24 = vsel %vm417_vm0, %v451_v21, -1e+30  ;;  %v438_v25 = vmul.f32 0.01, %v379_v12  ;;  %v441_v27 = vmul.f32 0.01, %v388_v16 }
  0x78   : > { %v455_v26 = vsel %vm423_vm5, %v382_v11, %v439_v22  ;;  %v440_v28 = vmul.f32 0.01, %v385_v20  ;;  %vm425_vm7 = vcmp.ge.f32.partialorder %v388_v16, 0.0  ;;  %vm424_vm8 = vcmp.ge.f32.partialorder %v385_v20, 0.0  ;;  %v400_v38 = vld [vmem:[%s5077_s15 + $0x108] sm:$0xff]  ;;  %v397_v39 = vld [vmem:[%s5077_s15 + $0xf0] sm:$0xff] }
  0x79   : > { %v454_v29 = vsel %vm422_vm6, %v379_v12, %v438_v25  ;;  %v5136_v32 = vsel %vm417_vm0, %v455_v26, -1e+30  ;;  %v457_v34 = vsel %vm425_vm7, %v388_v16, %v441_v27  ;;  %v443_v36 = vmul.f32 0.01, %v394_v30  ;;  %v406_v46 = vld [vmem:[%s5077_s15 + $0x138] sm:$0xff]  ;;  %v403_v47 = vld [vmem:[%s5077_s15 + $0x120] sm:$0xff] }
  0x7a   : > { %488 = vmax.xlane.f32.xlu1 %v5124_v23  ;;  %484 = vmax.xlane.f32.xlu0 %v5128_v24  ;;  %v5140_v33 = vsel %vm417_vm0, %v454_v29, -1e+30  ;;  %v456_v35 = vsel %vm424_vm8, %v385_v20, %v440_v28  ;;  %v442_v37 = vmul.f32 0.01, %v391_v31  ;;  %vm427_vm9 = vcmp.ge.f32.partialorder %v394_v30, 0.0  ;;  %v412_v54 = vld [vmem:[%s5077_s15 + $0x168] sm:$0xff] }
  0x7b   : > { %vm426_vm10 = vcmp.ge.f32.partialorder %v391_v31, 0.0  ;;  %v5148_v40 = vsel %vm417_vm0, %v457_v34, -1e+30  ;;  %v5152_v41 = vsel %vm417_vm0, %v456_v35, -1e+30  ;;  %v459_v42 = vsel %vm427_vm9, %v394_v30, %v443_v36  ;;  %v409_v55 = vld [vmem:[%s5077_s15 + $0x150] sm:$0xff] }
  0x7c   : > { %v458_v43 = vsel %vm426_vm10, %v391_v31, %v442_v37  ;;  %v445_v44 = vmul.f32 0.01, %v400_v38  ;;  %v444_v45 = vmul.f32 0.01, %v397_v39  ;;  %vm429_vm11 = vcmp.ge.f32.partialorder %v400_v38, 0.0  ;;  %v5201_v8 = vld [vmem:[%s5088_s14 + $0x8] sm:$0xff] }
  0x7d   : > { %vm428_vm12 = vcmp.ge.f32.partialorder %v397_v39, 0.0  ;;  %v5160_v48 = vsel %vm417_vm0, %v459_v42, -1e+30  ;;  %v5164_v49 = vsel %vm417_vm0, %v458_v43, -1e+30  ;;  %vm431_vm13 = vcmp.ge.f32.partialorder %v406_v46, 0.0 }
  0x7e   : > { %492 = vmax.xlane.f32.xlu1 %v5136_v32  ;;  %490 = vmax.xlane.f32.xlu0 %v5140_v33  ;;  %v461_v50 = vsel %vm429_vm11, %v400_v38, %v445_v44  ;;  %v460_v51 = vsel %vm428_vm12, %v397_v39, %v444_v45  ;;  %v447_v52 = vmul.f32 0.01, %v406_v46  ;;  %v446_v53 = vmul.f32 0.01, %v403_v47  ;;  %v5205_v9 = vld [vmem:[%s5088_s14 + $0x10] sm:$0xff]  ;;  %v5209_v10 = vld [vmem:[%s5088_s14 + $0x18] sm:$0xff] }
  0x7f   : > { %vm430_vm14 = vcmp.ge.f32.partialorder %v403_v47, 0.0  ;;  %v5172_v56 = vsel %vm417_vm0, %v461_v50, -1e+30  ;;  %v5176_v57 = vsel %vm417_vm0, %v460_v51, -1e+30  ;;  %vm433_vm15 = vcmp.ge.f32.partialorder %v412_v54, 0.0 }
  0x80   : > { %v463_v58 = vsel %vm431_vm13, %v406_v46, %v447_v52  ;;  %v462_v59 = vsel %vm430_vm14, %v403_v47, %v446_v53  ;;  %v449_v60 = vmul.f32 0.01, %v412_v54  ;;  %v448_v61 = vmul.f32 0.01, %v409_v55  ;;  %v5214_v11 = vld [vmem:[%s5088_s14 + $0x20] sm:$0xff]  ;;  %v5219_v12 = vld [vmem:[%s5088_s14 + $0x30] sm:$0xff] }
  0x81   : > { %vm432_vm1 = vcmp.ge.f32.partialorder %v409_v55, 0.0  ;;  %v5182_v62 = vsel %vm417_vm0, %v463_v58, -1e+30  ;;  %v5186_v63 = vsel %vm417_vm0, %v462_v59, -1e+30  ;;  %v5222_v13 = vld [vmem:[%s5088_s14 + $0x28] sm:$0xff] }
  0x82   : > { %496 = vmax.xlane.f32.xlu1 %v5148_v40  ;;  %494 = vmax.xlane.f32.xlu0 %v5152_v41  ;;  %v465_v4 = vsel %vm433_vm15, %v412_v54, %v449_v60  ;;  %v464_v5 = vsel %vm432_vm1, %v409_v55, %v448_v61  ;;  %v5227_v14 = vld [vmem:[%s5088_s14 + $0x40] sm:$0xff]  ;;  %v5232_v15 = vld [vmem:[%s5088_s14 + $0x50] sm:$0xff]  ;;  %v5235_v16 = vld [vmem:[%s5088_s14 + $0x38] sm:$0xff]  ;;  %v9677_v22 = vmov 2   ;;  %s3896_s21 = sshll.u32 %s5988_s17, 4  ;;  %p10438_p9 = scmp.ne.s32.totalorder %s9882_s22, 0  ;;  %s9562_s21 = int_to_ptr.vmem [resolvable:$true] %s3896_s21 }
  0x83   : > { %v5192_v6 = vsel %vm417_vm0, %v465_v4, -1e+30  ;;  %v5196_v7 = vsel %vm417_vm0, %v464_v5, -1e+30  ;;  %v5240_v19 = vld [vmem:[%s5088_s14 + $0x60] sm:$0xff]  ;;  %v5245_v20 = vld [vmem:[%s5088_s14 + $0x70] sm:$0xff] }
  0x84   : > { %v5250_v21 = vld [vmem:[%s5088_s14] sm:$0xff]  ;;  %v5265_v25 = vld [vmem:[%s5088_s14 + $0x48] sm:$0xff]  ;;  %v5269_v26 = vld [vmem:[%s5088_s14 + $0x58] sm:$0xff]  ;;  %s4747_s30 = scalar_lea.vmem %s9562_s21, 2048  ;;  %s4867_s29 = smov [#allocation8]  }
  0x85   : > { %v5273_v27 = vld [vmem:[%s5088_s14 + $0x68] sm:$0xff]  ;;  %v5277_v28 = vld [vmem:[%s5088_s14 + $0x78] sm:$0xff]  ;;  %p4748_p6 = scmp.ne.s32.totalorder %s9562_s21, %s4747_s30  ;;  %s4751_s19 = sshll.u32 %s4867_s29, 4  ;;  %s4752_s19 = int_to_ptr.vmem [resolvable:$false] %s4751_s19 }
  0x86   : > { %500 = vmax.xlane.f32.xlu1 %v5160_v48  ;;  %498 = vmax.xlane.f32.xlu0 %v5164_v49  ;;  %s4753_s20 = scalar_lea.vmem %s4752_s19, 4096  ;;  %p4754_p0 = scmp.lt.s32.totalorder %s9562_s21, %s4752_s19 }
  0x87   : > { %p4749_p12 = pnand %p4748_p6, %p10438_p9  ;;  %p4755_p5 = scmp.lt.s32.totalorder %s4753_s20, %s4747_s30 }
  0x89   : > { %p4750_p13 = pneg %p4749_p12  ;;  %p4756_p2 = por %p4755_p5, %p4754_p0 }
  0x8a   : > { %504 = vmax.xlane.f32.xlu1 %v5172_v56  ;;  %502 = vmax.xlane.f32.xlu0 %v5176_v57 }
  0x8b   : > { %p4757_p11 = pnand %p4756_p2, %p4750_p13 }
  0x8e   : > { %508 = vmax.xlane.f32.xlu1 %v5182_v62  ;;  %506 = vmax.xlane.f32.xlu0 %v5186_v63 }
  0x92   : > { %512 = vmax.xlane.f32.xlu1 %v5192_v6  ;;  %510 = vmax.xlane.f32.xlu0 %v5196_v7 }
  0xa3   : > { %1005 = vperm.xlu1 %4477, %v5201_v8  }
  0xa7   : > { %1008 = vperm.xlu1 %4477, %v5205_v9  }
  0xa8   : > { %1325 = vperm.xlu0 %4479, %v5201_v8  }
  0xab   : > { %1011 = vperm.xlu1 %4477, %v5209_v10  }
  0xac   : > { %1334 = vperm.xlu0 %4479, %v5214_v11  }
  0xaf   : > { %1014 = vperm.xlu1 %4477, %v5214_v11  }
  0xb0   : > { %1340 = vperm.xlu0 %4479, %v5219_v12  }
  0xb3   : > { %1017 = vperm.xlu1 %4477, %v5222_v13  }
  0xb4   : > { %1346 = vperm.xlu0 %4479, %v5227_v14  }
  0xb7   : > { %1020 = vperm.xlu1 %4477, %v5219_v12  }
  0xb8   : > { %1352 = vperm.xlu0 %4479, %v5232_v15  }
  0xbb   : > { %1023 = vperm.xlu1 %4477, %v5235_v16  }
  0xbc   : > { %1358 = vperm.xlu0 %4479, %v5240_v19  }
  0xbf   : > { %1026 = vperm.xlu1 %4477, %v5227_v14  }
  0xc0   : > { %1364 = vperm.xlu0 %4479, %v5245_v20  }
  0xc3   : > { %1032 = vperm.xlu1 %4477, %v5232_v15  }
  0xc4   : > { %4480 = vset.pattern.permute.xlu0 %v9677_v22 }
  0xc5   : > { %1626 = vperm.xlu0 %4480, %v5250_v21  }
  0xc7   : > { %1038 = vperm.xlu1 %4477, %v5240_v19  }
  0xc9   : > { %1635 = vperm.xlu0 %4480, %v5209_v10  }
  0xcb   : > { %1044 = vperm.xlu1 %4477, %v5245_v20  }
  0xcd   : > { %1641 = vperm.xlu0 %4480, %v5222_v13  }
  0xcf   : > { %4478 = vset.pattern.permute.xlu1 %v9679_v2 }
  0xd0   : > { %1322 = vperm.xlu1 %4478, %v5250_v21  }
  0xd4   : > { %1328 = vperm.xlu1 %4478, %v5205_v9  }
  0xd8   : > { %1331 = vperm.xlu1 %4478, %v5209_v10  }
  0xdc   : > { %1337 = vperm.xlu1 %4478, %v5222_v13  }
  0xe0   : > { %1343 = vperm.xlu1 %4478, %v5235_v16  }
  0xe4   : > { %1349 = vperm.xlu1 %4478, %v5265_v25  }
  0xe8   : > { %1355 = vperm.xlu1 %4478, %v5269_v26  }
  0xec   : > { %1361 = vperm.xlu1 %4478, %v5273_v27  }
  0xf0   : > { %1367 = vperm.xlu1 %4478, %v5277_v28  }
  0xf4   : > { %4481 = vset.pattern.permute.xlu1 %v9677_v22  ;;  %v369_v22 = vld [vmem:[%s5077_s15 + $0x10] sm:$0xff] }
  0xf5   : > { %1629 = vperm.xlu1 %4481, %v5201_v8  }
  0xf9   : > { %1632 = vperm.xlu1 %4481, %v5205_v9  }
  0xfd   : > { %1638 = vperm.xlu1 %4481, %v5214_v11  }
  0xff   : > { %v487_v29 = vpop.xlane.xlu1 %486  ;;  %v483_v30 = vpop.xlane.xlu0 %482 }
 0x100   : > { %v516_v31 = vsub.f32 %v5113_v17, %v487_v29  ;;  %v514_v34 = vsub.f32 %v5117_v18, %v483_v30 }
 0x102   : > { %v530_v35 = vmul.f32 1.442695, %v514_v34  ;;  %v534_v36 = vmul.f32 1.442695, %v516_v31  ;;  %v5303_v34 = vshrl.u32 %v415_v0, 7 }
 0x103   : > { %v489_v37 = vpop.xlane.xlu1 %488  ;;  %v485_v38 = vpop.xlane.xlu0 %484 }
 0x104   : > { %4542 = vpow2.f32 %v530_v35  ;;  %v515_v45 = vsub.f32 %v5128_v24, %v485_v38  ;;  %v517_v50 = vsub.f32 %v5124_v23, %v489_v37  ;;  %v5310_v37 = vadd.s32 1, %v5101_v3 }
 0x105   : > { %4544 = vpow2.f32 %v534_v36  ;;  %v674_v36 = vadd.s32 120, %v5303_v34  ;;  %v673_v0 = vadd.s32 112, %v5303_v34 }
 0x106   : > { %v532_v51 = vmul.f32 1.442695, %v515_v45  ;;  %v536_v54 = vmul.f32 1.442695, %v517_v50  ;;  %v671_v50 = vadd.s32 96, %v5303_v34  ;;  %vm676_vm1 = vcmp.eq.s32.totalorder %v5303_v34, %v5310_v37 }
 0x107   : > { %v493_v39 = vpop.xlane.xlu1 %492  ;;  %v491_v42 = vpop.xlane.xlu0 %490  ;;  %vm691_vm0 = vcmp.eq.s32.totalorder %v674_v36, %v5310_v37  ;;  %vm690_vm2 = vcmp.eq.s32.totalorder %v673_v0, %v5310_v37  ;;  %v662_v36 = vadd.s32 24, %v5303_v34 }
 0x108   : > { %v518_v43 = vsub.f32 %v5140_v33, %v491_v42  ;;  %v519_v55 = vsub.f32 %v5136_v32, %v493_v39  ;;  %vm688_vm4 = vcmp.eq.s32.totalorder %v671_v50, %v5310_v37 }
 0x109   : > { %vm679_vm13 = vcmp.eq.s32.totalorder %v662_v36, %v5310_v37 }
 0x10a   : > { %v538_v44 = vmul.f32 1.442695, %v518_v43  ;;  %v540_v60 = vmul.f32 1.442695, %v519_v55  ;;  %v669_v55 = vadd.s32 80, %v5303_v34 }
 0x10b   : > { %v497_v46 = vpop.xlane.xlu1 %496  ;;  %v495_v47 = vpop.xlane.xlu0 %494 }
 0x10c   : > { %v520_v17 = vsub.f32 %v5152_v41, %v495_v47  ;;  %4546 = vpow2.f32 %v538_v44  ;;  %v521_v61 = vsub.f32 %v5148_v40, %v497_v46  ;;  %v4861_v44 = vmov 1.0  }
 0x10d   : > { %4304 = vmatprep.subr.msk.mxu0 %vm691_vm0, %v4861_v44  ;;  %vm686_vm6 = vcmp.eq.s32.totalorder %v669_v55, %v5310_v37 }
 0x10e   : > { %v542_v18 = vmul.f32 1.442695, %v520_v17  ;;  %v544_v5 = vmul.f32 1.442695, %v521_v61  ;;  %4305 = vmatpush3.msk.msra.mxu0 %vm691_vm0, %v4861_v44  ;;  %v666_v61 = vadd.s32 56, %v5303_v34 }
 0x10f   : > { %v501_v52 = vpop.xlane.xlu1 %500  ;;  %v499_v53 = vpop.xlane.xlu0 %498  ;;  %4306 = vmatprep.subr.msk.mxu0 %vm690_vm2, %v4861_v44 }
 0x110   : > { %v522_v58 = vsub.f32 %v5164_v49, %v499_v53  ;;  %4548 = vpow2.f32 %v542_v18  ;;  %v523_v29 = vsub.f32 %v5160_v48, %v501_v52  ;;  %4307 = vmatpush3.msk.msra.mxu0 %vm690_vm2, %v4861_v44  ;;  %vm683_vm9 = vcmp.eq.s32.totalorder %v666_v61, %v5310_v37 }
 0x111   : > { %v5292_v33 = vpop.eup %4542  ;;  %4550 = vpow2.f32 %v532_v51 }
 0x112   : > { %v546_v24 = vmul.f32 1.442695, %v522_v58  ;;  %562 = vadd.xlane.f32.xlu0 %v5292_v33  ;;  %v5295_v41 = vpop.eup %4544  ;;  %4552 = vpow2.f32 %v536_v54  ;;  %v548_v48 = vmul.f32 1.442695, %v523_v29  ;;  %v668_v58 = vadd.s32 72, %v5303_v34 }
 0x113   : > { %v505_v23 = vpop.xlane.xlu1 %504  ;;  %v503_v59 = vpop.xlane.xlu0 %502  ;;  %v664_v29 = vadd.s32 40, %v5303_v34 }
 0x114   : > { %v524_v4 = vsub.f32 %v5176_v57, %v503_v59  ;;  %4554 = vpow2.f32 %v546_v24  ;;  %v525_v38 = vsub.f32 %v5172_v56, %v505_v23  ;;  %v672_v56 = vadd.s32 104, %v5303_v34 }
 0x115   : > { %4556 = vpow2.f32 %v540_v60  ;;  %v667_v60 = vadd.s32 64, %v5303_v34  ;;  %vm685_vm7 = vcmp.eq.s32.totalorder %v668_v58, %v5310_v37  ;;  %vm681_vm11 = vcmp.eq.s32.totalorder %v664_v29, %v5310_v37 }
 0x116   : > { %v550_v32 = vmul.f32 1.442695, %v524_v4  ;;  %566 = vadd.xlane.f32.xlu0 %v5295_v41  ;;  %v552_v45 = vmul.f32 1.442695, %v525_v38  ;;  %vm689_vm3 = vcmp.eq.s32.totalorder %v672_v56, %v5310_v37 }
 0x117   : > { %v507_v49 = vpop.xlane.xlu0 %506  ;;  %v509_v30 = vpop.xlane.xlu1 %508  ;;  %4308 = vmatprep.subr.msk.mxu0 %vm689_vm3, %v4861_v44  ;;  %vm684_vm8 = vcmp.eq.s32.totalorder %v667_v60, %v5310_v37 }
 0x118   : > { %v526_v31 = vsub.f32 %v5186_v63, %v507_v49  ;;  %4558 = vpow2.f32 %v550_v32  ;;  %v527_v47 = vsub.f32 %v5182_v62, %v509_v30  ;;  %4309 = vmatpush3.msk.msra.mxu0 %vm689_vm3, %v4861_v44  ;;  %v670_v62 = vadd.s32 88, %v5303_v34 }
 0x119   : > { %v5305_v35 = vpop.eup %4546  ;;  %4560 = vpow2.f32 %v544_v5  ;;  %4310 = vmatprep.subr.msk.mxu0 %vm688_vm4, %v4861_v44  ;;  %v665_v49 = vadd.s32 48, %v5303_v34 }
 0x11a   : > { %v554_v40 = vmul.f32 1.442695, %v526_v31  ;;  %570 = vadd.xlane.f32.xlu0 %v5305_v35  ;;  %v556_v52 = vmul.f32 1.442695, %v527_v47  ;;  %4311 = vmatpush3.msk.msra.mxu0 %vm688_vm4, %v4861_v44  ;;  %vm687_vm5 = vcmp.eq.s32.totalorder %v670_v62, %v5310_v37  ;;  %v663_v31 = vadd.s32 32, %v5303_v34 }
 0x11b   : > { %v511_v57 = vpop.xlane.xlu0 %510  ;;  %v513_v42 = vpop.xlane.xlu1 %512  ;;  %4312 = vmatprep.subr.msk.mxu0 %vm687_vm5, %v4861_v44  ;;  %vm682_vm10 = vcmp.eq.s32.totalorder %v665_v49, %v5310_v37 }
 0x11c   : > { %v528_v63 = vsub.f32 %v5196_v7, %v511_v57  ;;  %4562 = vpow2.f32 %v554_v40  ;;  %v529_v53 = vsub.f32 %v5192_v6, %v513_v42  ;;  %4313 = vmatpush3.msk.msra.mxu0 %vm687_vm5, %v4861_v44  ;;  %vm680_vm12 = vcmp.eq.s32.totalorder %v663_v31, %v5310_v37 }
 0x11d   : > { %v5316_v39 = vpop.eup %4548  ;;  %4564 = vpow2.f32 %v548_v48  ;;  %4314 = vmatprep.subr.msk.mxu0 %vm686_vm6, %v4861_v44  ;;  %v661_v48 = vadd.s32 16, %v5303_v34 }
 0x11e   : > { %v558_v43 = vmul.f32 1.442695, %v528_v63  ;;  %574 = vadd.xlane.f32.xlu0 %v5316_v39  ;;  %v5323_v7 = vpop.eup %4550  ;;  %v560_v6 = vmul.f32 1.442695, %v529_v53  ;;  %4315 = vmatpush3.msk.msra.mxu0 %vm686_vm6, %v4861_v44  ;;  %v660_v63 = vadd.s32 8, %v5303_v34 }
 0x11f   : > { %v5326_v46 = vpop.eup %4552  ;;  %v5340_v18 = vpop.permute.xlu1 %1005  ;;  %4316 = vmatprep.subr.msk.mxu0 %vm685_vm7, %v4861_v44  ;;  %vm678_vm14 = vcmp.eq.s32.totalorder %v661_v48, %v5310_v37 }
 0x120   : > { %4566 = vpow2.f32 %v558_v43  ;;  %4317 = vmatpush3.msk.msra.mxu0 %vm685_vm7, %v4861_v44  ;;  %vm677_vm15 = vcmp.eq.s32.totalorder %v660_v63, %v5310_v37  ;;  %v9675_v37 = vmov 3   ;;  %v5522_v63 = vld [vmem:[%s9662_s3] ss:$0 sm:$0xff] }
 0x121   : > { %564 = vadd.xlane.f32.xlu1 %v5323_v7  ;;  %v5333_v17 = vpop.eup %4554  ;;  %4568 = vpow2.f32 %v552_v45  ;;  %4318 = vmatprep.subr.msk.mxu0 %vm684_vm8, %v4861_v44 }
 0x122   : > { %578 = vadd.xlane.f32.xlu0 %v5333_v17  ;;  %v5343_v51 = vpop.eup %4556  ;;  %4570 = vpow2.f32 %v556_v52  ;;  %4319 = vmatpush3.msk.msra.mxu0 %vm684_vm8, %v4861_v44 }
 0x123   : > { %v5361_v59 = vpop.permute.xlu1 %1008  ;;  %4572 = vpow2.f32 %v560_v6  ;;  %4320 = vmatprep.subr.msk.mxu0 %vm683_vm9, %v4861_v44  ;;  %v5456_v47 = vpop.permute.xlu0 %1325 }
 0x124   : > { %4321 = vmatpush3.msk.msra.mxu0 %vm683_vm9, %v4861_v44  ;;  %vm1057_vm0 = vcmp.eq.s32.totalorder %v5101_v3, %v5361_v59 }
 0x125   : > { %568 = vadd.xlane.f32.xlu1 %v5326_v46  ;;  %v5347_v54 = vpop.eup %4558  ;;  %4322 = vmatprep.subr.msk.mxu0 %vm682_vm10, %v4861_v44 }
 0x126   : > { %582 = vadd.xlane.f32.xlu0 %v5347_v54  ;;  %v5356_v24 = vpop.eup %4560  ;;  %4323 = vmatpush3.msk.msra.mxu0 %vm682_vm10, %v4861_v44 }
 0x127   : > { %v5380_v5 = vpop.permute.xlu1 %1011  ;;  %4324 = vmatprep.subr.msk.mxu0 %vm681_vm11, %v4861_v44 }
 0x128   : > { %4325 = vmatpush3.msk.msra.mxu0 %vm681_vm11, %v4861_v44 }
 0x129   : > { %572 = vadd.xlane.f32.xlu1 %v5343_v51  ;;  %v5359_v23 = vpop.eup %4562  ;;  %4326 = vmatprep.subr.msk.mxu0 %vm680_vm12, %v4861_v44 }
 0x12a   : > { %586 = vadd.xlane.f32.xlu0 %v5359_v23  ;;  %v5370_v4 = vpop.eup %4564  ;;  %4327 = vmatpush3.msk.msra.mxu0 %vm680_vm12, %v4861_v44 }
 0x12b   : > { %v5397_v57 = vpop.permute.xlu1 %1014  ;;  %4328 = vmatprep.subr.msk.mxu0 %vm679_vm13, %v4861_v44 }
 0x12c   : > { %4329 = vmatpush3.msk.msra.mxu0 %vm679_vm13, %v4861_v44  ;;  %vm1065_vm8 = vcmp.eq.s32.totalorder %v5101_v3, %v5397_v57 }
 0x12d   : > { %576 = vadd.xlane.f32.xlu1 %v5356_v24  ;;  %v5373_v32 = vpop.eup %4566  ;;  %4330 = vmatprep.subr.msk.mxu0 %vm678_vm14, %v4861_v44 }
 0x12e   : > { %590 = vadd.xlane.f32.xlu0 %v5373_v32  ;;  %v5386_v30 = vpop.eup %4568  ;;  %4331 = vmatpush3.msk.msra.mxu0 %vm678_vm14, %v4861_v44 }
 0x12f   : > { %v5395_v40 = vpop.eup %4570  ;;  %v5412_v0 = vpop.permute.xlu1 %1017  ;;  %4332 = vmatprep.subr.msk.mxu0 %vm677_vm15, %v4861_v44 }
 0x130   : > { %v5406_v38 = vpop.eup %4572  ;;  %4333 = vmatpush3.msk.msra.mxu0 %vm677_vm15, %v4861_v44 }
 0x131   : > { %580 = vadd.xlane.f32.xlu1 %v5370_v4  ;;  %4334 = vmatprep.subr.msk.mxu0 %vm676_vm1, %v4861_v44 }
 0x132   : > { %4335 = vmatpush3.msk.msra.mxu0 %vm676_vm1, %v4861_v44 }
 0x133   : > { %v5424_v42 = vpop.permute.xlu1 %1020 }
 0x135   : > { %584 = vadd.xlane.f32.xlu1 %v5386_v30 }
 0x137   : > { %v5431_v43 = vpop.permute.xlu1 %1023 }
 0x139   : > { %588 = vadd.xlane.f32.xlu1 %v5395_v40 }
 0x13b   : > { %v5435_v56 = vpop.permute.xlu1 %1026 }
 0x13c   : > { %9890 = vst [vmem:[#allocation19_spill] sm:$0xff] %v5435_v56  ;;  %vm1081_vm11 = vcmp.eq.s32.totalorder %v5101_v3, %v5435_v56 }
 0x13d   : > { %592 = vadd.xlane.f32.xlu1 %v5406_v38 }
 0x13f   : > { %v5440_v34 = vpop.permute.xlu1 %1032 }
 0x140   : > { %9891 = vst [vmem:[#allocation20_spill] sm:$0xff] %v5440_v34  ;;  %v384_v34 = vld [vmem:[%s5077_s15 + $0x88] sm:$0xff] }
 0x143   : > { %v5445_v44 = vpop.permute.xlu1 %1038 }
 0x144   : > { %1647 = vperm.xlu0 %4480, %v5235_v16   ;;  %9892 = vst [vmem:[#allocation21_spill] sm:$0xff] %v5445_v44 }
 0x147   : > { %v5451_v45 = vpop.permute.xlu1 %1044 }
 0x148   : > { %1653 = vperm.xlu0 %4480, %v5265_v25   ;;  %9893 = vst [vmem:[#allocation22_spill] sm:$0xff] %v5451_v45 }
 0x14b   : > { %v5458_v50 = vpop.permute.xlu1 %1322 }
 0x14c   : > { %1659 = vperm.xlu0 %4480, %v5269_v26   ;;  %9894 = vst [vmem:[#allocation23_spill] sm:$0xff] %v5458_v50 }
 0x14e   : > { %1644 = vperm.xlu1 %4481, %v5219_v12  }
 0x150   : > { %1665 = vperm.xlu0 %4480, %v5273_v27  }
 0x152   : > { %1650 = vperm.xlu1 %4481, %v5227_v14  }
 0x154   : > { %1671 = vperm.xlu0 %4480, %v5277_v28  }
 0x156   : > { %1656 = vperm.xlu1 %4481, %v5232_v15  }
 0x158   : > { %4483 = vset.pattern.permute.xlu0 %v9675_v37 }
 0x159   : > { %1933 = vperm.xlu0 %4483, %v5201_v8   ;;  %v5462_v8 = vpop.permute.xlu0 %1334 }
 0x15a   : > { %1662 = vperm.xlu1 %4481, %v5240_v19   ;;  %9895 = vst [vmem:[#allocation24_spill] sm:$0xff] %v5462_v8  ;;  %v414_v8 = vld [vmem:[%s5077_s15 + $0x178] sm:$0xff] }
 0x15d   : > { %1942 = vperm.xlu0 %4483, %v5214_v11   ;;  %v5466_v11 = vpop.permute.xlu1 %1328 }
 0x15e   : > { %1668 = vperm.xlu1 %4481, %v5245_v20   ;;  %9896 = vst [vmem:[#allocation25_spill] sm:$0xff] %v5466_v11  ;;  %v5820_v11 = vld [vmem:[%s5088_s14 + $0x20] sm:$0xff] }
 0x161   : > { %1948 = vperm.xlu0 %4483, %v5219_v12   ;;  %v5470_v12 = vpop.permute.xlu0 %1340  ;;  %v5472_v62 = vpop.permute.xlu1 %1331 }
 0x162   : > { %4482 = vset.pattern.permute.xlu1 %v9675_v37  ;;  %9897 = vst [vmem:[#allocation26_spill] sm:$0xff] %v5470_v12  ;;  %9898 = vst [vmem:[#allocation27_spill] sm:$0xff] %v5472_v62 }
 0x163   : > { %1930 = vperm.xlu1 %4482, %v5250_v21  }
 0x165   : > { %1954 = vperm.xlu0 %4483, %v5227_v14  }
 0x167   : > { %1936 = vperm.xlu1 %4482, %v5205_v9   ;;  %v5476_v9 = vpop.permute.xlu0 %1346 }
 0x168   : > { %9899 = vst [vmem:[#allocation28_spill] sm:$0xff] %v5476_v9  ;;  %v9922_v9 = vmov 1  }
 0x169   : > { %1960 = vperm.xlu0 %4483, %v5232_v15  }
 0x16b   : > { %1939 = vperm.xlu1 %4482, %v5209_v10   ;;  %v5481_v10 = vpop.permute.xlu1 %1337 }
 0x16c   : > { %9900 = vst [vmem:[#allocation29_spill] sm:$0xff] %v5481_v10 }
 0x16d   : > { %1966 = vperm.xlu0 %4483, %v5240_v19  }
 0x16f   : > { %1945 = vperm.xlu1 %4482, %v5222_v13   ;;  %v5485_v13 = vpop.permute.xlu0 %1352  ;;  %v5487_v14 = vpop.permute.xlu1 %1343 }
 0x170   : > { %9901 = vst [vmem:[#allocation30_spill] sm:$0xff] %v5485_v13  ;;  %9902 = vst [vmem:[#allocation31_spill] sm:$0xff] %v5487_v14  ;;  %v5829_v14 = vld [vmem:[%s5088_s14 + $0x30] sm:$0xff] }
 0x171   : > { %1972 = vperm.xlu0 %4483, %v5245_v20  }
 0x173   : > { %1951 = vperm.xlu1 %4482, %v5235_v16   ;;  %v5491_v15 = vpop.permute.xlu0 %1358  ;;  %v5495_v16 = vpop.permute.xlu1 %1349 }
 0x174   : > { %9903 = vst [vmem:[#allocation32_spill] sm:$0xff] %v5491_v15  ;;  %9904 = vst [vmem:[#allocation33_spill] sm:$0xff] %v5495_v16 }
 0x175   : > { %4484 = vset.pattern.permute.xlu0 %v4858_v1 }
 0x176   : > { %1002 = vperm.xlu0 %4484, %v5250_v21  }
 0x177   : > { %1957 = vperm.xlu1 %4482, %v5265_v25   ;;  %v5499_v19 = vpop.permute.xlu0 %1364  ;;  %v5501_v20 = vpop.permute.xlu1 %1355 }
 0x178   : > { %9905 = vst [vmem:[#allocation34_spill] sm:$0xff] %v5499_v19  ;;  %9906 = vst [vmem:[#allocation35_spill] sm:$0xff] %v5501_v20 }
 0x17a   : > { %1029 = vperm.xlu0 %4484, %v5265_v25  }
 0x17b   : > { %1963 = vperm.xlu1 %4482, %v5269_v26   ;;  %v5503_v52 = vpop.permute.xlu0 %1626  ;;  %v5505_v53 = vpop.permute.xlu1 %1361 }
 0x17c   : > { %9907 = vst [vmem:[#allocation36_spill] sm:$0xff] %v5503_v52  ;;  %9908 = vst [vmem:[#allocation37_spill] sm:$0xff] %v5505_v53 }
 0x17e   : > { %1035 = vperm.xlu0 %4484, %v5269_v26  }
 0x17f   : > { %1969 = vperm.xlu1 %4482, %v5273_v27   ;;  %v5507_v55 = vpop.permute.xlu0 %1635  ;;  %v5509_v58 = vpop.permute.xlu1 %1367 }
 0x180   : > { %9909 = vst [vmem:[#allocation38_spill] sm:$0xff] %v5507_v55  ;;  %9910 = vst [vmem:[#allocation39_spill] sm:$0xff] %v5509_v58 }
 0x182   : > { %1041 = vperm.xlu0 %4484, %v5273_v27  }
 0x183   : > { %1975 = vperm.xlu1 %4482, %v5277_v28   ;;  %v5511_v6 = vpop.permute.xlu0 %1641  ;;  %v5513_v60 = vpop.permute.xlu1 %1629 }
 0x184   : > { %9911 = vst [vmem:[#allocation40_spill] sm:$0xff] %v5511_v6  ;;  %9912 = vst [vmem:[#allocation41_spill] sm:$0xff] %v5513_v60  ;;  %v387_v6 = vld [vmem:[%s5077_s15 + $0xa0] sm:$0xff] }
 0x186   : > { %1047 = vperm.xlu0 %4484, %v5277_v28  }
 0x187   : > { %4485 = vset.pattern.permute.xlu1 %v4858_v1  ;;  %v5515_v61 = vpop.permute.xlu1 %1632 }
 0x188   : > { %9913 = vst [vmem:[#allocation42_spill] sm:$0xff] %v5515_v61  ;;  %v405_v61 = vld [vmem:[%s5077_s15 + $0x130] sm:$0xff] }
 0x18b   : > { %v5517_v31 = vpop.permute.xlu1 %1638 }
 0x18c   : > { %9914 = vst [vmem:[#allocation43_spill] sm:$0xff] %v5517_v31 }
 0x19b   : > { %v563_v1 = vpop.xlane.xlu0 %562 }
 0x19c   : > { %4574 = vrcp.f32 %v563_v1 }
 0x19f   : > { %v567_v49 = vpop.xlane.xlu0 %566 }
 0x1a0   : > { %4576 = vrcp.f32 %v567_v49 }
 0x1a3   : > { %v571_v29 = vpop.xlane.xlu0 %570 }
 0x1a4   : > { %4578 = vrcp.f32 %v571_v29 }
 0x1a7   : > { %v575_v36 = vpop.xlane.xlu0 %574 }
 0x1a8   : > { %4580 = vrcp.f32 %v575_v36 }
 0x1a9   : > { %v4575_v48 = vpop.eup %4574 }
 0x1aa   : > { %v565_v37 = vpop.xlane.xlu1 %564  ;;  %v5526_v1 = vmul.f32 %v4575_v48, %v5292_v33 }
 0x1ab   : > { %4582 = vrcp.f32 %v565_v37  ;;  %v579_v2 = vpop.xlane.xlu0 %578 }
 0x1ac   : > { %v5530_v49 = vmul.f32 %v5522_v63, %v5526_v1  ;;  %4584 = vrcp.f32 %v579_v2  ;;  %v642_v29 = vmul.f32 %v5526_v1, %v369_v22 }
 0x1ad   : > { %v4577_v36 = vpop.eup %4576 }
 0x1ae   : > { %v569_v58 = vpop.xlane.xlu1 %568  ;;  %v5534_v45 = vmul.f32 %v4577_v36, %v5295_v41  ;;  %1115 = vperm.xlu1 %4485, %v5530_v49   ;;  %4336 = vmatprep.mubr.f32.mxu0 %v642_v29 }
 0x1af   : > { %4586 = vrcp.f32 %v569_v58  ;;  %v583_v33 = vpop.xlane.xlu0 %582 }
 0x1b0   : > { %v5539_v37 = vmul.f32 %v5522_v63, %v5534_v45  ;;  %4588 = vrcp.f32 %v583_v33 }
 0x1b1   : > { %v4579_v48 = vpop.eup %4578 }
 0x1b2   : > { %v573_v2 = vpop.xlane.xlu1 %572  ;;  %v5542_v22 = vmul.f32 %v4579_v48, %v5305_v35  ;;  %1125 = vperm.xlu1 %4485, %v5539_v37  }
 0x1b3   : > { %4590 = vrcp.f32 %v573_v2  ;;  %v587_v41 = vpop.xlane.xlu0 %586  ;;  %v372_v2 = vld [vmem:[%s5077_s15 + $0x28] sm:$0xff] }
 0x1b4   : > { %v5547_v58 = vmul.f32 %v5522_v63, %v5542_v22  ;;  %4592 = vrcp.f32 %v587_v41  ;;  %v375_v41 = vld [vmem:[%s5077_s15 + $0x40] sm:$0xff] }
 0x1b5   : > { %v4581_v29 = vpop.eup %4580 }
 0x1b6   : > { %v577_v36 = vpop.xlane.xlu1 %576  ;;  %v5550_v33 = vmul.f32 %v4581_v29, %v5316_v39  ;;  %1135 = vperm.xlu1 %4485, %v5547_v58  }
 0x1b7   : > { %4594 = vrcp.f32 %v577_v36  ;;  %v591_v48 = vpop.xlane.xlu0 %590 }
 0x1b8   : > { %v4583_v35 = vpop.eup %4582  ;;  %v5556_v19 = vmul.f32 %v5522_v63, %v5550_v33  ;;  %4596 = vrcp.f32 %v591_v48 }
 0x1b9   : > { %v5559_v53 = vmul.f32 %v4583_v35, %v5323_v7  ;;  %v4585_v44 = vpop.eup %4584  ;;  %v644_v7 = vmul.f32 %v5534_v45, %v375_v41  ;;  %v378_v35 = vld [vmem:[%s5077_s15 + $0x58] sm:$0xff] }
 0x1ba   : > { %v581_v15 = vpop.xlane.xlu1 %580  ;;  %v5567_v29 = vmul.f32 %v4585_v44, %v5333_v17  ;;  %1145 = vperm.xlu1 %4485, %v5556_v19  }
 0x1bb   : > { %v5564_v39 = vmul.f32 %v5522_v63, %v5559_v53  ;;  %4598 = vrcp.f32 %v581_v15  ;;  %v643_v36 = vmul.f32 %v5559_v53, %v372_v2  ;;  %v381_v15 = vld [vmem:[%s5077_s15 + $0x70] sm:$0xff] }
 0x1bc   : > { %v4587_v13 = vpop.eup %4586  ;;  %v5575_v48 = vmul.f32 %v5522_v63, %v5567_v29 }
 0x1bd   : > { %v5578_v20 = vmul.f32 %v4587_v13, %v5326_v46  ;;  %1120 = vperm.xlu0 %4484, %v5564_v39   ;;  %4337 = vmatmul.mubr.f32.vlgmr.msra.gmra.mxu0 %v643_v36  ;;  %v4589_v17 = vpop.eup %4588 }
 0x1be   : > { %9915 = vst [vmem:[#allocation44_spill] sm:$0xff] %v5575_v48  ;;  %v585_v44 = vpop.xlane.xlu1 %584  ;;  %4339 = vmatprep.mubr.f32.mxu0 %v644_v7  ;;  %v5587_v41 = vmul.f32 %v4589_v17, %v5347_v54  ;;  %1155 = vperm.xlu1 %4485, %v5575_v48   ;;  %v646_v54 = vmul.f32 %v5542_v22, %v381_v15  ;;  %v390_v15 = vld [vmem:[%s5077_s15 + $0xb8] sm:$0xff] }
 0x1bf   : > { %v5584_v2 = vmul.f32 %v5522_v63, %v5578_v20  ;;  %4600 = vrcp.f32 %v585_v44  ;;  %v645_v46 = vmul.f32 %v5578_v20, %v378_v35 }
 0x1c0   : > { %v4591_v13 = vpop.eup %4590  ;;  %v5594_v36 = vmul.f32 %v5522_v63, %v5587_v41 }
 0x1c1   : > { %v5597_v7 = vmul.f32 %v4591_v13, %v5343_v51  ;;  %1130 = vperm.xlu0 %4484, %v5584_v2   ;;  %v4593_v17 = vpop.eup %4592  ;;  %4340 = vmatmul.mubr.f32.gmra.mxu0 %v645_v46 }
 0x1c2   : > { %9916 = vst [vmem:[#allocation45_spill] sm:$0xff] %v5594_v36  ;;  %v589_v44 = vpop.xlane.xlu1 %588  ;;  %v5607_v55 = vmul.f32 %v4593_v17, %v5359_v23  ;;  %4342 = vmatprep.mubr.f32.mxu0 %v646_v54  ;;  %1165 = vperm.xlu1 %4485, %v5594_v36   ;;  %v648_v23 = vmul.f32 %v5550_v33, %v387_v6 }
 0x1c3   : > { %v5604_v35 = vmul.f32 %v5522_v63, %v5597_v7  ;;  %4602 = vrcp.f32 %v589_v44  ;;  %v647_v51 = vmul.f32 %v5597_v7, %v384_v34  ;;  %v393_v44 = vld [vmem:[%s5077_s15 + $0xd0] sm:$0xff] }
 0x1c4   : > { %v4595_v13 = vpop.eup %4594  ;;  %v5614_v46 = vmul.f32 %v5522_v63, %v5607_v55 }
 0x1c5   : > { %v5617_v60 = vmul.f32 %v4595_v13, %v5356_v24  ;;  %1140 = vperm.xlu0 %4484, %v5604_v35   ;;  %v4597_v17 = vpop.eup %4596  ;;  %4343 = vmatmul.mubr.f32.gmra.mxu0 %v647_v51 }
 0x1c6   : > { %9917 = vst [vmem:[#allocation46_spill] sm:$0xff] %v5614_v46  ;;  %v593_v54 = vpop.xlane.xlu1 %592  ;;  %v5627_v31 = vmul.f32 %v4597_v17, %v5373_v32  ;;  %4345 = vmatprep.mubr.f32.mxu0 %v648_v23  ;;  %1175 = vperm.xlu1 %4485, %v5614_v46   ;;  %v650_v32 = vmul.f32 %v5567_v29, %v393_v44  ;;  %v396_v17 = vld [vmem:[%s5077_s15 + $0xe8] sm:$0xff]  ;;  %v399_v23 = vld [vmem:[%s5077_s15 + $0x100] sm:$0xff] }
 0x1c7   : > { %v5624_v34 = vmul.f32 %v5522_v63, %v5617_v60  ;;  %4604 = vrcp.f32 %v593_v54  ;;  %v649_v24 = vmul.f32 %v5617_v60, %v390_v15  ;;  %v652_v44 = vmul.f32 %v5587_v41, %v399_v23 }
 0x1c8   : > { %v4599_v6 = vpop.eup %4598  ;;  %v5633_v51 = vmul.f32 %v5522_v63, %v5627_v31  ;;  %v654_v23 = vmul.f32 %v5607_v55, %v405_v61 }
 0x1c9   : > { %9918 = vst [vmem:[#allocation47_spill] sm:$0xff] %v5624_v34  ;;  %v5636_v13 = vmul.f32 %v4599_v6, %v5370_v4  ;;  %1150 = vperm.xlu0 %4484, %v5624_v34   ;;  %4346 = vmatmul.mubr.f32.gmra.mxu0 %v649_v24  ;;  %v402_v24 = vld [vmem:[%s5077_s15 + $0x118] sm:$0xff] }
 0x1ca   : > { %9919 = vst [vmem:[#allocation48_spill] sm:$0xff] %v5633_v51  ;;  %4348 = vmatprep.mubr.f32.mxu0 %v650_v32  ;;  %1185 = vperm.xlu1 %4485, %v5633_v51  }
 0x1cb   : > { %v5644_v15 = vmul.f32 %v5522_v63, %v5636_v13  ;;  %v651_v4 = vmul.f32 %v5636_v13, %v396_v17 }
 0x1cc   : > { %v4601_v54 = vpop.eup %4600 }
 0x1cd   : > { %9920 = vst [vmem:[#allocation49_spill] sm:$0xff] %v5644_v15  ;;  %v5649_v6 = vmul.f32 %v4601_v54, %v5386_v30  ;;  %1160 = vperm.xlu0 %4484, %v5644_v15   ;;  %4349 = vmatmul.mubr.f32.gmra.mxu0 %v651_v4  ;;  %v408_v54 = vld [vmem:[%s5077_s15 + $0x148] sm:$0xff]  ;;  %v411_v4 = vld [vmem:[%s5077_s15 + $0x160] sm:$0xff] }
 0x1ce   : > { %4351 = vmatprep.mubr.f32.mxu0 %v652_v44  ;;  %4487 = vset.pattern.permute.xlu1 %v9922_v9  ;;  %v656_v61 = vmul.f32 %v5627_v31, %v411_v4 }
 0x1cf   : > { %v5657_v32 = vmul.f32 %v5522_v63, %v5649_v6  ;;  %v653_v17 = vmul.f32 %v5649_v6, %v402_v24  ;;  %1438 = vperm.xlu1 %4487, %v5564_v39   ;;  %v5673_v24 = vpop.permute.xlu0 %1647 }
 0x1d0   : > { %v4603_v52 = vpop.eup %4602  ;;  %9924 = vst [vmem:[#allocation52_spill] sm:$0xff] %v5673_v24  ;;  %v5811_v24 = vld [vmem:[%s5088_s14 + $0x10] sm:$0xff] }
 0x1d1   : > { %9921 = vst [vmem:[#allocation50_spill] sm:$0xff] %v5657_v32  ;;  %v5662_v30 = vmul.f32 %v4603_v52, %v5395_v40  ;;  %1170 = vperm.xlu0 %4484, %v5657_v32   ;;  %4352 = vmatmul.mubr.f32.gmra.mxu0 %v653_v17 }
 0x1d2   : > { %4354 = vmatprep.mubr.f32.mxu0 %v654_v23 }
 0x1d3   : > { %v5671_v44 = vmul.f32 %v5522_v63, %v5662_v30  ;;  %v655_v40 = vmul.f32 %v5662_v30, %v408_v54  ;;  %1446 = vperm.xlu1 %4487, %v5584_v2   ;;  %v5689_v54 = vpop.permute.xlu0 %1653 }
 0x1d4   : > { %v4605_v12 = vpop.eup %4604  ;;  %9926 = vst [vmem:[#allocation54_spill] sm:$0xff] %v5689_v54 }
 0x1d5   : > { %9923 = vst [vmem:[#allocation51_spill] sm:$0xff] %v5671_v44  ;;  %v5677_v52 = vmul.f32 %v4605_v12, %v5406_v38  ;;  %1180 = vperm.xlu0 %4484, %v5671_v44   ;;  %4355 = vmatmul.mubr.f32.gmra.mxu0 %v655_v40  ;;  %v5691_v38 = vpop.permute.xlu1 %1644 }
 0x1d6   : > { %4357 = vmatprep.mubr.f32.mxu0 %v656_v61  ;;  %9927 = vst [vmem:[#allocation55_spill] sm:$0xff] %v5691_v38 }
 0x1d7   : > { %v5685_v17 = vmul.f32 %v5522_v63, %v5677_v52  ;;  %v657_v23 = vmul.f32 %v5677_v52, %v414_v8  ;;  %1454 = vperm.xlu1 %4487, %v5604_v35   ;;  %v5697_v12 = vpop.permute.xlu0 %1659 }
 0x1d8   : > { %9928 = vst [vmem:[#allocation56_spill] sm:$0xff] %v5697_v12 }
 0x1d9   : > { %9925 = vst [vmem:[#allocation53_spill] sm:$0xff] %v5685_v17  ;;  %1190 = vperm.xlu0 %4484, %v5685_v17   ;;  %4358 = vmatmul.mubr.f32.gmra.mxu0 %v657_v23  ;;  %v5699_v63 = vpop.permute.xlu1 %1650  ;;  %v9935_v23 = vmov 2  }
 0x1da   : > { %9929 = vst [vmem:[#allocation57_spill] sm:$0xff] %v5699_v63 }
 0x1db   : > { %1462 = vperm.xlu1 %4487, %v5624_v34   ;;  %v5704_v8 = vpop.permute.xlu0 %1665 }
 0x1dc   : > { %9930 = vst [vmem:[#allocation58_spill] sm:$0xff] %v5704_v8 }
 0x1dd   : > { %4486 = vset.pattern.permute.xlu0 %v9922_v9  ;;  %v5706_v4 = vpop.permute.xlu1 %1656 }
 0x1de   : > { %1434 = vperm.xlu0 %4486, %v5530_v49   ;;  %9931 = vst [vmem:[#allocation59_spill] sm:$0xff] %v5706_v4 }
 0x1df   : > { %1470 = vperm.xlu1 %4487, %v5644_v15   ;;  %v5711_v9 = vpop.permute.xlu0 %1671 }
 0x1e0   : > { %9932 = vst [vmem:[#allocation60_spill] sm:$0xff] %v5711_v9 }
 0x1e1   : > { %v5713_v40 = vpop.permute.xlu1 %1662 }
 0x1e2   : > { %1442 = vperm.xlu0 %4486, %v5539_v37   ;;  %9933 = vst [vmem:[#allocation61_spill] sm:$0xff] %v5713_v40 }
 0x1e3   : > { %1478 = vperm.xlu1 %4487, %v5657_v32   ;;  %v5717_v61 = vpop.permute.xlu0 %1933 }
 0x1e4   : > { %9934 = vst [vmem:[#allocation62_spill] sm:$0xff] %v5717_v61  ;;  %v5804_v61 = vld [vmem:[%s5088_s14 + $0x8] sm:$0xff] }
 0x1e5   : > { %v5720_v8 = vpop.permute.xlu1 %1668 }
 0x1e6   : > { %1450 = vperm.xlu0 %4486, %v5547_v58   ;;  %9936 = vst [vmem:[#allocation63_spill] sm:$0xff] %v5720_v8 }
 0x1e7   : > { %1486 = vperm.xlu1 %4487, %v5671_v44   ;;  %v5727_v9 = vpop.permute.xlu0 %1942 }
 0x1e8   : > { %9938 = vst [vmem:[#allocation65_spill] sm:$0xff] %v5727_v9 }
 0x1e9   : > { %v5724_v12 = vpop.permute.xlu1 %1930 }
 0x1ea   : > { %1458 = vperm.xlu0 %4486, %v5556_v19   ;;  %9937 = vst [vmem:[#allocation64_spill] sm:$0xff] %v5724_v12  ;;  %v4863_v12 = vmov 4  }
 0x1eb   : > { %1494 = vperm.xlu1 %4487, %v5685_v17   ;;  %v5734_v4 = vpop.permute.xlu0 %1948 }
 0x1ec   : > { %9940 = vst [vmem:[#allocation67_spill] sm:$0xff] %v5734_v4 }
 0x1ed   : > { %v5732_v40 = vpop.permute.xlu1 %1936 }
 0x1ee   : > { %1466 = vperm.xlu0 %4486, %v5575_v48   ;;  %9939 = vst [vmem:[#allocation66_spill] sm:$0xff] %v5732_v40 }
 0x1ef   : > { %4488 = vset.pattern.permute.xlu1 %v9935_v23  ;;  %v5742_v54 = vpop.permute.xlu0 %1954 }
 0x1f0   : > { %1738 = vperm.xlu1 %4488, %v5530_v49   ;;  %9942 = vst [vmem:[#allocation69_spill] sm:$0xff] %v5742_v54  ;;  %v9947_v54 = vmov 3  }
 0x1f1   : > { %v5739_v8 = vpop.permute.xlu1 %1939 }
 0x1f2   : > { %1474 = vperm.xlu0 %4486, %v5594_v36   ;;  %9941 = vst [vmem:[#allocation68_spill] sm:$0xff] %v5739_v8 }
 0x1f3   : > { %v5749_v4 = vpop.permute.xlu0 %1960 }
 0x1f4   : > { %1746 = vperm.xlu1 %4488, %v5539_v37   ;;  %9944 = vst [vmem:[#allocation71_spill] sm:$0xff] %v5749_v4 }
 0x1f5   : > { %v5746_v63 = vpop.permute.xlu1 %1945 }
 0x1f6   : > { %1482 = vperm.xlu0 %4486, %v5614_v46   ;;  %9943 = vst [vmem:[#allocation70_spill] sm:$0xff] %v5746_v63 }
 0x1f7   : > { %v5756_v9 = vpop.permute.xlu0 %1966 }
 0x1f8   : > { %1754 = vperm.xlu1 %4488, %v5547_v58   ;;  %9946 = vst [vmem:[#allocation73_spill] sm:$0xff] %v5756_v9 }
 0x1fa   : > { %1490 = vperm.xlu0 %4486, %v5633_v51  }
 0x1fb   : > { %v5764_v4 = vpop.permute.xlu0 %1972 }
 0x1fc   : > { %1762 = vperm.xlu1 %4488, %v5556_v19   ;;  %9949 = vst [vmem:[#allocation75_spill] sm:$0xff] %v5764_v4 }
 0x1fe   : > { %4489 = vset.pattern.permute.xlu0 %v9935_v23  ;;  %v5753_v23 = vpop.permute.xlu1 %1951 }
 0x1ff   : > { %1742 = vperm.xlu0 %4489, %v5564_v39   ;;  %9945 = vst [vmem:[#allocation72_spill] sm:$0xff] %v5753_v23  ;;  %v5770_v63 = vpop.permute.xlu0 %1002 }
 0x200   : > { %1770 = vperm.xlu1 %4488, %v5575_v48   ;;  %vm1049_vm5 = vcmp.eq.s32.totalorder %v5101_v3, %v5770_v63 }
 0x202   : > { %v5761_v40 = vpop.permute.xlu1 %1957 }
 0x203   : > { %1750 = vperm.xlu0 %4489, %v5584_v2   ;;  %9948 = vst [vmem:[#allocation74_spill] sm:$0xff] %v5761_v40  ;;  %v5778_v40 = vpop.permute.xlu0 %1029 }
 0x204   : > { %1778 = vperm.xlu1 %4488, %v5594_v36   ;;  %9952 = vst [vmem:[#allocation78_spill] sm:$0xff] %v5778_v40 }
 0x206   : > { %v5768_v23 = vpop.permute.xlu1 %1963 }
 0x207   : > { %1758 = vperm.xlu0 %4489, %v5604_v35   ;;  %9950 = vst [vmem:[#allocation76_spill] sm:$0xff] %v5768_v23  ;;  %v5785_v23 = vpop.permute.xlu0 %1035 }
 0x208   : > { %1786 = vperm.xlu1 %4488, %v5614_v46   ;;  %9954 = vst [vmem:[#allocation80_spill] sm:$0xff] %v5785_v23 }
 0x20a   : > { %v5775_v9 = vpop.permute.xlu1 %1969 }
 0x20b   : > { %1766 = vperm.xlu0 %4489, %v5624_v34   ;;  %9951 = vst [vmem:[#allocation77_spill] sm:$0xff] %v5775_v9 }
 0x20c   : > { %1794 = vperm.xlu1 %4488, %v5633_v51  }
 0x20e   : > { %v5783_v4 = vpop.permute.xlu1 %1975 }
 0x20f   : > { %1774 = vperm.xlu0 %4489, %v5644_v15   ;;  %9953 = vst [vmem:[#allocation79_spill] sm:$0xff] %v5783_v4 }
 0x210   : > { %4491 = vset.pattern.permute.xlu1 %v9947_v54 }
 0x211   : > { %2046 = vperm.xlu1 %4491, %v5564_v39  }
 0x213   : > { %1782 = vperm.xlu0 %4489, %v5657_v32  }
 0x215   : > { %2054 = vperm.xlu1 %4491, %v5584_v2  }
 0x217   : > { %1790 = vperm.xlu0 %4489, %v5671_v44  }
 0x219   : > { %2062 = vperm.xlu1 %4491, %v5604_v35  }
 0x21b   : > { %1798 = vperm.xlu0 %4489, %v5685_v17  }
 0x21d   : > { %2070 = vperm.xlu1 %4491, %v5624_v34  }
 0x21f   : > { %4490 = vset.pattern.permute.xlu0 %v9947_v54  ;;  %v5792_v54 = vpop.permute.xlu0 %1041 }
 0x220   : > { %2042 = vperm.xlu0 %4490, %v5530_v49   ;;  %9956 = vst [vmem:[#allocation82_spill] sm:$0xff] %v5792_v54 }
 0x221   : > { %2078 = vperm.xlu1 %4491, %v5644_v15  }
 0x223   : > { %v5801_v23 = vpop.permute.xlu0 %1047 }
 0x224   : > { %2050 = vperm.xlu0 %4490, %v5539_v37   ;;  %9959 = vst [vmem:[#allocation85_spill] sm:$0xff] %v5801_v23 }
 0x225   : > { %2086 = vperm.xlu1 %4491, %v5657_v32  }
 0x228   : > { %2058 = vperm.xlu0 %4490, %v5547_v58  }
 0x229   : > { %v5789_v9 = vpop.permute.xlu1 %1115  ;;  %2094 = vperm.xlu1 %4491, %v5671_v44  }
 0x22a   : > { %9955 = vst [vmem:[#allocation81_spill] sm:$0xff] %v5789_v9 }
 0x22c   : > { %2066 = vperm.xlu0 %4490, %v5556_v19  }
 0x22d   : > { %v5795_v8 = vpop.permute.xlu1 %1125  ;;  %2102 = vperm.xlu1 %4491, %v5685_v17  }
 0x22e   : > { %9957 = vst [vmem:[#allocation83_spill] sm:$0xff] %v5795_v8  ;;  %v5868_v8 = vld [vmem:[%s5088_s14 + $0x38] sm:$0xff] }
 0x230   : > { %2074 = vperm.xlu0 %4490, %v5575_v48  }
 0x231   : > { %v5799_v4 = vpop.permute.xlu1 %1135  ;;  %4493 = vset.pattern.permute.xlu1 %v4863_v12 }
 0x232   : > { %9958 = vst [vmem:[#allocation84_spill] sm:$0xff] %v5799_v4  ;;  %2237 = vperm.xlu1 %4493, %v5804_v61  }
 0x234   : > { %2082 = vperm.xlu0 %4490, %v5594_v36  }
 0x235   : > { %v5808_v54 = vpop.permute.xlu1 %1145 }
 0x236   : > { %9960 = vst [vmem:[#allocation86_spill] sm:$0xff] %v5808_v54  ;;  %2240 = vperm.xlu1 %4493, %v5811_v24  }
 0x238   : > { %v5814_v38 = vpop.permute.xlu0 %1120  ;;  %2090 = vperm.xlu0 %4490, %v5614_v46  }
 0x239   : > { %9961 = vst [vmem:[#allocation87_spill] sm:$0xff] %v5814_v38  ;;  %v5817_v23 = vpop.permute.xlu1 %1155  ;;  %v5838_v38 = vld [vmem:[%s5088_s14 + $0x40] sm:$0xff] }
 0x23a   : > { %9962 = vst [vmem:[#allocation88_spill] sm:$0xff] %v5817_v23  ;;  %2246 = vperm.xlu1 %4493, %v5820_v11  }
 0x23c   : > { %v5823_v16 = vpop.permute.xlu0 %1130  ;;  %2098 = vperm.xlu0 %4490, %v5633_v51  }
 0x23d   : > { %9963 = vst [vmem:[#allocation89_spill] sm:$0xff] %v5823_v16  ;;  %v5826_v50 = vpop.permute.xlu1 %1165  ;;  %v5844_v16 = vld [vmem:[%s5088_s14 + $0x18] sm:$0xff] }
 0x23e   : > { %9964 = vst [vmem:[#allocation90_spill] sm:$0xff] %v5826_v50  ;;  %2252 = vperm.xlu1 %4493, %v5829_v14  }
 0x240   : > { %v5832_v10 = vpop.permute.xlu0 %1140  ;;  %4492 = vset.pattern.permute.xlu0 %v4863_v12 }
 0x241   : > { %9965 = vst [vmem:[#allocation91_spill] sm:$0xff] %v5832_v10  ;;  %v5834_v23 = vpop.permute.xlu1 %1175  ;;  %2234 = vperm.xlu0 %4492, %v5250_v21   ;;  %v5850_v10 = vld [vmem:[%s5088_s14 + $0x50] sm:$0xff]  ;;  %v5856_v21 = vld [vmem:[%s5088_s14 + $0x28] sm:$0xff] }
 0x242   : > { %9966 = vst [vmem:[#allocation92_spill] sm:$0xff] %v5834_v23  ;;  %2258 = vperm.xlu1 %4493, %v5838_v38   ;;  %v5860_v23 = vld [vmem:[%s5088_s14 + $0x60] sm:$0xff] }
 0x244   : > { %v5841_v50 = vpop.permute.xlu0 %1150 }
 0x245   : > { %9967 = vst [vmem:[#allocation93_spill] sm:$0xff] %v5841_v50  ;;  %2243 = vperm.xlu0 %4492, %v5844_v16   ;;  %v5847_v54 = vpop.permute.xlu1 %1185 }
 0x246   : > { %9968 = vst [vmem:[#allocation94_spill] sm:$0xff] %v5847_v54  ;;  %2264 = vperm.xlu1 %4493, %v5850_v10   ;;  %v5872_v54 = vld [vmem:[%s5088_s14 + $0x70] sm:$0xff] }
 0x248   : > { %v5853_v12 = vpop.permute.xlu0 %1160 }
 0x249   : > { %9969 = vst [vmem:[#allocation95_spill] sm:$0xff] %v5853_v12  ;;  %2249 = vperm.xlu0 %4492, %v5856_v21  }
 0x24a   : > { %2270 = vperm.xlu1 %4493, %v5860_v23   ;;  %v5863_v50 = vpop.permute.xlu1 %1438 }
 0x24b   : > { %9970 = vst [vmem:[#allocation96_spill] sm:$0xff] %v5863_v50 }
 0x24c   : > { %v5865_v4 = vpop.permute.xlu0 %1170 }
 0x24d   : > { %9971 = vst [vmem:[#allocation97_spill] sm:$0xff] %v5865_v4  ;;  %2255 = vperm.xlu0 %4492, %v5868_v8  }
 0x24e   : > { %2276 = vperm.xlu1 %4493, %v5872_v54   ;;  %v5875_v12 = vpop.permute.xlu1 %1446 }
 0x250   : > { %v5877_v62 = vpop.permute.xlu0 %1180 }
 0x251   : > { %9972 = vst [vmem:[#allocation98_spill] sm:$0xff] %v5877_v62  ;;  %2261 = vperm.xlu0 %4492, %v5265_v25  }
 0x252   : > { %2346 = vperm.xlu1 %4493, %v5530_v49   ;;  %v5881_v9 = vpop.permute.xlu1 %1454 }
 0x254   : > { %v5883_v50 = vpop.permute.xlu0 %1190 }
 0x255   : > { %9973 = vst [vmem:[#allocation99_spill] sm:$0xff] %v5883_v50  ;;  %2267 = vperm.xlu0 %4492, %v5269_v26  }
 0x256   : > { %2354 = vperm.xlu1 %4493, %v5539_v37   ;;  %v5887_v4 = vpop.permute.xlu1 %1462 }
 0x259   : > { %2273 = vperm.xlu0 %4492, %v5273_v27   ;;  %v5890_v40 = vpop.permute.xlu0 %1434 }
 0x25a   : > { %9974 = vst [vmem:[#allocation100_spill] sm:$0xff] %v5890_v40  ;;  %2362 = vperm.xlu1 %4493, %v5547_v58   ;;  %v5893_v62 = vpop.permute.xlu1 %1470 }
 0x25b   : > { %9975 = vst [vmem:[#allocation101_spill] sm:$0xff] %v5893_v62 }
 0x25d   : > { %2279 = vperm.xlu0 %4492, %v5277_v28   ;;  %v5896_v25 = vpop.permute.xlu0 %1442 }
 0x25e   : > { %9976 = vst [vmem:[#allocation102_spill] sm:$0xff] %v5896_v25  ;;  %2370 = vperm.xlu1 %4493, %v5556_v19   ;;  %v5899_v50 = vpop.permute.xlu1 %1478 }
 0x25f   : > { %9977 = vst [vmem:[#allocation103_spill] sm:$0xff] %v5899_v50 }
 0x261   : > { %2350 = vperm.xlu0 %4492, %v5564_v39   ;;  %v5902_v26 = vpop.permute.xlu0 %1450 }
 0x262   : > { %9978 = vst [vmem:[#allocation104_spill] sm:$0xff] %v5902_v26  ;;  %2378 = vperm.xlu1 %4493, %v5575_v48   ;;  %v5905_v27 = vpop.permute.xlu1 %1486 }
 0x263   : > { %9979 = vst [vmem:[#allocation105_spill] sm:$0xff] %v5905_v27 }
 0x265   : > { %2358 = vperm.xlu0 %4492, %v5584_v2   ;;  %v5908_v62 = vpop.permute.xlu0 %1458 }
 0x266   : > { %9980 = vst [vmem:[#allocation106_spill] sm:$0xff] %v5908_v62  ;;  %2386 = vperm.xlu1 %4493, %v5594_v36   ;;  %v5911_v28 = vpop.permute.xlu1 %1494  ;;  %v9767_v36 = vmov 5  }
 0x267   : > { %9981 = vst [vmem:[#allocation107_spill] sm:$0xff] %v5911_v28 }
 0x269   : > { %2366 = vperm.xlu0 %4492, %v5604_v35   ;;  %v5914_v50 = vpop.permute.xlu0 %1466 }
 0x26a   : > { %9982 = vst [vmem:[#allocation108_spill] sm:$0xff] %v5914_v50  ;;  %2394 = vperm.xlu1 %4493, %v5614_v46   ;;  %v5930_v46 = vld [vmem:[%s5088_s14] sm:$0xff] }
 0x26b   : > { %v5917_v26 = vpop.permute.xlu1 %1738 }
 0x26c   : > { %9983 = vst [vmem:[#allocation109_spill] sm:$0xff] %v5917_v26 }
 0x26d   : > { %2374 = vperm.xlu0 %4492, %v5624_v34   ;;  %v5920_v27 = vpop.permute.xlu0 %1474 }
 0x26e   : > { %9984 = vst [vmem:[#allocation110_spill] sm:$0xff] %v5920_v27  ;;  %2402 = vperm.xlu1 %4493, %v5633_v51  }
 0x26f   : > { %v5923_v62 = vpop.permute.xlu1 %1746 }
 0x270   : > { %9985 = vst [vmem:[#allocation111_spill] sm:$0xff] %v5923_v62 }
 0x271   : > { %2382 = vperm.xlu0 %4492, %v5644_v15   ;;  %v5926_v28 = vpop.permute.xlu0 %1482  ;;  %v377_v15 = vld [vmem:[%s5077_s15 + $0x50] sm:$0xff] }
 0x272   : > { %9986 = vst [vmem:[#allocation112_spill] sm:$0xff] %v5926_v28  ;;  %4494 = vset.pattern.permute.xlu1 %v9767_v36  ;;  %v371_v36 = vld [vmem:[%s5077_s15 + $0x20] sm:$0xff] }
 0x273   : > { %2538 = vperm.xlu1 %4494, %v5930_v46   ;;  %v5933_v26 = vpop.permute.xlu1 %1754 }
 0x274   : > { %9987 = vst [vmem:[#allocation113_spill] sm:$0xff] %v5933_v26  ;;  %v368_v26 = vld [vmem:[%s5077_s15 + $0x8] sm:$0xff] }
 0x275   : > { %2390 = vperm.xlu0 %4492, %v5657_v32   ;;  %v5936_v27 = vpop.permute.xlu0 %1490  ;;  %v627_v32 = vmul.f32 %v5559_v53, %v371_v36  ;;  %v626_v25 = vmul.f32 %v5526_v1, %v368_v26 }
 0x276   : > { %9988 = vst [vmem:[#allocation114_spill] sm:$0xff] %v5936_v27  ;;  %v5954_v27 = vld [vmem:[%s9663_s4] ss:$0 sm:$0xff] }
 0x277   : > { %2544 = vperm.xlu1 %4494, %v5811_v24   ;;  %v5939_v51 = vpop.permute.xlu1 %1762 }
 0x278   : > { %9989 = vst [vmem:[#allocation115_spill] sm:$0xff] %v5939_v51 }
 0x279   : > { %2398 = vperm.xlu0 %4492, %v5671_v44  }
 0x27a   : > { %v5942_v28 = vpop.permute.xlu0 %1742 }
 0x27b   : > { %9990 = vst [vmem:[#allocation116_spill] sm:$0xff] %v5942_v28  ;;  %2547 = vperm.xlu1 %4494, %v5844_v16   ;;  %v5946_v62 = vpop.permute.xlu1 %1770 }
 0x27c   : > { %9991 = vst [vmem:[#allocation117_spill] sm:$0xff] %v5946_v62  ;;  %v5963_v62 = vld [vmem:[%s9663_s4 + $0x1] ss:$0 sm:$0xff] }
 0x27d   : > { %v4338_v50 = vpop.f32.mrf.mxu0  ;;  %2406 = vperm.xlu0 %4492, %v5685_v17  }
 0x27e   : > { %v5956_v51 = vpop.permute.xlu0 %1750  ;;  %v870_v28 = vadd.f32 %v4338_v50, %v627_v32  ;;  %v629_v50 = vmul.f32 %v5578_v20, %v377_v15  ;;  %v374_v32 = vld [vmem:[%s5077_s15 + $0x38] sm:$0xff] }
 0x27f   : > { %9992 = vst [vmem:[#allocation118_spill] sm:$0xff] %v5956_v51  ;;  %v790_v44 = vpop.f32.mrf.mxu0  ;;  %2553 = vperm.xlu1 %4494, %v5856_v21   ;;  %v5966_v53 = vpop.permute.xlu1 %1778  ;;  %v9790_v51 = vmov 6   ;;  %v628_v15 = vmul.f32 %v5534_v45, %v374_v32  ;;  %v9997_v32 = vmov 6  }
 0x280   : > { %9993 = vst [vmem:[#allocation119_spill] sm:$0xff] %v5966_v53  ;;  %v891_v36 = vmul.f32 %v5954_v27, %v870_v28  ;;  %v869_v17 = vadd.f32 %v790_v44, %v626_v25 }
 0x281   : > { %v4341_v48 = vpop.f32.mrf.mxu0  ;;  %4496 = vset.pattern.permute.xlu0 %v9790_v51  ;;  %v383_v51 = vld [vmem:[%s5077_s15 + $0x80] sm:$0xff] }
 0x282   : > { %2954 = vperm.xlu0 %4496, %v5530_v49   ;;  %v5972_v1 = vpop.permute.xlu0 %1758  ;;  %v912_v26 = vadd.f32 %v5963_v62, %v891_v36  ;;  %v890_v53 = vmul.f32 %v5954_v27, %v869_v17  ;;  %v872_v28 = vadd.f32 %v4341_v48, %v629_v50  ;;  %v631_v45 = vmul.f32 %v5597_v7, %v383_v51  ;;  %v380_v50 = vld [vmem:[%s5077_s15 + $0x68] sm:$0xff] }
 0x283   : > { %9994 = vst [vmem:[#allocation120_spill] sm:$0xff] %v5972_v1  ;;  %v800_v40 = vpop.f32.mrf.mxu0  ;;  %2559 = vperm.xlu1 %4494, %v5868_v8   ;;  %v5978_v44 = vpop.permute.xlu1 %1786  ;;  %v630_v51 = vmul.f32 %v5542_v22, %v380_v50  ;;  %v386_v50 = vld [vmem:[%s5077_s15 + $0x98] sm:$0xff] }
 0x284   : > { %9995 = vst [vmem:[#allocation121_spill] sm:$0xff] %v5978_v44  ;;  %v928_v25 = vmax.f32 %v912_v26, 0.0  ;;  %v911_v20 = vadd.f32 %v5963_v62, %v890_v53  ;;  %v893_v34 = vmul.f32 %v5954_v27, %v872_v28  ;;  %v871_v17 = vadd.f32 %v800_v40, %v628_v15  ;;  %v389_v15 = vld [vmem:[%s5077_s15 + $0xb0] sm:$0xff] }
 0x285   : > { %v4344_v1 = vpop.f32.mrf.mxu0  ;;  %v633_v22 = vmul.f32 %v5617_v60, %v389_v15 }
 0x286   : > { %2962 = vperm.xlu0 %4496, %v5539_v37   ;;  %v5985_v36 = vpop.permute.xlu0 %1766  ;;  %944 = vst [vmem:[%s5988_s17 + $0x8] sm:$0xff] %v928_v25  ;;  %v927_v48 = vmax.f32 %v911_v20, 0.0  ;;  %v914_v53 = vadd.f32 %v5963_v62, %v893_v34  ;;  %v892_v28 = vmul.f32 %v5954_v27, %v871_v17  ;;  %v874_v40 = vadd.f32 %v4344_v1, %v631_v45 }
 0x287   : > { %9996 = vst [vmem:[#allocation122_spill] sm:$0xff] %v5985_v36  ;;  %v810_v8 = vpop.f32.mrf.mxu0  ;;  %4495 = vset.pattern.permute.xlu1 %v9997_v32  ;;  %v5995_v26 = vpop.permute.xlu1 %1794  ;;  %v10077_v36 = vld [vmem:[#allocation31_spill] sm:$0xff] }
 0x288   : > { %9998 = vst [vmem:[#allocation123_spill] sm:$0xff] %v5995_v26  ;;  %943 = vst [vmem:[%s5988_s17] sm:$0xff] %v927_v48  ;;  %2842 = vperm.xlu1 %4495, %v5930_v46   ;;  %v930_v20 = vmax.f32 %v914_v53, 0.0  ;;  %v913_v7 = vadd.f32 %v5963_v62, %v892_v28  ;;  %v895_v48 = vmul.f32 %v5954_v27, %v874_v40  ;;  %v9798_v53 = vmov 7  }
 0x289   : > { %v4347_v25 = vpop.f32.mrf.mxu0  ;;  %v873_v44 = vadd.f32 %v810_v8, %v630_v51  ;;  %v395_v51 = vld [vmem:[%s5077_s15 + $0xe0] sm:$0xff] }
 0x28a   : > { %2970 = vperm.xlu0 %4496, %v5547_v58   ;;  %v6001_v34 = vpop.permute.xlu0 %1774  ;;  %946 = vst [vmem:[%s5988_s17 + $0x18] sm:$0xff] %v930_v20  ;;  %v929_v17 = vmax.f32 %v913_v7, 0.0  ;;  %v876_v7 = vadd.f32 %v4347_v25, %v633_v22  ;;  %v635_v25 = vmul.f32 %v5636_v13, %v395_v51  ;;  %v392_v22 = vld [vmem:[%s5077_s15 + $0xc8] sm:$0xff] }
 0x28b   : > { %9999 = vst [vmem:[#allocation124_spill] sm:$0xff] %v6001_v34  ;;  %v820_v26 = vpop.f32.mrf.mxu0  ;;  %v916_v34 = vadd.f32 %v5963_v62, %v895_v48  ;;  %v894_v8 = vmul.f32 %v5954_v27, %v873_v44  ;;  %v634_v51 = vmul.f32 %v5567_v29, %v392_v22 }
 0x28c   : > { %4497 = vset.pattern.permute.xlu1 %v9798_v53  ;;  %v6009_v1 = vpop.permute.xlu1 %2046  ;;  %945 = vst [vmem:[%s5988_s17 + $0x10] sm:$0xff] %v929_v17  ;;  %v632_v53 = vmul.f32 %v5550_v33, %v386_v50  ;;  %v897_v15 = vmul.f32 %v5954_v27, %v876_v7  ;;  %v10003_v17 = vmov 5   ;;  %v401_v7 = vld [vmem:[%s5077_s15 + $0x110] sm:$0xff] }
 0x28d   : > { %10000 = vst [vmem:[#allocation125_spill] sm:$0xff] %v6009_v1  ;;  %v4350_v45 = vpop.f32.mrf.mxu0  ;;  %3146 = vperm.xlu1 %4497, %v5930_v46   ;;  %v932_v40 = vmax.f32 %v916_v34, 0.0  ;;  %v915_v48 = vadd.f32 %v5963_v62, %v894_v8  ;;  %v3484_v1 = vld [vmem:[#allocation7 + $0x118] sm:$0xff] }
 0x28e   : > { %2978 = vperm.xlu0 %4496, %v5556_v19   ;;  %v6016_v28 = vpop.permute.xlu0 %1782  ;;  %v875_v34 = vadd.f32 %v820_v26, %v632_v53  ;;  %v918_v50 = vadd.f32 %v5963_v62, %v897_v15 }
 0x28f   : > { %10001 = vst [vmem:[#allocation126_spill] sm:$0xff] %v6016_v28  ;;  %v830_v20 = vpop.f32.mrf.mxu0  ;;  %948 = vst [vmem:[%s5988_s17 + $0x28] sm:$0xff] %v932_v40  ;;  %v931_v28 = vmax.f32 %v915_v48, 0.0  ;;  %v878_v40 = vadd.f32 %v4350_v45, %v635_v25  ;;  %v637_v45 = vmul.f32 %v5649_v6, %v401_v7 }
 0x290   : > { %v6023_v60 = vpop.permute.xlu1 %2054  ;;  %v896_v8 = vmul.f32 %v5954_v27, %v875_v34  ;;  %v934_v53 = vmax.f32 %v918_v50, 0.0  ;;  %v398_v34 = vld [vmem:[%s5077_s15 + $0xf8] sm:$0xff] }
 0x291   : > { %10002 = vst [vmem:[#allocation127_spill] sm:$0xff] %v6023_v60  ;;  %v4353_v46 = vpop.f32.mrf.mxu0  ;;  %4498 = vset.pattern.permute.xlu1 %v10003_v17  ;;  %947 = vst [vmem:[%s5988_s17 + $0x20] sm:$0xff] %v931_v28  ;;  %v899_v15 = vmul.f32 %v5954_v27, %v878_v40  ;;  %v877_v28 = vadd.f32 %v830_v20, %v634_v51  ;;  %v636_v6 = vmul.f32 %v5587_v41, %v398_v34 }
 0x292   : > { %v6028_v44 = vpop.permute.xlu0 %1790  ;;  %2654 = vperm.xlu1 %4498, %v5564_v39   ;;  %4512 = vset.pattern.permute.xlu0 %v10003_v17  ;;  %950 = vst [vmem:[%s5988_s17 + $0x38] sm:$0xff] %v934_v53  ;;  %v880_v40 = vadd.f32 %v4353_v46, %v637_v45  ;;  %v407_v53 = vld [vmem:[%s5077_s15 + $0x140] sm:$0xff] }
 0x293   : > { %10004 = vst [vmem:[#allocation128_spill] sm:$0xff] %v6028_v44  ;;  %v840_v33 = vpop.f32.mrf.mxu0  ;;  %2541 = vperm.xlu0 %4512, %v5804_v61   ;;  %v917_v44 = vadd.f32 %v5963_v62, %v896_v8  ;;  %v920_v25 = vadd.f32 %v5963_v62, %v899_v15  ;;  %v898_v8 = vmul.f32 %v5954_v27, %v877_v28  ;;  %v404_v28 = vld [vmem:[%s5077_s15 + $0x128] sm:$0xff] }
 0x294   : > { %v6039_v26 = vpop.permute.xlu1 %2062  ;;  %v901_v51 = vmul.f32 %v5954_v27, %v880_v40  ;;  %v879_v15 = vadd.f32 %v840_v33, %v636_v6  ;;  %v639_v46 = vmul.f32 %v5662_v30, %v407_v53  ;;  %v413_v40 = vld [vmem:[%s5077_s15 + $0x170] sm:$0xff]  ;;  %v638_v30 = vmul.f32 %v5607_v55, %v404_v28 }
 0x295   : > { %10005 = vst [vmem:[#allocation129_spill] sm:$0xff] %v6039_v26  ;;  %v4356_v13 = vpop.f32.mrf.mxu0  ;;  %v933_v29 = vmax.f32 %v917_v44, 0.0  ;;  %v936_v20 = vmax.f32 %v920_v25, 0.0  ;;  %v919_v44 = vadd.f32 %v5963_v62, %v898_v8  ;;  %v3452_v26 = vld [vmem:[#allocation7 + $0x18] sm:$0xff] }
 0x296   : > { %v6042_v48 = vpop.permute.xlu0 %1798  ;;  %4499 = vset.pattern.permute.xlu1 %v9997_v32  ;;  %v900_v25 = vmul.f32 %v5954_v27, %v879_v15  ;;  %v882_v8 = vadd.f32 %v4356_v13, %v639_v46 }
 0x297   : > { %10006 = vst [vmem:[#allocation130_spill] sm:$0xff] %v6042_v48  ;;  %2845 = vperm.xlu1 %4499, %v5804_v61   ;;  %2550 = vperm.xlu0 %4512, %v5820_v11   ;;  %v850_v22 = vpop.f32.mrf.mxu0  ;;  %949 = vst [vmem:[%s5988_s17 + $0x30] sm:$0xff] %v933_v29  ;;  %v935_v34 = vmax.f32 %v919_v44, 0.0  ;;  %v922_v29 = vadd.f32 %v5963_v62, %v901_v51  ;;  %v410_v48 = vld [vmem:[%s5077_s15 + $0x158] sm:$0xff]  ;;  %v641_v44 = vmul.f32 %v5677_v52, %v413_v40 }
 0x298   : > { %v6053_v50 = vpop.permute.xlu1 %2070  ;;  %952 = vst [vmem:[%s5988_s17 + $0x48] sm:$0xff] %v936_v20  ;;  %v903_v53 = vmul.f32 %v5954_v27, %v882_v8  ;;  %v881_v13 = vadd.f32 %v850_v22, %v638_v30  ;;  %v640_v51 = vmul.f32 %v5627_v31, %v410_v48  ;;  %v3480_v52 = vld [vmem:[#allocation7 + $0xf8] sm:$0xff] }
 0x299   : > { %10007 = vst [vmem:[#allocation131_spill] sm:$0xff] %v6053_v50  ;;  %v4359_v45 = vpop.f32.mrf.mxu0  ;;  %951 = vst [vmem:[%s5988_s17 + $0x40] sm:$0xff] %v935_v34  ;;  %v938_v33 = vmax.f32 %v922_v29, 0.0  ;;  %v6096_v31 = vld [vmem:[#allocation7 + $0x1f8] sm:$0xff]  ;;  %4144 = vmatprep.subr.mxu1 %v3480_v52  ;;  %v3462_v52 = vld [vmem:[#allocation7 + $0x68] sm:$0xff] }
 0x29a   : > { %v924_v15 = vadd.f32 %v5963_v62, %v903_v53  ;;  %v902_v28 = vmul.f32 %v5954_v27, %v881_v13  ;;  %v884_v34 = vadd.f32 %v4359_v45, %v641_v44  ;;  %v3464_v45 = vld [vmem:[#allocation7 + $0x78] sm:$0xff]  ;;  %4224 = vmatprep.subr.mxu0 %v6096_v31  ;;  %v3463_v13 = vld [vmem:[#allocation7 + $0x70] sm:$0xff]  ;;  %v4618_v44 = vld [vmem:[%s5088_s14 + $0x48] sm:$0xff] }
 0x29b   : > { %v6059_v7 = vpop.permute.xlu0 %2042  ;;  %2958 = vperm.xlu1 %4499, %v5564_v39   ;;  %2556 = vperm.xlu0 %4512, %v5829_v14   ;;  %v921_v14 = vadd.f32 %v5963_v62, %v900_v25  ;;  %v860_v20 = vpop.f32.mrf.mxu0  ;;  %954 = vst [vmem:[%s5988_s17 + $0x58] sm:$0xff] %v938_v33  ;;  %v3496_v33 = vld [vmem:[#allocation7 + $0x178] sm:$0xff] }
 0x29c   : > { %10008 = vst [vmem:[#allocation132_spill] sm:$0xff] %v6059_v7  ;;  %v6068_v41 = vpop.permute.xlu1 %2078  ;;  %v883_v29 = vadd.f32 %v860_v20, %v640_v51  ;;  %v940_v25 = vmax.f32 %v924_v15, 0.0  ;;  %v923_v48 = vadd.f32 %v5963_v62, %v902_v28  ;;  %v905_v8 = vmul.f32 %v5954_v27, %v884_v34  ;;  %4145 = vmatpush3.msra.mxu1 %v3464_v45  ;;  %v3511_v20 = vld [vmem:[#allocation7 + $0x1f0] sm:$0xff]  ;;  %v10071_v7 = vld [vmem:[#allocation91_spill] sm:$0xff] }
 0x29d   : > { %10009 = vst [vmem:[#allocation133_spill] sm:$0xff] %v6068_v41  ;;  %v937_v55 = vmax.f32 %v921_v14, 0.0  ;;  %4225 = vmatpush3.msra.mxu0 %v3496_v33  ;;  %v10016_v34 = vmov 7  }
 0x29e   : > { %v904_v40 = vmul.f32 %v5954_v27, %v883_v29  ;;  %956 = vst [vmem:[%s5988_s17 + $0x68] sm:$0xff] %v940_v25  ;;  %v939_v30 = vmax.f32 %v923_v48, 0.0  ;;  %v926_v14 = vadd.f32 %v5963_v62, %v905_v8  ;;  %v3479_v27 = vld [vmem:[#allocation7 + $0xf0] sm:$0xff]  ;;  %4226 = vmatprep.subr.mxu0 %v3511_v20  ;;  %v3510_v25 = vld [vmem:[#allocation7 + $0x1e8] sm:$0xff]  ;;  %v3477_v8 = vld [vmem:[#allocation7 + $0xe0] sm:$0xff] }
 0x29f   : > { %v6074_v50 = vpop.permute.xlu0 %2050  ;;  %4500 = vset.pattern.permute.xlu1 %v10003_v17  ;;  %2650 = vperm.xlu0 %4512, %v5530_v49   ;;  %953 = vst [vmem:[%s5988_s17 + $0x50] sm:$0xff] %v937_v55  ;;  %v3495_v55 = vld [vmem:[#allocation7 + $0x170] sm:$0xff]  ;;  %v3494_v48 = vld [vmem:[#allocation7 + $0x168] sm:$0xff]  ;;  %v3492_v20 = vld [vmem:[#allocation7 + $0x158] sm:$0xff] }
 0x2a0   : > { %10010 = vst [vmem:[#allocation134_spill] sm:$0xff] %v6074_v50  ;;  %v6082_v6 = vpop.permute.xlu1 %2086  ;;  %2658 = vperm.xlu1 %4500, %v5539_v37   ;;  %v925_v53 = vadd.f32 %v5963_v62, %v904_v40  ;;  %955 = vst [vmem:[%s5988_s17 + $0x60] sm:$0xff] %v939_v30  ;;  %v942_v15 = vmax.f32 %v926_v14, 0.0  ;;  %4146 = vmatprep.subr.mxu1 %v3479_v27  ;;  %v3478_v62 = vld [vmem:[#allocation7 + $0xe8] sm:$0xff]  ;;  %v3509_v40 = vld [vmem:[#allocation7 + $0x1e0] sm:$0xff] }
 0x2a1   : > { %10011 = vst [vmem:[#allocation135_spill] sm:$0xff] %v6082_v6  ;;  %4147 = vmatpush3.msra.mxu1 %v3463_v13  ;;  %4227 = vmatpush3.msra.mxu0 %v3495_v55  ;;  %v3461_v30 = vld [vmem:[#allocation7 + $0x60] sm:$0xff]  ;;  %v3460_v27 = vld [vmem:[#allocation7 + $0x58] sm:$0xff]  ;;  %v3475_v55 = vld [vmem:[#allocation7 + $0xd0] sm:$0xff] }
 0x2a2   : > { %v941_v28 = vmax.f32 %v925_v53, 0.0  ;;  %958 = vst [vmem:[%s5988_s17 + $0x78] sm:$0xff] %v942_v15  ;;  %4148 = vmatprep.subr.mxu1 %v3478_v62  ;;  %4228 = vmatprep.subr.mxu0 %v3510_v25  ;;  %v3493_v14 = vld [vmem:[#allocation7 + $0x160] sm:$0xff]  ;;  %v3508_v53 = vld [vmem:[#allocation7 + $0x1d8] sm:$0xff]  ;;  %v3507_v15 = vld [vmem:[#allocation7 + $0x1d0] sm:$0xff] }
 0x2a3   : > { %v6089_v46 = vpop.permute.xlu0 %2058  ;;  %2562 = vperm.xlu0 %4512, %v5838_v38   ;;  %4149 = vmatpush3.msra.mxu1 %v3462_v52  ;;  %v3491_v62 = vld [vmem:[#allocation7 + $0x150] sm:$0xff] }
 0x2a4   : > { %10012 = vst [vmem:[#allocation136_spill] sm:$0xff] %v6089_v46  ;;  %v6094_v22 = vpop.permute.xlu1 %2094  ;;  %4501 = vset.pattern.permute.xlu1 %v9997_v32  ;;  %957 = vst [vmem:[%s5988_s17 + $0x70] sm:$0xff] %v941_v28  ;;  %4229 = vmatpush3.msra.mxu0 %v3494_v48  ;;  %v3459_v28 = vld [vmem:[#allocation7 + $0x50] sm:$0xff]  ;;  %v3474_v48 = vld [vmem:[#allocation7 + $0xc8] sm:$0xff] }
 0x2a5   : > { %10013 = vst [vmem:[#allocation137_spill] sm:$0xff] %v6094_v22  ;;  %2848 = vperm.xlu1 %4501, %v5811_v24   ;;  %4150 = vmatprep.subr.mxu1 %v3477_v8  ;;  %v3506_v8 = vld [vmem:[#allocation7 + $0x1c8] sm:$0xff] }
 0x2a6   : > { %4230 = vmatprep.subr.mxu0 %v3509_v40  ;;  %4151 = vmatpush3.msra.mxu1 %v3461_v30  ;;  %v3458_v40 = vld [vmem:[#allocation7 + $0x48] sm:$0xff] }
 0x2a7   : > { %v6104_v38 = vpop.permute.xlu0 %2066  ;;  %2565 = vperm.xlu0 %4512, %v4618_v44   ;;  %4231 = vmatpush3.msra.mxu0 %v3493_v14  ;;  %v4620_v30 = vld [vmem:[%s5088_s14 + $0x68] sm:$0xff] }
 0x2a8   : > { %10014 = vst [vmem:[#allocation138_spill] sm:$0xff] %v6104_v38  ;;  %v6110_v51 = vpop.permute.xlu1 %2102  ;;  %4232 = vmatprep.subr.mxu0 %v3508_v53  ;;  %v3490_v14 = vld [vmem:[#allocation7 + $0x148] sm:$0xff]  ;;  %v3473_v53 = vld [vmem:[#allocation7 + $0xc0] sm:$0xff] }
 0x2a9   : > { %10015 = vst [vmem:[#allocation139_spill] sm:$0xff] %v6110_v51  ;;  %4502 = vset.pattern.permute.xlu1 %v10016_v34  ;;  %4233 = vmatpush3.msra.mxu0 %v3492_v20  ;;  %v3503_v51 = vld [vmem:[#allocation7 + $0x1b0] sm:$0xff]  ;;  %v10061_v46 = vld [vmem:[#allocation88_spill] sm:$0xff] }
 0x2aa   : > { %3152 = vperm.xlu1 %4502, %v5811_v24   ;;  %v3476_v24 = vld [vmem:[#allocation7 + $0xd8] sm:$0xff]  ;;  %4234 = vmatprep.subr.mxu0 %v3507_v15  ;;  %v6413_v50 = vsel %vm1081_vm11, %v10061_v46, 0.0  ;;  %vm10066_vm11 = vcmp.eq.s32.totalorder %v5101_v3, %v5380_v5 }
 0x2ab   : > { %v6114_v29 = vpop.permute.xlu0 %2074  ;;  %2568 = vperm.xlu0 %4512, %v5850_v10   ;;  %v4619_v10 = vld [vmem:[%s5088_s14 + $0x58] sm:$0xff]  ;;  %4152 = vmatprep.subr.mxu1 %v3476_v24 }
 0x2ac   : > { %10017 = vst [vmem:[#allocation140_spill] sm:$0xff] %v6114_v29  ;;  %4153 = vmatpush3.msra.mxu1 %v3460_v27  ;;  %4235 = vmatpush3.msra.mxu0 %v3491_v62  ;;  %v3505_v27 = vld [vmem:[#allocation7 + $0x1c0] sm:$0xff] }
 0x2ad   : > { %v6120_v45 = vpop.permute.xlu1 %2237  ;;  %4154 = vmatprep.subr.mxu1 %v3475_v55  ;;  %4236 = vmatprep.subr.mxu0 %v3506_v8  ;;  %v4621_v55 = vld [vmem:[%s5088_s14 + $0x78] sm:$0xff]  ;;  %v3489_v8 = vld [vmem:[#allocation7 + $0x140] sm:$0xff] }
 0x2ae   : > { %10018 = vst [vmem:[#allocation141_spill] sm:$0xff] %v6120_v45  ;;  %4503 = vset.pattern.permute.xlu1 %v10003_v17  ;;  %4155 = vmatpush3.msra.mxu1 %v3459_v28  ;;  %v3457_v28 = vld [vmem:[#allocation7 + $0x40] sm:$0xff] }
 0x2af   : > { %v6122_v33 = vpop.permute.xlu0 %2082  ;;  %2662 = vperm.xlu1 %4503, %v5584_v2   ;;  %2571 = vperm.xlu0 %4512, %v4619_v10  }
 0x2b0   : > { %10019 = vst [vmem:[#allocation142_spill] sm:$0xff] %v6122_v33  ;;  %4156 = vmatprep.subr.mxu1 %v3474_v48  ;;  %4237 = vmatpush3.msra.mxu0 %v3490_v14  ;;  %v6170_v14 = vadd.s32 128, %v5101_v3 }
 0x2b1   : > { %v6127_v13 = vpop.permute.xlu1 %2240  ;;  %4157 = vmatpush3.msra.mxu1 %v3458_v40  ;;  %4238 = vmatprep.subr.mxu0 %v3505_v27  ;;  %v3472_v40 = vld [vmem:[#allocation7 + $0xb8] sm:$0xff] }
 0x2b2   : > { %10020 = vst [vmem:[#allocation143_spill] sm:$0xff] %v6127_v13  ;;  %4158 = vmatprep.subr.mxu1 %v3473_v53  ;;  %4239 = vmatpush3.msra.mxu0 %v3489_v8  ;;  %v3504_v53 = vld [vmem:[#allocation7 + $0x1b8] sm:$0xff]  ;;  %v3471_v8 = vld [vmem:[#allocation7 + $0xb0] sm:$0xff]  ;;  %vm1058_vm2 = vcmp.eq.s32.totalorder %v6170_v14, %v5361_v59  ;;  %vm1050_vm4 = vcmp.eq.s32.totalorder %v6170_v14, %v5770_v63 }
 0x2b3   : > { %v6129_v44 = vpop.permute.xlu0 %2090  ;;  %4504 = vset.pattern.permute.xlu1 %v9997_v32  ;;  %2574 = vperm.xlu0 %4512, %v5860_v23   ;;  %v3456_v27 = vld [vmem:[#allocation7 + $0x38] sm:$0xff]  ;;  %vm1082_vm13 = vcmp.eq.s32.totalorder %v6170_v14, %v5435_v56  ;;  %vm1078_vm14 = vcmp.eq.s32.totalorder %v6170_v14, %v5431_v43  ;;  %v10059_v13 = vld [vmem:[#allocation29_spill] sm:$0xff] }
 0x2b4   : > { %10021 = vst [vmem:[#allocation144_spill] sm:$0xff] %v6129_v44  ;;  %2851 = vperm.xlu1 %4504, %v5844_v16   ;;  %4159 = vmatpush3.msra.mxu1 %v3457_v28  ;;  %v6178_v28 = vadd.s32 384, %v5101_v3  ;;  %v10036_v44 = vld [vmem:[#allocation27_spill] sm:$0xff]  ;;  %10062 = vst [vmem:[#allocation29_spill] sm:$0xff] %v6413_v50  ;;  %v10079_v50 = vld [vmem:[#allocation93_spill] sm:$0xff] }
 0x2b5   : > { %v6134_v25 = vpop.permute.xlu1 %2246  ;;  %4160 = vmatprep.subr.mxu1 %v3472_v40  ;;  %4240 = vmatprep.subr.mxu0 %v3504_v53  ;;  %vm1381_vm10 = vcmp.eq.s32.totalorder %v5101_v3, %v10036_v44 }
 0x2b6   : > { %10022 = vst [vmem:[#allocation145_spill] sm:$0xff] %v6134_v25  ;;  %4161 = vmatpush3.msra.mxu1 %v3456_v27  ;;  %vm1060_vm7 = vcmp.eq.s32.totalorder %v6178_v28, %v5361_v59  ;;  %v3487_v27 = vld [vmem:[#allocation7 + $0x130] sm:$0xff]  ;;  %vm1052_vm15 = vcmp.eq.s32.totalorder %v6178_v28, %v5770_v63  ;;  %vm1080_vm12 = vcmp.eq.s32.totalorder %v6178_v28, %v5431_v43  ;;  %v3468_v25 = vld [vmem:[#allocation7 + $0x98] sm:$0xff] }
 0x2b7   : > { %v6136_v52 = vpop.permute.xlu0 %2098  ;;  %2577 = vperm.xlu0 %4512, %v4620_v30   ;;  %4162 = vmatprep.subr.mxu1 %v3471_v8  ;;  %v10033_v8 = vld [vmem:[#allocation78_spill] sm:$0xff] }
 0x2b8   : > { %10023 = vst [vmem:[#allocation146_spill] sm:$0xff] %v6136_v52  ;;  %2966 = vperm.xlu1 %4504, %v5584_v2  }
 0x2b9   : > { %v6140_v23 = vpop.permute.xlu1 %2252 }
 0x2ba   : > { %10024 = vst [vmem:[#allocation147_spill] sm:$0xff] %v6140_v23 }
 0x2bb   : > { %2580 = vperm.xlu0 %4512, %v5872_v54  }
 0x2bc   : > { %v6142_v24 = vpop.permute.xlu0 %2234  ;;  %4505 = vset.pattern.permute.xlu1 %v10003_v17 }
 0x2bd   : > { %10025 = vst [vmem:[#allocation148_spill] sm:$0xff] %v6142_v24  ;;  %v6146_v10 = vpop.permute.xlu1 %2258  ;;  %2666 = vperm.xlu1 %4505, %v5547_v58  }
 0x2be   : > { %10026 = vst [vmem:[#allocation149_spill] sm:$0xff] %v6146_v10  ;;  %v10038_v10 = vld [vmem:[#allocation84_spill] sm:$0xff] }
 0x2bf   : > { %2583 = vperm.xlu0 %4512, %v4621_v55   ;;  %v6175_v55 = vadd.s32 256, %v5101_v3 }
 0x2c0   : > { %v6149_v20 = vpop.permute.xlu0 %2243 }
 0x2c1   : > { %10027 = vst [vmem:[#allocation150_spill] sm:$0xff] %v6149_v20  ;;  %v6152_v15 = vpop.permute.xlu1 %2264  ;;  %4506 = vset.pattern.permute.xlu1 %v9997_v32  ;;  %vm1059_vm6 = vcmp.eq.s32.totalorder %v6175_v55, %v5361_v59  ;;  %vm1051_vm3 = vcmp.eq.s32.totalorder %v6175_v55, %v5770_v63  ;;  %vm1083_vm9 = vcmp.eq.s32.totalorder %v6175_v55, %v5435_v56  ;;  %v3469_v63 = vld [vmem:[#allocation7 + $0xa0] sm:$0xff]  ;;  %v3500_v56 = vld [vmem:[#allocation7 + $0x198] sm:$0xff] }
 0x2c2   : > { %10028 = vst [vmem:[#allocation151_spill] sm:$0xff] %v6152_v15  ;;  %2854 = vperm.xlu1 %4506, %v5820_v11   ;;  %vm1079_vm1 = vcmp.eq.s32.totalorder %v6175_v55, %v5431_v43 }
 0x2c3   : > { %4537 = vset.pattern.permute.xlu0 %v10016_v34 }
 0x2c4   : > { %v6156_v54 = vpop.permute.xlu0 %2249  ;;  %3258 = vperm.xlu0 %4537, %v5530_v49  }
 0x2c5   : > { %v6160_v62 = vpop.permute.xlu1 %2270 }
 0x2c6   : > { %10029 = vst [vmem:[#allocation152_spill] sm:$0xff] %v6160_v62  ;;  %4507 = vset.pattern.permute.xlu1 %v10016_v34  ;;  %v3486_v62 = vld [vmem:[#allocation7 + $0x128] sm:$0xff] }
 0x2c7   : > { %3158 = vperm.xlu1 %4507, %v5820_v11   ;;  %v3488_v11 = vld [vmem:[#allocation7 + $0x138] sm:$0xff] }
 0x2c8   : > { %v6163_v48 = vpop.permute.xlu0 %2255  ;;  %3149 = vperm.xlu0 %4537, %v5804_v61   ;;  %4241 = vmatpush3.msra.mxu0 %v3488_v11  ;;  %v3454_v11 = vld [vmem:[#allocation7 + $0x28] sm:$0xff] }
 0x2c9   : > { %v6167_v30 = vpop.permute.xlu1 %2276  ;;  %4242 = vmatprep.subr.mxu0 %v3503_v51  ;;  %v3502_v51 = vld [vmem:[#allocation7 + $0x1a8] sm:$0xff] }
 0x2ca   : > { %10030 = vst [vmem:[#allocation153_spill] sm:$0xff] %v6167_v30  ;;  %4243 = vmatpush3.msra.mxu0 %v3487_v27 }
 0x2cb   : > { %4508 = vset.pattern.permute.xlu1 %v10003_v17  ;;  %4244 = vmatprep.subr.mxu0 %v3502_v51  ;;  %v6340_v51 = vsel %vm1065_vm8, %v10038_v10, 0.0  ;;  %vm10046_vm8 = vcmp.eq.s32.totalorder %v5101_v3, %v5424_v42 }
 0x2cc   : > { %v6172_v49 = vpop.permute.xlu0 %2261  ;;  %2670 = vperm.xlu1 %4508, %v5604_v35   ;;  %3262 = vperm.xlu0 %4537, %v5564_v39   ;;  %v3455_v39 = vld [vmem:[#allocation7 + $0x30] sm:$0xff] }
 0x2cd   : > { %v6183_v61 = vpop.permute.xlu1 %2346  ;;  %4163 = vmatpush3.msra.mxu1 %v3455_v39  ;;  %v10034_v39 = vld [vmem:[#allocation81_spill] sm:$0xff]  ;;  %4245 = vmatpush3.msra.mxu0 %v3486_v62 }
 0x2ce   : > { %10031 = vst [vmem:[#allocation154_spill] sm:$0xff] %v6183_v61  ;;  %v6276_v30 = vsel %vm1049_vm5, %v10034_v39, 0.0  ;;  %v6282_v27 = vsel %vm1050_vm4, %v10034_v39, 0.0  ;;  %v6288_v52 = vsel %vm1051_vm3, %v10034_v39, 0.0  ;;  %vm1376_vm5 = vcmp.eq.s32.totalorder %v6178_v28, %v5456_v47  ;;  %v10054_v61 = vld [vmem:[#allocation87_spill] sm:$0xff] }
 0x2cf   : > { %vm1382_vm4 = vcmp.eq.s32.totalorder %v6170_v14, %v10036_v44  ;;  %v6303_v15 = vsel %vm1052_vm15, %v10034_v39, 0.0  ;;  %vm1384_vm3 = vcmp.eq.s32.totalorder %v6178_v28, %v10036_v44  ;;  %vm10041_vm15 = vcmp.eq.s32.totalorder %v6175_v55, %v5397_v57 }
 0x2d0   : > { %v6189_v40 = vpop.permute.xlu0 %2267  ;;  %4509 = vset.pattern.permute.xlu1 %v9997_v32  ;;  %3266 = vperm.xlu0 %4537, %v5539_v37   ;;  %v3470_v37 = vld [vmem:[#allocation7 + $0xa8] sm:$0xff]  ;;  %v6352_v29 = vsel %vm10041_vm15, %v10038_v10, 0.0  ;;  %vm10050_vm15 = vcmp.eq.s32.totalorder %v6175_v55, %v5424_v42 }
 0x2d1   : > { %v6215_v53 = vpop.permute.xlu1 %2354  ;;  %2857 = vperm.xlu1 %4509, %v5856_v21   ;;  %4164 = vmatprep.subr.mxu1 %v3470_v37  ;;  %10042 = vst [vmem:[#allocation27_spill] sm:$0xff] %v6352_v29  ;;  %v1512_v29 = vsel %vm1384_vm3, %v5875_v12, 0.0  ;;  %vm10097_vm3 = vcmp.eq.s32.totalorder %v6178_v28, %v10059_v13 }
 0x2d2   : > { %10032 = vst [vmem:[#allocation155_spill] sm:$0xff] %v6215_v53  ;;  %4165 = vmatpush3.msra.mxu1 %v3454_v11  ;;  %v10045_v53 = vld [vmem:[#allocation86_spill] sm:$0xff] }
 0x2d3   : > { %v6366_v20 = vsel %vm10046_vm8, %v10045_v53, 0.0  ;;  %v6378_v11 = vsel %vm10050_vm15, %v10045_v53, 0.0  ;;  %vm10055_vm8 = vcmp.eq.s32.totalorder %v5101_v3, %v5340_v18  ;;  %vm10057_vm15 = vcmp.eq.s32.totalorder %v6175_v55, %v5340_v18  ;;  %4166 = vmatprep.subr.mxu1 %v3469_v63 }
 0x2d4   : > { %v6248_v21 = vpop.permute.xlu0 %2273  ;;  %3155 = vperm.xlu0 %4537, %v5844_v16   ;;  %v10037_v16 = vld [vmem:[#allocation83_spill] sm:$0xff]  ;;  %10047 = vst [vmem:[#allocation84_spill] sm:$0xff] %v6366_v20  ;;  %10051 = vst [vmem:[#allocation156_spill] sm:$0xff] %v6378_v11  ;;  %v1197_v23 = vsel %vm10055_vm8, %v10054_v61, 0.0  ;;  %v1199_v62 = vsel %vm10057_vm15, %v10054_v61, 0.0  ;;  %vm10060_vm8 = vcmp.eq.s32.totalorder %v6178_v28, %v5340_v18  ;;  %v6425_v63 = vsel %vm1083_vm9, %v10061_v46, 0.0 }
 0x2d5   : > { %v6291_v22 = vpop.permute.xlu1 %2362  ;;  %v6309_v37 = vsel %vm1057_vm0, %v10037_v16, 0.0  ;;  %v6315_v33 = vsel %vm1058_vm2, %v10037_v16, 0.0  ;;  %v6321_v6 = vsel %vm1059_vm6, %v10037_v16, 0.0  ;;  %2974 = vperm.xlu1 %4509, %v5604_v35   ;;  %vm1383_vm0 = vcmp.eq.s32.totalorder %v6175_v55, %v10036_v44  ;;  %10064 = vst [vmem:[#allocation159_spill] sm:$0xff] %v6425_v63  ;;  %v3498_v44 = vld [vmem:[#allocation7 + $0x188] sm:$0xff] }
 0x2d6   : > { %10035 = vst [vmem:[#allocation78_spill] sm:$0xff] %v6291_v22  ;;  %vm1086_vm2 = vcmp.eq.s32.totalorder %v6170_v14, %v10033_v8  ;;  %v6334_v39 = vsel %vm1060_vm7, %v10037_v16, 0.0  ;;  %vm10039_vm6 = vcmp.eq.s32.totalorder %v6170_v14, %v5397_v57  ;;  %v3501_v16 = vld [vmem:[#allocation7 + $0x1a0] sm:$0xff]  ;;  %vm10043_vm7 = vcmp.eq.s32.totalorder %v6178_v28, %v5397_v57 }
 0x2d7   : > { %v6346_v41 = vsel %vm10039_vm6, %v10038_v10, 0.0  ;;  %v6360_v22 = vsel %vm10043_vm7, %v10038_v10, 0.0  ;;  %vm10048_vm6 = vcmp.eq.s32.totalorder %v6170_v14, %v5424_v42  ;;  %v3453_v57 = vld [vmem:[#allocation7 + $0x20] sm:$0xff]  ;;  %vm10052_vm7 = vcmp.eq.s32.totalorder %v6178_v28, %v5424_v42  ;;  %4246 = vmatprep.subr.mxu0 %v3501_v16 }
 0x2d8   : > { %10040 = vst [vmem:[#allocation81_spill] sm:$0xff] %v6346_v41  ;;  %v6354_v59 = vpop.permute.xlu0 %2279  ;;  %10044 = vst [vmem:[#allocation83_spill] sm:$0xff] %v6360_v22  ;;  %v6372_v45 = vsel %vm10048_vm6, %v10045_v53, 0.0  ;;  %v6384_v10 = vsel %vm10052_vm7, %v10045_v53, 0.0  ;;  %vm10056_vm6 = vcmp.eq.s32.totalorder %v6170_v14, %v5340_v18  ;;  %3270 = vperm.xlu0 %4537, %v5584_v2   ;;  %v3485_v53 = vld [vmem:[#allocation7 + $0x120] sm:$0xff]  ;;  %vm1389_vm7 = vcmp.eq.s32.totalorder %v5101_v3, %v10059_v13  ;;  %v10065_v18 = vld [vmem:[#allocation89_spill] sm:$0xff] }
 0x2d9   : > { %10049 = vst [vmem:[#allocation86_spill] sm:$0xff] %v6372_v45  ;;  %10053 = vst [vmem:[#allocation157_spill] sm:$0xff] %v6384_v10  ;;  %v1198_v24 = vsel %vm10056_vm6, %v10054_v61, 0.0  ;;  %v6399_v42 = vpop.permute.xlu1 %2370  ;;  %v6407_v38 = vsel %vm10060_vm8, %v10054_v61, 0.0  ;;  %v6419_v2 = vsel %vm1082_vm13, %v10061_v46, 0.0  ;;  %4510 = vset.pattern.permute.xlu1 %v10003_v17  ;;  %v6432_v61 = vsel %vm10066_vm11, %v10065_v18, 0.0  ;;  %4167 = vmatpush3.msra.mxu1 %v3453_v57 }
 0x2da   : > { %10058 = vst [vmem:[#allocation87_spill] sm:$0xff] %v6399_v42  ;;  %10063 = vst [vmem:[#allocation158_spill] sm:$0xff] %v6419_v2  ;;  %vm10067_vm13 = vcmp.eq.s32.totalorder %v6170_v14, %v5380_v5  ;;  %vm10068_vm9 = vcmp.eq.s32.totalorder %v6175_v55, %v5380_v5  ;;  %vm10069_vm6 = vcmp.eq.s32.totalorder %v6178_v28, %v5380_v5  ;;  %2674 = vperm.xlu1 %4510, %v5556_v19   ;;  %v10084_v45 = vld [vmem:[#allocation95_spill] sm:$0xff]  ;;  %v4622_v41 = vld [vmem:[%s5088_s14 + $0x30] sm:$0xff] }
 0x2db   : > { %v6438_v42 = vsel %vm10067_vm13, %v10065_v18, 0.0  ;;  %v6444_v63 = vsel %vm10068_vm9, %v10065_v18, 0.0  ;;  %v6450_v16 = vsel %vm10069_vm6, %v10065_v18, 0.0  ;;  %vm1390_vm15 = vcmp.eq.s32.totalorder %v6170_v14, %v10059_v13  ;;  %v10075_v18 = vld [vmem:[#allocation96_spill] sm:$0xff]  ;;  %4247 = vmatpush3.msra.mxu0 %v3485_v53  ;;  %4168 = vmatprep.subr.mxu1 %v3468_v25 }
 0x2dc   : > { %v6453_v46 = vpop.permute.xlu0 %2350  ;;  %vm10072_vm8 = vcmp.eq.s32.totalorder %v5101_v3, %v5412_v0  ;;  %vm10073_vm11 = vcmp.eq.s32.totalorder %v6170_v14, %v5412_v0  ;;  %vm10074_vm13 = vcmp.eq.s32.totalorder %v6175_v55, %v5412_v0  ;;  %vm10076_vm9 = vcmp.eq.s32.totalorder %v5101_v3, %v5456_v47  ;;  %3274 = vperm.xlu0 %4537, %v5547_v58  }
 0x2dd   : > { %10070 = vst [vmem:[#allocation89_spill] sm:$0xff] %v6453_v46  ;;  %v6461_v60 = vsel %vm10072_vm8, %v10071_v7, 0.0  ;;  %v6467_v5 = vsel %vm10073_vm11, %v10071_v7, 0.0  ;;  %v6473_v57 = vsel %vm10074_vm13, %v10071_v7, 0.0  ;;  %v1501_v46 = vsel %vm10076_vm9, %v10075_v18, 0.0  ;;  %4248 = vmatprep.subr.mxu0 %v3500_v56  ;;  %4169 = vmatpush3.msra.mxu1 %v3452_v26 }
 0x2de   : > { %vm10078_vm13 = vcmp.eq.s32.totalorder %v6178_v28, %v5412_v0  ;;  %vm10080_vm9 = vcmp.eq.s32.totalorder %v5101_v3, %v5431_v43  ;;  %vm10081_vm6 = vcmp.eq.s32.totalorder %v6170_v14, %v5456_v47  ;;  %vm10082_vm11 = vcmp.eq.s32.totalorder %v6175_v55, %v5456_v47  ;;  %v6506_v0 = vpop.permute.xlu1 %2378  ;;  %4511 = vset.pattern.permute.xlu1 %v9997_v32  ;;  %v3499_v47 = vld [vmem:[#allocation7 + $0x190] sm:$0xff] }
 0x2df   : > { %v6489_v2 = vsel %vm10078_vm13, %v10071_v7, 0.0  ;;  %v6495_v25 = vsel %vm10080_vm9, %v10079_v50, 0.0  ;;  %v1502_v53 = vsel %vm10081_vm6, %v10075_v18, 0.0  ;;  %v1503_v10 = vsel %vm10082_vm11, %v10075_v18, 0.0  ;;  %10083 = vst [vmem:[#allocation91_spill] sm:$0xff] %v6506_v0  ;;  %v3467_v7 = vld [vmem:[#allocation7 + $0x90] sm:$0xff]  ;;  %4249 = vmatpush3.msra.mxu0 %v3484_v1  ;;  %2860 = vperm.xlu1 %4511, %v4622_v41  }
 0x2e0   : > { %vm1398_vm13 = vcmp.eq.s32.totalorder %v6170_v14, %v10077_v36  ;;  %vm1399_vm9 = vcmp.eq.s32.totalorder %v6175_v55, %v10077_v36  ;;  %vm1400_vm8 = vcmp.eq.s32.totalorder %v6178_v28, %v10077_v36  ;;  %vm1087_vm6 = vcmp.eq.s32.totalorder %v6175_v55, %v10033_v8  ;;  %v6557_v26 = vpop.permute.xlu0 %2358  ;;  %4170 = vmatprep.subr.mxu1 %v3467_v7  ;;  %v3483_v1 = vld [vmem:[#allocation7 + $0x110] sm:$0xff] }
 0x2e1   : > { %v6520_v58 = vsel %vm1078_vm14, %v10079_v50, 0.0  ;;  %v6526_v0 = vsel %vm1079_vm1, %v10079_v50, 0.0  ;;  %v6532_v11 = vsel %vm1080_vm12, %v10079_v50, 0.0  ;;  %vm10085_vm11 = vcmp.eq.s32.totalorder %v5101_v3, %v10033_v8  ;;  %10087 = vst [vmem:[#allocation31_spill] sm:$0xff] %v6557_v26  ;;  %v3466_v26 = vld [vmem:[#allocation7 + $0x88] sm:$0xff]  ;;  %4250 = vmatprep.subr.mxu0 %v3499_v47 }
 0x2e2   : > { %v6538_v20 = vsel %vm10085_vm11, %v10084_v45, 0.0  ;;  %vm1088_vm14 = vcmp.eq.s32.totalorder %v6178_v28, %v10033_v8  ;;  %v1504_v22 = vsel %vm1376_vm5, %v10075_v18, 0.0  ;;  %v6546_v43 = vadd.f32 %v1501_v46, %v1197_v23  ;;  %v3451_v18 = vld [vmem:[#allocation7 + $0x10] sm:$0xff]  ;;  %4251 = vmatpush3.msra.mxu0 %v3483_v1  ;;  %v3481_v1 = vld [vmem:[#allocation7 + $0x100] sm:$0xff] }
 0x2e3   : > { %v1509_v50 = vsel %vm1381_vm10, %v5875_v12, 0.0  ;;  %v1510_v56 = vsel %vm1382_vm4, %v5875_v12, 0.0  ;;  %v6559_v46 = vadd.f32 %v1502_v53, %v1198_v24  ;;  %v6561_v23 = vadd.f32 %v1503_v10, %v1199_v62  ;;  %v4623_v24 = vld [vmem:[%s5088_s14 + $0x28] sm:$0xff]  ;;  %4171 = vmatpush3.msra.mxu1 %v3451_v18  ;;  %4513 = vset.pattern.permute.xlu1 %v10016_v34  ;;  %v3449_v18 = vld [vmem:[#allocation7] sm:$0xff] }
 0x2e4   : > { %10086 = vst [vmem:[#allocation96_spill] sm:$0xff] %v6546_v43  ;;  %v1511_v43 = vsel %vm1383_vm0, %v5875_v12, 0.0  ;;  %vm2301_vm10 = vcmp.eq.s32.totalorder %v5101_v3, %v6156_v54  ;;  %vm2302_vm12 = vcmp.eq.s32.totalorder %v6170_v14, %v6156_v54  ;;  %vm2303_vm1 = vcmp.eq.s32.totalorder %v6175_v55, %v6156_v54  ;;  %3161 = vperm.xlu0 %4537, %v4623_v24   ;;  %v6581_v12 = vpop.permute.xlu1 %2386 }
 0x2e5   : > { %vm2304_vm5 = vcmp.eq.s32.totalorder %v6178_v28, %v6156_v54  ;;  %10088 = vst [vmem:[#allocation93_spill] sm:$0xff] %v6581_v12  ;;  %v6587_v10 = vsel %vm1086_vm2, %v10084_v45, 0.0  ;;  %v6590_v62 = vadd.f32 %v1504_v22, %v6407_v38  ;;  %v6593_v53 = vadd.f32 %v1509_v50, %v6432_v61  ;;  %v2367_v38 = vpop.permute.xlu0 %2366  ;;  %4172 = vmatprep.subr.mxu1 %v3466_v26  ;;  %v3482_v61 = vld [vmem:[#allocation7 + $0x108] sm:$0xff]  ;;  %v3465_v50 = vld [vmem:[#allocation7 + $0x80] sm:$0xff] }
 0x2e6   : > { %v6596_v7 = vadd.f32 %v1510_v56, %v6438_v42  ;;  %v6599_v24 = vadd.f32 %v1511_v43, %v6444_v63  ;;  %v6602_v12 = vadd.f32 %v1512_v29, %v6450_v16  ;;  %v1517_v22 = vsel %vm1389_vm7, %v5881_v9, 0.0  ;;  %v3450_v42 = vld [vmem:[#allocation7 + $0x8] sm:$0xff]  ;;  %4252 = vmatprep.subr.mxu0 %v3498_v44  ;;  %v3497_v56 = vld [vmem:[#allocation7 + $0x180] sm:$0xff]  ;;  %3164 = vperm.xlu1 %4513, %v4622_v41   ;;  %v10095_v44 = vld [vmem:[#allocation33_spill] sm:$0xff] }
 0x2e7   : > { %vm2309_vm4 = vcmp.eq.s32.totalorder %v5101_v3, %v6163_v48  ;;  %v6614_v29 = vsel %vm2301_vm10, %v2367_v38, 0.0  ;;  %v6619_v63 = vsel %vm2302_vm12, %v2367_v38, 0.0  ;;  %v6624_v16 = vsel %vm2303_vm1, %v2367_v38, 0.0  ;;  %v10093_v26 = vld [vmem:[#allocation23_spill] sm:$0xff]  ;;  %4173 = vmatpush3.msra.mxu1 %v3450_v42  ;;  %4253 = vmatpush3.msra.mxu0 %v3482_v61 }
 0x2e8   : > { %10089 = vst [vmem:[#allocation95_spill] sm:$0xff] %v6614_v29  ;;  %10090 = vst [vmem:[#allocation160_spill] sm:$0xff] %v6619_v63  ;;  %v6629_v43 = vsel %vm2304_vm5, %v2367_v38, 0.0  ;;  %vm1369_vm0 = vcmp.eq.s32.totalorder %v5101_v3, %v10093_v26  ;;  %v1518_v54 = vsel %vm1390_vm15, %v5881_v9, 0.0  ;;  %vm2310_vm11 = vcmp.eq.s32.totalorder %v6170_v14, %v6163_v48  ;;  %3278 = vperm.xlu0 %4537, %v5604_v35   ;;  %v6650_v47 = vpop.permute.xlu1 %2394  ;;  %v10211_v63 = vld [vmem:[#allocation48_spill] sm:$0xff]  ;;  %v10238_v29 = vld [vmem:[#allocation138_spill] sm:$0xff] }
 0x2e9   : > { %10091 = vst [vmem:[#allocation161_spill] sm:$0xff] %v6624_v16  ;;  %10092 = vst [vmem:[#allocation162_spill] sm:$0xff] %v6629_v43  ;;  %vm2311_vm10 = vcmp.eq.s32.totalorder %v6175_v55, %v6163_v48  ;;  %vm2312_vm12 = vcmp.eq.s32.totalorder %v6178_v28, %v6163_v48  ;;  %vm1405_vm1 = vcmp.eq.s32.totalorder %v5101_v3, %v10095_v44  ;;  %v1520_v41 = vsel %vm10097_vm3, %v5881_v9, 0.0 }
 0x2ea   : > { %10094 = vst [vmem:[#allocation23_spill] sm:$0xff] %v6650_v47  ;;  %vm1406_vm15 = vcmp.eq.s32.totalorder %v6170_v14, %v10095_v44  ;;  %vm1408_vm7 = vcmp.eq.s32.totalorder %v6178_v28, %v10095_v44  ;;  %vm10096_vm2 = vcmp.eq.s32.totalorder %v6175_v55, %v10059_v13  ;;  %v6669_v38 = vadd.f32 %v1517_v22, %v6461_v60  ;;  %v2375_v13 = vpop.permute.xlu0 %2374 }
 0x2eb   : > { %v1519_v35 = vsel %vm10096_vm2, %v5881_v9, 0.0  ;;  %vm10098_vm5 = vcmp.eq.s32.totalorder %v5101_v3, %v10077_v36  ;;  %v1526_v43 = vsel %vm1398_vm13, %v5887_v4, 0.0  ;;  %v1527_v9 = vsel %vm1399_vm9, %v5887_v4, 0.0  ;;  %4174 = vmatprep.subr.mxu1 %v3465_v50  ;;  %4254 = vmatprep.subr.mxu0 %v3497_v56 }
 0x2ec   : > { %v1525_v47 = vsel %vm10098_vm5, %v5887_v4, 0.0  ;;  %v1528_v60 = vsel %vm1400_vm8, %v5887_v4, 0.0  ;;  %vm2317_vm3 = vcmp.eq.s32.totalorder %v5101_v3, %v6172_v49  ;;  %v6692_v22 = vsel %vm2309_vm4, %v2375_v13, 0.0  ;;  %4175 = vmatpush3.msra.mxu1 %v3449_v18  ;;  %4255 = vmatpush3.msra.mxu0 %v3481_v1  ;;  %v6723_v48 = vpop.permute.xlu1 %2402 }
 0x2ed   : > { %10099 = vst [vmem:[#allocation33_spill] sm:$0xff] %v6692_v22  ;;  %v6697_v42 = vsel %vm2310_vm11, %v2375_v13, 0.0  ;;  %v6702_v4 = vsel %vm2311_vm10, %v2375_v13, 0.0  ;;  %v6707_v36 = vsel %vm2312_vm12, %v2375_v13, 0.0  ;;  %v6713_v61 = vsel %vm1087_vm6, %v10084_v45, 0.0  ;;  %4514 = vset.pattern.permute.xlu1 %v10003_v17  ;;  %3282 = vperm.xlu0 %4537, %v5556_v19   ;;  %10103 = vst [vmem:[#allocation166_spill] sm:$0xff] %v6723_v48 }
 0x2ee   : > { %10100 = vst [vmem:[#allocation163_spill] sm:$0xff] %v6697_v42  ;;  %10101 = vst [vmem:[#allocation164_spill] sm:$0xff] %v6702_v4  ;;  %vm2318_vm8 = vcmp.eq.s32.totalorder %v6170_v14, %v6172_v49  ;;  %vm2319_vm13 = vcmp.eq.s32.totalorder %v6175_v55, %v6172_v49  ;;  %vm2320_vm9 = vcmp.eq.s32.totalorder %v6178_v28, %v6172_v49  ;;  %v6729_v50 = vsel %vm1088_vm14, %v10084_v45, 0.0  ;;  %v10104_v13 = vld [vmem:[#allocation47_spill] sm:$0xff]  ;;  %v10112_v49 = vld [vmem:[#allocation24_spill] sm:$0xff] }
 0x2ef   : > { %10102 = vst [vmem:[#allocation165_spill] sm:$0xff] %v6707_v36  ;;  %v6732_v56 = vadd.f32 %v1518_v54, %v6467_v5  ;;  %v6735_v18 = vadd.f32 %v1519_v35, %v6473_v57  ;;  %v6738_v1 = vadd.f32 %v1520_v41, %v6489_v2  ;;  %2678 = vperm.xlu1 %4514, %v10104_v13   ;;  %v2383_v57 = vpop.permute.xlu0 %2382  ;;  %v4624_v48 = vld [vmem:[%s5088_s14 + $0x38] sm:$0xff]  ;;  %v10127_v36 = vld [vmem:[#allocation28_spill] sm:$0xff] }
 0x2f0   : > { %4360 = vmatprep.subr.mxu1 %v6096_v31  ;;  %v6743_v19 = vadd.f32 %v1525_v47, %v6495_v25  ;;  %v6746_v8 = vadd.f32 %v1526_v43, %v6520_v58  ;;  %v6749_v45 = vadd.f32 %v1527_v9, %v6526_v0  ;;  %v6752_v5 = vadd.f32 %v1528_v60, %v6532_v11  ;;  %v10111_v0 = vld [vmem:[#allocation25_spill] sm:$0xff]  ;;  %v10113_v58 = vld [vmem:[#allocation100_spill] sm:$0xff]  ;;  %v6816_v41 = vpop.permute.xlu1 %2538  ;;  %v10166_v22 = vld [vmem:[#allocation86_spill] sm:$0xff] }
 0x2f1   : > { %v6757_v2 = vsel %vm2317_vm3, %v2383_v57, 0.0  ;;  %v6762_v31 = vsel %vm2318_vm8, %v2383_v57, 0.0  ;;  %v6767_v25 = vsel %vm2319_vm13, %v2383_v57, 0.0  ;;  %v6772_v11 = vsel %vm2320_vm9, %v2383_v57, 0.0  ;;  %3286 = vperm.xlu0 %4537, %v10104_v13   ;;  %10117 = vst [vmem:[#allocation25_spill] sm:$0xff] %v6816_v41  ;;  %v10118_v9 = vld [vmem:[#allocation101_spill] sm:$0xff] }
 0x2f2   : > { %10105 = vst [vmem:[#allocation47_spill] sm:$0xff] %v6749_v45  ;;  %10106 = vst [vmem:[#allocation167_spill] sm:$0xff] %v6752_v5  ;;  %vm1377_vm6 = vcmp.eq.s32.totalorder %v5101_v3, %v10111_v0  ;;  %vm1378_vm14 = vcmp.eq.s32.totalorder %v6170_v14, %v10111_v0  ;;  %vm1379_vm4 = vcmp.eq.s32.totalorder %v6175_v55, %v10111_v0  ;;  %v1497_v43 = vsel %vm1369_vm0, %v10113_v58, 0.0  ;;  %v10128_v4 = vld [vmem:[#allocation36_spill] sm:$0xff] }
 0x2f3   : > { %10107 = vst [vmem:[#allocation168_spill] sm:$0xff] %v6757_v2  ;;  %10108 = vst [vmem:[#allocation169_spill] sm:$0xff] %v6762_v31  ;;  %vm2325_vm11 = vcmp.eq.s32.totalorder %v5101_v3, %v6189_v40  ;;  %vm2326_vm10 = vcmp.eq.s32.totalorder %v6170_v14, %v6189_v40  ;;  %vm2327_vm12 = vcmp.eq.s32.totalorder %v6175_v55, %v6189_v40  ;;  %4515 = vset.pattern.permute.xlu1 %v9997_v32  ;;  %v10182_v41 = vld [vmem:[#allocation52_spill] sm:$0xff] }
 0x2f4   : > { %10109 = vst [vmem:[#allocation170_spill] sm:$0xff] %v6767_v25  ;;  %10110 = vst [vmem:[#allocation171_spill] sm:$0xff] %v6772_v11  ;;  %vm2328_vm5 = vcmp.eq.s32.totalorder %v6178_v28, %v6189_v40  ;;  %vm1385_vm3 = vcmp.eq.s32.totalorder %v5101_v3, %v10112_v49  ;;  %vm1388_vm9 = vcmp.eq.s32.totalorder %v6178_v28, %v10112_v49  ;;  %v1533_v60 = vsel %vm1405_vm1, %v10118_v9, 0.0  ;;  %v2391_v11 = vpop.permute.xlu0 %2390  ;;  %v10125_v40 = vld [vmem:[#allocation44_spill] sm:$0xff] }
 0x2f5   : > { %vm10114_vm2 = vcmp.eq.s32.totalorder %v6170_v14, %v10093_v26  ;;  %vm10115_vm8 = vcmp.eq.s32.totalorder %v6175_v55, %v10093_v26  ;;  %vm10116_vm13 = vcmp.eq.s32.totalorder %v6178_v28, %v10093_v26  ;;  %v1534_v57 = vsel %vm1406_vm15, %v10118_v9, 0.0  ;;  %2863 = vperm.xlu1 %4515, %v4624_v48   ;;  %3290 = vperm.xlu0 %4537, %v10125_v40  }
 0x2f6   : > { %v1498_v54 = vsel %vm10114_vm2, %v10113_v58, 0.0  ;;  %v1499_v47 = vsel %vm10115_vm8, %v10113_v58, 0.0  ;;  %v1500_v35 = vsel %vm10116_vm13, %v10113_v58, 0.0  ;;  %vm10119_vm0 = vcmp.eq.s32.totalorder %v6175_v55, %v10095_v44 }
 0x2f7   : > { %v1535_v26 = vsel %vm10119_vm0, %v10118_v9, 0.0  ;;  %v1536_v58 = vsel %vm1408_vm7, %v10118_v9, 0.0  ;;  %v6838_v25 = vsel %vm2325_vm11, %v2391_v11, 0.0  ;;  %v6843_v31 = vsel %vm2326_vm10, %v2391_v11, 0.0  ;;  %v10124_v9 = vld [vmem:[#allocation26_spill] sm:$0xff] }
 0x2f8   : > { %10120 = vst [vmem:[#allocation24_spill] sm:$0xff] %v6838_v25  ;;  %10121 = vst [vmem:[#allocation100_spill] sm:$0xff] %v6843_v31  ;;  %v6848_v2 = vsel %vm2327_vm12, %v2391_v11, 0.0  ;;  %v6853_v44 = vsel %vm2328_vm5, %v2391_v11, 0.0  ;;  %vm1393_vm7 = vcmp.eq.s32.totalorder %v5101_v3, %v10124_v9  ;;  %vm1394_vm1 = vcmp.eq.s32.totalorder %v6170_v14, %v10124_v9  ;;  %v6884_v25 = vpop.permute.xlu1 %2544 }
 0x2f9   : > { %10122 = vst [vmem:[#allocation101_spill] sm:$0xff] %v6848_v2  ;;  %10123 = vst [vmem:[#allocation172_spill] sm:$0xff] %v6853_v44  ;;  %vm2333_vm15 = vcmp.eq.s32.totalorder %v5101_v3, %v6248_v21  ;;  %vm2334_vm2 = vcmp.eq.s32.totalorder %v6170_v14, %v6248_v21  ;;  %vm2335_vm11 = vcmp.eq.s32.totalorder %v6175_v55, %v6248_v21  ;;  %2982 = vperm.xlu1 %4515, %v10104_v13   ;;  %v10137_v13 = vld [vmem:[#allocation42_spill] sm:$0xff] }
 0x2fa   : > { %vm2336_vm10 = vcmp.eq.s32.totalorder %v6178_v28, %v6248_v21  ;;  %vm1395_vm12 = vcmp.eq.s32.totalorder %v6175_v55, %v10124_v9  ;;  %v6873_v11 = vadd.f32 %v1497_v43, %v6276_v30  ;;  %v6876_v44 = vadd.f32 %v1498_v54, %v6282_v27  ;;  %10126 = vst [vmem:[#allocation26_spill] sm:$0xff] %v6884_v25  ;;  %v2399_v43 = vpop.permute.xlu0 %2398  ;;  %v10138_v21 = vld [vmem:[#allocation49_spill] sm:$0xff]  ;;  %v10139_v54 = vld [vmem:[#allocation102_spill] sm:$0xff] }
 0x2fb   : > { %v6879_v2 = vadd.f32 %v1499_v47, %v6288_v52  ;;  %v6882_v31 = vadd.f32 %v1500_v35, %v6303_v15  ;;  %vm1401_vm8 = vcmp.eq.s32.totalorder %v5101_v3, %v10127_v36  ;;  %v6895_v52 = vadd.f32 %v1533_v60, %v6538_v20  ;;  %3294 = vperm.xlu0 %4537, %v10138_v21  }
 0x2fc   : > { %v6898_v15 = vadd.f32 %v1534_v57, %v6587_v10  ;;  %v6901_v30 = vadd.f32 %v1535_v26, %v6713_v61  ;;  %v6904_v27 = vadd.f32 %v1536_v58, %v6729_v50  ;;  %v6914_v20 = vsel %vm2333_vm15, %v2399_v43, 0.0  ;;  %v6960_v26 = vpop.permute.xlu1 %2547  ;;  %v10142_v58 = vld [vmem:[#allocation104_spill] sm:$0xff] }
 0x2fd   : > { %10129 = vst [vmem:[#allocation44_spill] sm:$0xff] %v6895_v52  ;;  %10133 = vst [vmem:[#allocation175_spill] sm:$0xff] %v6914_v20  ;;  %v6919_v10 = vsel %vm2334_vm2, %v2399_v43, 0.0  ;;  %v6924_v61 = vsel %vm2335_vm11, %v2399_v43, 0.0  ;;  %v6929_v50 = vsel %vm2336_vm10, %v2399_v43, 0.0  ;;  %vm1681_vm5 = vcmp.eq.s32.totalorder %v5101_v3, %v10137_v13  ;;  %4516 = vset.pattern.permute.xlu1 %v10016_v34 }
 0x2fe   : > { %10130 = vst [vmem:[#allocation36_spill] sm:$0xff] %v6898_v15  ;;  %10131 = vst [vmem:[#allocation173_spill] sm:$0xff] %v6901_v30  ;;  %vm2341_vm2 = vcmp.eq.s32.totalorder %v5101_v3, %v6354_v59  ;;  %vm2342_vm0 = vcmp.eq.s32.totalorder %v6170_v14, %v6354_v59  ;;  %vm2343_vm11 = vcmp.eq.s32.totalorder %v6175_v55, %v6354_v59  ;;  %v1505_v47 = vsel %vm1377_vm6, %v10139_v54, 0.0  ;;  %v10159_v15 = vld [vmem:[#allocation108_spill] sm:$0xff] }
 0x2ff   : > { %10132 = vst [vmem:[#allocation174_spill] sm:$0xff] %v6904_v27  ;;  %10134 = vst [vmem:[#allocation176_spill] sm:$0xff] %v6919_v10  ;;  %vm2344_vm13 = vcmp.eq.s32.totalorder %v6178_v28, %v6354_v59  ;;  %v1506_v35 = vsel %vm1378_vm14, %v10139_v54, 0.0  ;;  %v1507_v60 = vsel %vm1379_vm4, %v10139_v54, 0.0  ;;  %vm10140_vm10 = vcmp.eq.s32.totalorder %v6178_v28, %v10111_v0  ;;  %v10145_v10 = vld [vmem:[#allocation43_spill] sm:$0xff]  ;;  %3167 = vperm.xlu1 %4516, %v4624_v48  }
 0x300   : > { %10135 = vst [vmem:[#allocation177_spill] sm:$0xff] %v6924_v61  ;;  %10136 = vst [vmem:[#allocation178_spill] sm:$0xff] %v6929_v50  ;;  %v1508_v57 = vsel %vm10140_vm10, %v10139_v54, 0.0  ;;  %vm1683_vm6 = vcmp.eq.s32.totalorder %v6175_v55, %v10137_v13  ;;  %vm1684_vm15 = vcmp.eq.s32.totalorder %v6178_v28, %v10137_v13  ;;  %v1513_v43 = vsel %vm1385_vm3, %v10142_v58, 0.0  ;;  %v2407_v61 = vpop.permute.xlu0 %2406  ;;  %v10150_v48 = vld [vmem:[#allocation55_spill] sm:$0xff] }
 0x301   : > { %10141 = vst [vmem:[#allocation42_spill] sm:$0xff] %v6960_v26  ;;  %vm10143_vm14 = vcmp.eq.s32.totalorder %v6170_v14, %v10112_v49  ;;  %vm10144_vm4 = vcmp.eq.s32.totalorder %v6175_v55, %v10112_v49  ;;  %v1516_v54 = vsel %vm1388_vm9, %v10142_v58, 0.0  ;;  %vm1689_vm3 = vcmp.eq.s32.totalorder %v5101_v3, %v10145_v10  ;;  %v10173_v26 = vld [vmem:[#allocation111_spill] sm:$0xff] }
 0x302   : > { %v1514_v50 = vsel %vm10143_vm14, %v10142_v58, 0.0  ;;  %v1515_v0 = vsel %vm10144_vm4, %v10142_v58, 0.0  ;;  %vm1690_vm10 = vcmp.eq.s32.totalorder %v6170_v14, %v10145_v10  ;;  %v6990_v20 = vsel %vm2341_vm2, %v2407_v61, 0.0 }
 0x303   : > { %10146 = vst [vmem:[#allocation49_spill] sm:$0xff] %v6990_v20  ;;  %v6995_v49 = vsel %vm2342_vm0, %v2407_v61, 0.0  ;;  %v7000_v58 = vsel %vm2343_vm11, %v2407_v61, 0.0  ;;  %v7005_v27 = vsel %vm2344_vm13, %v2407_v61, 0.0  ;;  %vm1691_vm9 = vcmp.eq.s32.totalorder %v6175_v55, %v10145_v10  ;;  %4517 = vset.pattern.permute.xlu1 %v10003_v17 }
 0x304   : > { %10147 = vst [vmem:[#allocation102_spill] sm:$0xff] %v6995_v49  ;;  %10148 = vst [vmem:[#allocation104_spill] sm:$0xff] %v7000_v58  ;;  %vm1692_vm2 = vcmp.eq.s32.totalorder %v6178_v28, %v10145_v10  ;;  %vm1697_vm0 = vcmp.eq.s32.totalorder %v5101_v3, %v10150_v48  ;;  %vm1698_vm14 = vcmp.eq.s32.totalorder %v6170_v14, %v10150_v48  ;;  %v1529_v52 = vsel %vm1401_vm8, %v10159_v15, 0.0 }
 0x305   : > { %10149 = vst [vmem:[#allocation43_spill] sm:$0xff] %v7005_v27  ;;  %v1569_v49 = vadd.f32 %v1505_v47, %v6309_v37  ;;  %v1570_v58 = vadd.f32 %v1506_v35, %v6315_v33  ;;  %v7018_v59 = vadd.f32 %v1507_v60, %v6321_v6  ;;  %v7021_v61 = vadd.f32 %v1508_v57, %v6334_v39  ;;  %v10151_v27 = vld [vmem:[#allocation45_spill] sm:$0xff]  ;;  %v10153_v33 = vld [vmem:[#allocation106_spill] sm:$0xff]  ;;  %v7042_v35 = vpop.permute.xlu1 %2553  ;;  %v10157_v57 = vld [vmem:[#allocation83_spill] sm:$0xff] }
 0x306   : > { %3298 = vperm.xlu0 %4537, %v10151_v27   ;;  %vm1699_vm13 = vcmp.eq.s32.totalorder %v6175_v55, %v10150_v48  ;;  %v7029_v20 = vadd.f32 %v1513_v43, %v6340_v51  ;;  %v10152_v37 = vld [vmem:[#allocation81_spill] sm:$0xff]  ;;  %v1521_v6 = vsel %vm1393_vm7, %v10153_v33, 0.0  ;;  %v1522_v39 = vsel %vm1394_vm1, %v10153_v33, 0.0  ;;  %10154 = vst [vmem:[#allocation55_spill] sm:$0xff] %v7042_v35  ;;  %v10156_v51 = vld [vmem:[#allocation27_spill] sm:$0xff]  ;;  %2682 = vperm.xlu1 %4517, %v10125_v40  }
 0x307   : > { %v7032_v47 = vadd.f32 %v1514_v50, %v10152_v37  ;;  %v10155_v60 = vld [vmem:[#allocation41_spill] sm:$0xff]  ;;  %v7049_v50 = vadd.f32 %v1515_v0, %v10156_v51  ;;  %v7052_v43 = vadd.f32 %v1516_v54, %v10157_v57  ;;  %v1523_v37 = vsel %vm1395_vm12, %v10153_v33, 0.0  ;;  %v10165_v57 = vld [vmem:[#allocation84_spill] sm:$0xff] }
 0x308   : > { %vm1677_vm4 = vcmp.eq.s32.totalorder %v5101_v3, %v10155_v60  ;;  %vm10158_vm7 = vcmp.eq.s32.totalorder %v6178_v28, %v10124_v9  ;;  %vm10160_vm1 = vcmp.eq.s32.totalorder %v6170_v14, %v10127_v36  ;;  %v10161_v54 = vld [vmem:[#allocation109_spill] sm:$0xff]  ;;  %vm10162_vm11 = vcmp.eq.s32.totalorder %v5101_v3, %v10128_v4  ;;  %v10170_v36 = vld [vmem:[#allocation38_spill] sm:$0xff] }
 0x309   : > { %v1524_v30 = vsel %vm10158_vm7, %v10153_v33, 0.0  ;;  %v1530_v0 = vsel %vm10160_vm1, %v10159_v15, 0.0  ;;  %v1801_v51 = vsel %vm10162_vm11, %v10161_v54, 0.0  ;;  %vm10163_vm12 = vcmp.eq.s32.totalorder %v6170_v14, %v10128_v4  ;;  %v7079_v33 = vpop.permute.xlu0 %2954  ;;  %v10169_v15 = vld [vmem:[#allocation50_spill] sm:$0xff] }
 0x30a   : > { %v1802_v9 = vsel %vm10163_vm12, %v10161_v54, 0.0  ;;  %10164 = vst [vmem:[#allocation81_spill] sm:$0xff] %v7079_v33  ;;  %v1585_v42 = vadd.f32 %v1521_v6, %v10165_v57  ;;  %v1586_v5 = vadd.f32 %v1522_v39, %v10166_v22  ;;  %vm10167_vm11 = vcmp.eq.s32.totalorder %v6175_v55, %v10128_v4  ;;  %3302 = vperm.xlu0 %4537, %v10169_v15   ;;  %v10171_v22 = vld [vmem:[#allocation156_spill] sm:$0xff]  ;;  %v10172_v39 = vld [vmem:[#allocation157_spill] sm:$0xff]  ;;  %v7111_v15 = vpop.permute.xlu1 %2559 }
 0x30b   : > { %v1803_v45 = vsel %vm10167_vm11, %v10161_v54, 0.0  ;;  %vm10168_vm1 = vcmp.eq.s32.totalorder %v6178_v28, %v10128_v4  ;;  %v1587_v6 = vadd.f32 %v1523_v37, %v10171_v22  ;;  %v1588_v57 = vadd.f32 %v1524_v30, %v10172_v39  ;;  %10175 = vst [vmem:[#allocation106_spill] sm:$0xff] %v7111_v15  ;;  %v10176_v37 = vld [vmem:[#allocation40_spill] sm:$0xff]  ;;  %v10177_v30 = vld [vmem:[#allocation29_spill] sm:$0xff]  ;;  %v10179_v39 = vld [vmem:[#allocation158_spill] sm:$0xff]  ;;  %4518 = vset.pattern.permute.xlu1 %v9997_v32 }
 0x30c   : > { %v1804_v35 = vsel %vm10168_vm1, %v10161_v54, 0.0  ;;  %v1809_v4 = vsel %vm1681_vm5, %v10173_v26, 0.0  ;;  %vm10174_vm11 = vcmp.eq.s32.totalorder %v6170_v14, %v10137_v13  ;;  %vm1687_vm1 = vcmp.eq.s32.totalorder %v6175_v55, %v10170_v36  ;;  %v10185_v13 = vld [vmem:[#allocation46_spill] sm:$0xff] }
 0x30d   : > { %v1810_v54 = vsel %vm10174_vm11, %v10173_v26, 0.0  ;;  %vm1688_vm7 = vcmp.eq.s32.totalorder %v6178_v28, %v10170_v36  ;;  %v7122_v22 = vadd.f32 %v1529_v52, %v10177_v30  ;;  %v7125_v33 = vadd.f32 %v1530_v0, %v10179_v39 }
 0x30e   : > { %v7128_v15 = vadd.f32 %v1801_v51, %v6873_v11  ;;  %v7131_v25 = vadd.f32 %v1802_v9, %v6876_v44  ;;  %vm1695_vm5 = vcmp.eq.s32.totalorder %v6175_v55, %v10176_v37  ;;  %vm1696_vm11 = vcmp.eq.s32.totalorder %v6178_v28, %v10176_v37  ;;  %v7155_v51 = vpop.permute.xlu0 %2962  ;;  %3306 = vperm.xlu0 %4537, %v10185_v13   ;;  %v10189_v13 = vld [vmem:[#allocation62_spill] sm:$0xff] }
 0x30f   : > { %10178 = vst [vmem:[#allocation41_spill] sm:$0xff] %v7122_v22  ;;  %10180 = vst [vmem:[#allocation27_spill] sm:$0xff] %v7125_v33  ;;  %vm1701_vm8 = vcmp.eq.s32.totalorder %v5101_v3, %v10182_v41  ;;  %vm1702_vm12 = vcmp.eq.s32.totalorder %v6170_v14, %v10182_v41  ;;  %v7142_v52 = vadd.f32 %v1803_v45, %v6879_v2  ;;  %v1811_v44 = vsel %vm1683_vm6, %v10173_v26, 0.0  ;;  %v10184_v45 = vld [vmem:[#allocation113_spill] sm:$0xff]  ;;  %v7205_v22 = vpop.permute.xlu1 %2842 }
 0x310   : > { %10181 = vst [vmem:[#allocation83_spill] sm:$0xff] %v7131_v25  ;;  %v7145_v11 = vadd.f32 %v1804_v35, %v6882_v31  ;;  %v1812_v0 = vsel %vm1684_vm15, %v10173_v26, 0.0  ;;  %10183 = vst [vmem:[#allocation109_spill] sm:$0xff] %v7155_v51  ;;  %v7157_v9 = vadd.f32 %v1809_v4, %v1569_v49  ;;  %v7159_v30 = vadd.f32 %v1810_v54, %v1570_v58  ;;  %v10186_v58 = vld [vmem:[#allocation115_spill] sm:$0xff]  ;;  %v10193_v51 = vld [vmem:[#allocation64_spill] sm:$0xff] }
 0x311   : > { %v1817_v2 = vsel %vm1689_vm3, %v10184_v45, 0.0  ;;  %v1818_v31 = vsel %vm1690_vm10, %v10184_v45, 0.0  ;;  %v1819_v26 = vsel %vm1691_vm9, %v10184_v45, 0.0  ;;  %v1820_v49 = vsel %vm1692_vm2, %v10184_v45, 0.0  ;;  %v7188_v54 = vld [vmem:[%s5088_s14 + $0x40] sm:$0xff]  ;;  %10188 = vst [vmem:[#allocation84_spill] sm:$0xff] %v7205_v22 }
 0x312   : > { %v1825_v35 = vsel %vm1697_vm0, %v10186_v58, 0.0  ;;  %v1826_v4 = vsel %vm1698_vm14, %v10186_v58, 0.0  ;;  %2866 = vperm.xlu1 %4518, %v7188_v54   ;;  %v7192_v39 = vadd.f32 %v1811_v44, %v7018_v59  ;;  %v7195_v10 = vadd.f32 %v1812_v0, %v7021_v61  ;;  %v10190_v61 = vld [vmem:[#allocation116_spill] sm:$0xff]  ;;  %v10195_v22 = vld [vmem:[#allocation51_spill] sm:$0xff] }
 0x313   : > { %v1827_v45 = vsel %vm1699_vm13, %v10186_v58, 0.0  ;;  %vm10187_vm15 = vcmp.eq.s32.totalorder %v6178_v28, %v10150_v48  ;;  %vm1981_vm6 = vcmp.eq.s32.totalorder %v5101_v3, %v10189_v13  ;;  %vm1982_vm3 = vcmp.eq.s32.totalorder %v6170_v14, %v10189_v13  ;;  %3310 = vperm.xlu0 %4537, %v10195_v22  }
 0x314   : > { %v1828_v33 = vsel %vm10187_vm15, %v10186_v58, 0.0  ;;  %vm1983_vm10 = vcmp.eq.s32.totalorder %v6175_v55, %v10189_v13  ;;  %vm1984_vm9 = vcmp.eq.s32.totalorder %v6178_v28, %v10189_v13  ;;  %v7216_v59 = vadd.f32 %v1817_v2, %v7029_v20  ;;  %v7229_v58 = vpop.permute.xlu0 %2970  ;;  %v10194_v20 = vld [vmem:[#allocation68_spill] sm:$0xff] }
 0x315   : > { %v7219_v48 = vadd.f32 %v1818_v31, %v7032_v47  ;;  %v1805_v44 = vsel %vm1677_vm4, %v10190_v61, 0.0  ;;  %vm10191_vm2 = vcmp.eq.s32.totalorder %v6170_v14, %v10155_v60  ;;  %10192 = vst [vmem:[#allocation86_spill] sm:$0xff] %v7229_v58  ;;  %v7240_v47 = vadd.f32 %v1819_v26, %v7049_v50  ;;  %v10196_v50 = vld [vmem:[#allocation70_spill] sm:$0xff] }
 0x316   : > { %v1806_v0 = vsel %vm10191_vm2, %v10190_v61, 0.0  ;;  %v7243_v2 = vadd.f32 %v1820_v49, %v7052_v43  ;;  %v7245_v31 = vadd.f32 %v1825_v35, %v1585_v42  ;;  %v7247_v58 = vadd.f32 %v1826_v4, %v1586_v5  ;;  %2986 = vperm.xlu1 %4518, %v10125_v40   ;;  %v10203_v35 = vld [vmem:[#allocation66_spill] sm:$0xff] }
 0x317   : > { %v7258_v43 = vadd.f32 %v1827_v45, %v1587_v6  ;;  %v7260_v42 = vadd.f32 %v1828_v33, %v1588_v57  ;;  %vm10197_vm0 = vcmp.eq.s32.totalorder %v6175_v55, %v10155_v60  ;;  %vm10198_vm4 = vcmp.eq.s32.totalorder %v6178_v28, %v10155_v60  ;;  %v10199_v33 = vld [vmem:[#allocation96_spill] sm:$0xff]  ;;  %v10200_v57 = vld [vmem:[#allocation118_spill] sm:$0xff]  ;;  %3314 = vperm.xlu0 %4537, %v10211_v63  }
 0x318   : > { %v1807_v5 = vsel %vm10197_vm0, %v10190_v61, 0.0  ;;  %v1808_v26 = vsel %vm10198_vm4, %v10190_v61, 0.0  ;;  %vm1998_vm14 = vcmp.eq.s32.totalorder %v6170_v14, %v10196_v50  ;;  %vm1999_vm2 = vcmp.eq.s32.totalorder %v6175_v55, %v10196_v50  ;;  %v10204_v45 = vld [vmem:[#allocation120_spill] sm:$0xff] }
 0x319   : > { %vm2000_vm15 = vcmp.eq.s32.totalorder %v6178_v28, %v10196_v50  ;;  %v7280_v6 = vadd.f32 %v1805_v44, %v10199_v33  ;;  %v7283_v60 = vadd.f32 %v1806_v0, %v6559_v46  ;;  %vm10201_vm0 = vcmp.eq.s32.totalorder %v5101_v3, %v10170_v36  ;;  %v7311_v0 = vpop.permute.xlu1 %3146  ;;  %v7313_v33 = vpop.permute.xlu0 %2978 }
 0x31a   : > { %v1813_v40 = vsel %vm10201_vm0, %v10200_v57, 0.0  ;;  %vm10202_vm4 = vcmp.eq.s32.totalorder %v6170_v14, %v10170_v36  ;;  %v1815_v4 = vsel %vm1687_vm1, %v10200_v57, 0.0  ;;  %v1816_v46 = vsel %vm1688_vm7, %v10200_v57, 0.0  ;;  %10207 = vst [vmem:[#allocation38_spill] sm:$0xff] %v7311_v0  ;;  %10208 = vst [vmem:[#allocation156_spill] sm:$0xff] %v7313_v33  ;;  %v10209_v36 = vld [vmem:[#allocation65_spill] sm:$0xff]  ;;  %4519 = vset.pattern.permute.xlu1 %v10016_v34 }
 0x31b   : > { %v1814_v49 = vsel %vm10202_vm4, %v10200_v57, 0.0  ;;  %vm10205_vm0 = vcmp.eq.s32.totalorder %v5101_v3, %v10176_v37  ;;  %vm10206_vm4 = vcmp.eq.s32.totalorder %v6170_v14, %v10176_v37  ;;  %vm1986_vm1 = vcmp.eq.s32.totalorder %v6170_v14, %v10203_v35  ;;  %v10210_v33 = vld [vmem:[#allocation122_spill] sm:$0xff]  ;;  %v10212_v37 = vld [vmem:[#allocation67_spill] sm:$0xff]  ;;  %3170 = vperm.xlu1 %4519, %v7188_v54   ;;  %v10219_v54 = vld [vmem:[#allocation132_spill] sm:$0xff] }
 0x31c   : > { %v1821_v61 = vsel %vm10205_vm0, %v10204_v45, 0.0  ;;  %v1822_v44 = vsel %vm10206_vm4, %v10204_v45, 0.0  ;;  %vm1987_vm7 = vcmp.eq.s32.totalorder %v6175_v55, %v10203_v35  ;;  %vm1988_vm13 = vcmp.eq.s32.totalorder %v6178_v28, %v10203_v35 }
 0x31d   : > { %v1823_v57 = vsel %vm1695_vm5, %v10204_v45, 0.0  ;;  %v1824_v22 = vsel %vm1696_vm11, %v10204_v45, 0.0  ;;  %v1829_v0 = vsel %vm1701_vm8, %v10210_v33, 0.0  ;;  %v1830_v16 = vsel %vm1702_vm12, %v10210_v33, 0.0 }
 0x31e   : > { %vm1994_vm5 = vcmp.eq.s32.totalorder %v6170_v14, %v10209_v36  ;;  %vm1995_vm4 = vcmp.eq.s32.totalorder %v6175_v55, %v10209_v36  ;;  %vm1996_vm11 = vcmp.eq.s32.totalorder %v6178_v28, %v10209_v36  ;;  %v7349_v45 = vadd.f32 %v1807_v5, %v6561_v23 }
 0x31f   : > { %v7352_v41 = vadd.f32 %v1808_v26, %v6590_v62  ;;  %v7355_v63 = vadd.f32 %v1813_v40, %v6593_v53  ;;  %v7358_v33 = vadd.f32 %v1814_v49, %v6596_v7  ;;  %vm2002_vm8 = vcmp.eq.s32.totalorder %v6170_v14, %v10212_v37  ;;  %v10215_v40 = vld [vmem:[#allocation125_spill] sm:$0xff]  ;;  %4520 = vset.pattern.permute.xlu1 %v10003_v17  ;;  %v4627_v17 = vld [vmem:[%s5088_s14 + $0x48] sm:$0xff] }
 0x320   : > { %vm2003_vm12 = vcmp.eq.s32.totalorder %v6175_v55, %v10212_v37  ;;  %vm2004_vm0 = vcmp.eq.s32.totalorder %v6178_v28, %v10212_v37  ;;  %v7368_v23 = vadd.f32 %v1815_v4, %v6599_v24  ;;  %v7371_v62 = vadd.f32 %v1816_v46, %v6602_v12  ;;  %v7437_v46 = vpop.permute.xlu0 %2541  ;;  %2686 = vperm.xlu1 %4520, %v10138_v21  }
 0x321   : > { %v7374_v53 = vadd.f32 %v1821_v61, %v6669_v38  ;;  %v7377_v7 = vadd.f32 %v1822_v44, %v6732_v56  ;;  %v7381_v5 = vadd.f32 %v1823_v57, %v6735_v18  ;;  %v7384_v26 = vadd.f32 %v1824_v22, %v6738_v1  ;;  %v7416_v1 = vpop.permute.xlu1 %2654  ;;  %10223 = vst [vmem:[#allocation29_spill] sm:$0xff] %v7437_v46  ;;  %v10227_v57 = vld [vmem:[#allocation129_spill] sm:$0xff] }
 0x322   : > { %v7387_v24 = vadd.f32 %v1829_v0, %v6743_v19  ;;  %v7390_v12 = vadd.f32 %v1830_v16, %v6746_v8  ;;  %v7396_v38 = vsel %vm1981_vm6, %v10215_v40, 0.0  ;;  %v7402_v56 = vsel %vm1982_vm3, %v10215_v40, 0.0  ;;  %10216 = vst [vmem:[#allocation40_spill] sm:$0xff] %v7416_v1  ;;  %v4626_v19 = vld [vmem:[%s5088_s14 + $0x78] sm:$0xff]  ;;  %v10217_v8 = vld [vmem:[#allocation127_spill] sm:$0xff] }
 0x323   : > { %v7408_v18 = vsel %vm1983_vm10, %v10215_v40, 0.0  ;;  %v7414_v16 = vsel %vm1984_vm9, %v10215_v40, 0.0  ;;  %3191 = vperm.xlu0 %4537, %v4626_v19   ;;  %vm10218_vm6 = vcmp.eq.s32.totalorder %v5101_v3, %v10194_v20  ;;  %vm10220_vm3 = vcmp.eq.s32.totalorder %v5101_v3, %v10193_v51 }
 0x324   : > { %10213 = vst [vmem:[#allocation157_spill] sm:$0xff] %v7387_v24  ;;  %10214 = vst [vmem:[#allocation111_spill] sm:$0xff] %v7390_v12  ;;  %v7423_v22 = vsel %vm10218_vm6, %v10217_v8, 0.0  ;;  %v2105_v49 = vsel %vm10220_vm3, %v10219_v54, 0.0  ;;  %vm10221_vm10 = vcmp.eq.s32.totalorder %v6175_v55, %v10193_v51  ;;  %vm10222_vm9 = vcmp.eq.s32.totalorder %v6178_v28, %v10193_v51  ;;  %4521 = vset.pattern.permute.xlu1 %v9997_v32 }
 0x325   : > { %v2107_v13 = vsel %vm10221_vm10, %v10219_v54, 0.0  ;;  %v2108_v4 = vsel %vm10222_vm9, %v10219_v54, 0.0  ;;  %vm10224_vm6 = vcmp.eq.s32.totalorder %v6170_v14, %v10194_v20  ;;  %vm10225_vm3 = vcmp.eq.s32.totalorder %v6175_v55, %v10194_v20  ;;  %2869 = vperm.xlu1 %4521, %v4627_v17  }
 0x326   : > { %v2118_v61 = vsel %vm10224_vm6, %v10217_v8, 0.0  ;;  %v7447_v44 = vsel %vm10225_vm3, %v10217_v8, 0.0  ;;  %vm10226_vm10 = vcmp.eq.s32.totalorder %v6178_v28, %v10194_v20  ;;  %vm10228_vm9 = vcmp.eq.s32.totalorder %v5101_v3, %v10196_v50  ;;  %v10232_v50 = vld [vmem:[#allocation134_spill] sm:$0xff] }
 0x327   : > { %v7453_v0 = vsel %vm10226_vm10, %v10217_v8, 0.0  ;;  %v7459_v40 = vsel %vm10228_vm9, %v10227_v57, 0.0  ;;  %v7466_v19 = vsel %vm1998_vm14, %v10227_v57, 0.0  ;;  %v7472_v20 = vsel %vm1999_vm2, %v10227_v57, 0.0 }
 0x328   : > { %v7478_v8 = vsel %vm2000_vm15, %v10227_v57, 0.0  ;;  %vm10229_vm6 = vcmp.eq.s32.totalorder %v6170_v14, %v10193_v51  ;;  %v7488_v24 = vadd.f32 %v2105_v49, %v7128_v15  ;;  %v7491_v1 = vadd.f32 %v2107_v13, %v7142_v52  ;;  %v7516_v49 = vpop.permute.xlu1 %2845  ;;  %v7518_v13 = vpop.permute.xlu0 %2550 }
 0x329   : > { %v7484_v12 = vsel %vm10229_vm6, %v10219_v54, 0.0  ;;  %v7494_v46 = vadd.f32 %v2108_v4, %v7145_v11  ;;  %vm10233_vm14 = vcmp.eq.s32.totalorder %v5101_v3, %v10203_v35  ;;  %v2114_v51 = vsel %vm1986_vm1, %v10232_v50, 0.0  ;;  %v10234_v11 = vld [vmem:[#allocation136_spill] sm:$0xff]  ;;  %10236 = vst [vmem:[#allocation115_spill] sm:$0xff] %v7516_v49  ;;  %10237 = vst [vmem:[#allocation62_spill] sm:$0xff] %v7518_v13  ;;  %2990 = vperm.xlu1 %4521, %v10138_v21  }
 0x32a   : > { %10230 = vst [vmem:[#allocation158_spill] sm:$0xff] %v7484_v12  ;;  %v2113_v57 = vsel %vm10233_vm14, %v10232_v50, 0.0  ;;  %v2115_v15 = vsel %vm1987_vm7, %v10232_v50, 0.0  ;;  %v2116_v52 = vsel %vm1988_vm13, %v10232_v50, 0.0  ;;  %vm10235_vm15 = vcmp.eq.s32.totalorder %v5101_v3, %v10209_v36 }
 0x32b   : > { %10231 = vst [vmem:[#allocation113_spill] sm:$0xff] %v7494_v46  ;;  %v2121_v54 = vsel %vm10235_vm15, %v10234_v11, 0.0  ;;  %v2122_v4 = vsel %vm1994_vm5, %v10234_v11, 0.0  ;;  %v2123_v35 = vsel %vm1995_vm4, %v10234_v11, 0.0  ;;  %v2124_v50 = vsel %vm1996_vm11, %v10234_v11, 0.0 }
 0x32c   : > { %vm10239_vm13 = vcmp.eq.s32.totalorder %v5101_v3, %v10212_v37  ;;  %v7537_v49 = vadd.f32 %v2113_v57, %v7157_v9  ;;  %v2130_v27 = vsel %vm2002_vm8, %v10238_v29, 0.0  ;;  %v2131_v12 = vsel %vm2003_vm12, %v10238_v29, 0.0  ;;  %v7577_v37 = vpop.permute.xlu1 %2958 }
 0x32d   : > { %v2129_v13 = vsel %vm10239_vm13, %v10238_v29, 0.0  ;;  %v2132_v36 = vsel %vm2004_vm0, %v10238_v29, 0.0  ;;  %v7553_v9 = vadd.f32 %v2114_v51, %v7159_v30  ;;  %v7556_v57 = vadd.f32 %v2115_v15, %v7192_v39  ;;  %v10240_v51 = vld [vmem:[#allocation143_spill] sm:$0xff]  ;;  %4522 = vset.pattern.permute.xlu1 %v10016_v34 }
 0x32e   : > { %v7559_v11 = vadd.f32 %v2116_v52, %v7195_v10  ;;  %v7562_v25 = vadd.f32 %v2121_v54, %v7216_v59  ;;  %v7566_v46 = vadd.f32 %v2122_v4, %v7219_v48  ;;  %v7569_v29 = vadd.f32 %v2123_v35, %v7240_v47  ;;  %v7590_v47 = vpop.permute.xlu0 %2556  ;;  %3173 = vperm.xlu1 %4522, %v4627_v17  }
 0x32f   : > { %v7572_v30 = vadd.f32 %v2124_v50, %v7243_v2  ;;  %v7575_v39 = vadd.f32 %v2129_v13, %v7245_v31  ;;  %v7580_v10 = vadd.f32 %v2130_v27, %v7247_v58  ;;  %v7583_v59 = vadd.f32 %v2131_v12, %v7258_v43  ;;  %v10241_v27 = vld [vmem:[#allocation145_spill] sm:$0xff]  ;;  %v10242_v58 = vld [vmem:[#allocation148_spill] sm:$0xff] }
 0x330   : > { %v7586_v48 = vadd.f32 %v2132_v36, %v7260_v42  ;;  %vm2289_vm2 = vcmp.eq.s32.totalorder %v5101_v3, %v10240_v51  ;;  %vm2290_vm1 = vcmp.eq.s32.totalorder %v6170_v14, %v10240_v51  ;;  %vm2291_vm7 = vcmp.eq.s32.totalorder %v6175_v55, %v10240_v51 }
 0x331   : > { %vm2292_vm0 = vcmp.eq.s32.totalorder %v6178_v28, %v10240_v51  ;;  %vm2297_vm5 = vcmp.eq.s32.totalorder %v5101_v3, %v10241_v27  ;;  %vm2298_vm4 = vcmp.eq.s32.totalorder %v6170_v14, %v10241_v27  ;;  %vm2299_vm11 = vcmp.eq.s32.totalorder %v6175_v55, %v10241_v27  ;;  %v10253_v51 = vld [vmem:[#allocation83_spill] sm:$0xff] }
 0x332   : > { %vm2281_vm12 = vcmp.eq.s32.totalorder %v5101_v3, %v10242_v58  ;;  %vm2283_vm3 = vcmp.eq.s32.totalorder %v6175_v55, %v10242_v58  ;;  %vm2284_vm10 = vcmp.eq.s32.totalorder %v6178_v28, %v10242_v58  ;;  %v7615_v2 = vadd.f32 %v7396_v38, %v7280_v6  ;;  %v7636_v6 = vpop.permute.xlu0 %2650  ;;  %v10243_v38 = vld [vmem:[#allocation147_spill] sm:$0xff]  ;;  %v10251_v35 = vld [vmem:[#allocation113_spill] sm:$0xff] }
 0x333   : > { %v7619_v31 = vadd.f32 %v7402_v56, %v7283_v60  ;;  %v7623_v43 = vadd.f32 %v7408_v18, %v7349_v45  ;;  %v7627_v21 = vadd.f32 %v7414_v16, %v7352_v41  ;;  %v7631_v42 = vadd.f32 %v7423_v22, %v7355_v63  ;;  %v10244_v41 = vld [vmem:[#allocation154_spill] sm:$0xff]  ;;  %v10245_v45 = vld [vmem:[#allocation141_spill] sm:$0xff]  ;;  %v7657_v18 = vpop.permute.xlu1 %2658 }
 0x334   : > { %v7634_v12 = vadd.f32 %v2118_v61, %v7358_v33  ;;  %v2409_v60 = vsel %vm2281_vm12, %v10244_v41, 0.0  ;;  %v7649_v63 = vadd.f32 %v7447_v44, %v7368_v23  ;;  %v7653_v33 = vadd.f32 %v7453_v0, %v7371_v62  ;;  %v10246_v56 = vld [vmem:[#allocation150_spill] sm:$0xff] }
 0x335   : > { %vm2308_vm14 = vcmp.eq.s32.totalorder %v6178_v28, %v10243_v38  ;;  %vm2286_vm12 = vcmp.eq.s32.totalorder %v6170_v14, %v10245_v45  ;;  %vm2287_vm15 = vcmp.eq.s32.totalorder %v6175_v55, %v10245_v45  ;;  %vm2288_vm6 = vcmp.eq.s32.totalorder %v6178_v28, %v10245_v45 }
 0x336   : > { %vm2294_vm9 = vcmp.eq.s32.totalorder %v6170_v14, %v10246_v56  ;;  %vm2295_vm13 = vcmp.eq.s32.totalorder %v6175_v55, %v10246_v56  ;;  %v7675_v23 = vadd.f32 %v7459_v40, %v7374_v53  ;;  %v7680_v62 = vadd.f32 %v7466_v19, %v7377_v7  ;;  %v7707_v61 = vpop.permute.xlu0 %2562  ;;  %v10249_v19 = vld [vmem:[#allocation78_spill] sm:$0xff] }
 0x337   : > { %v7684_v16 = vadd.f32 %v7472_v20, %v7381_v5  ;;  %v7688_v22 = vadd.f32 %v7478_v8, %v7384_v26  ;;  %vm2282_vm8 = vcmp.eq.s32.totalorder %v6170_v14, %v10242_v58  ;;  %v2411_v53 = vsel %vm2283_vm3, %v10244_v41, 0.0  ;;  %v10247_v5 = vld [vmem:[#allocation155_spill] sm:$0xff]  ;;  %10248 = vst [vmem:[#allocation116_spill] sm:$0xff] %v7707_v61  ;;  %v7737_v52 = vpop.permute.xlu1 %2848  ;;  %v10254_v58 = vld [vmem:[#allocation158_spill] sm:$0xff] }
 0x338   : > { %v2412_v7 = vsel %vm2284_vm10, %v10244_v41, 0.0  ;;  %v2417_v26 = vsel %vm2289_vm2, %v10247_v5, 0.0  ;;  %v7705_v17 = vadd.f32 %v2409_v60, %v7488_v24  ;;  %v2418_v44 = vsel %vm2290_vm1, %v10247_v5, 0.0 }
 0x339   : > { %v2419_v0 = vsel %vm2291_vm7, %v10247_v5, 0.0  ;;  %v2420_v40 = vsel %vm2292_vm0, %v10247_v5, 0.0  ;;  %v2425_v24 = vsel %vm2297_vm5, %v10249_v19, 0.0  ;;  %v2426_v20 = vsel %vm2298_vm4, %v10249_v19, 0.0 }
 0x33a   : > { %v2427_v8 = vsel %vm2299_vm11, %v10249_v19, 0.0  ;;  %vm10250_vm2 = vcmp.eq.s32.totalorder %v6178_v28, %v10241_v27  ;;  %v2410_v54 = vsel %vm2282_vm8, %v10244_v41, 0.0  ;;  %v7741_v13 = vadd.f32 %v2417_v26, %v7537_v49  ;;  %v10255_v41 = vld [vmem:[#allocation45_spill] sm:$0xff] }
 0x33b   : > { %v2428_v15 = vsel %vm10250_vm2, %v10249_v19, 0.0  ;;  %v7744_v4 = vadd.f32 %v2411_v53, %v7491_v1  ;;  %v7747_v50 = vadd.f32 %v2412_v7, %v10251_v35  ;;  %v10252_v36 = vmov 5   ;;  %v7762_v1 = vpop.permute.xlu0 %2565 }
 0x33c   : > { %4523 = vset.pattern.permute.xlu1 %v10252_v36  ;;  %v2170_v60 = vadd.f32 %v10254_v58, %v10253_v51  ;;  %v7753_v27 = vadd.f32 %v2418_v44, %v7553_v9  ;;  %v7756_v5 = vadd.f32 %v2419_v0, %v7556_v57  ;;  %v7759_v49 = vadd.f32 %v2420_v40, %v7559_v11  ;;  %v10257_v11 = vld [vmem:[#allocation87_spill] sm:$0xff]  ;;  %v4628_v58 = vld [vmem:[%s5088_s14 + $0x50] sm:$0xff] }
 0x33d   : > { %2690 = vperm.xlu1 %4523, %v10255_v41   ;;  %10256 = vst [vmem:[#allocation64_spill] sm:$0xff] %v7762_v1  ;;  %v7765_v53 = vadd.f32 %v2425_v24, %v7562_v25  ;;  %v7768_v7 = vadd.f32 %v2426_v20, %v7566_v46  ;;  %v7771_v26 = vadd.f32 %v2427_v8, %v7569_v29  ;;  %v10261_v29 = vld [vmem:[#allocation89_spill] sm:$0xff]  ;;  %v2436_v0 = vsel %vm2308_vm14, %v10257_v11, 0.0  ;;  %v7810_v20 = vpop.permute.xlu1 %3152  ;;  %v10263_v8 = vld [vmem:[#allocation31_spill] sm:$0xff] }
 0x33e   : > { %v7774_v9 = vadd.f32 %v2428_v15, %v7572_v30  ;;  %v7776_v57 = vadd.f32 %v2410_v54, %v2170_v60  ;;  %vm10258_vm1 = vcmp.eq.s32.totalorder %v5101_v3, %v10243_v38  ;;  %vm10259_vm7 = vcmp.eq.s32.totalorder %v6170_v14, %v10243_v38 }
 0x33f   : > { %v2433_v44 = vsel %vm10258_vm1, %v10257_v11, 0.0  ;;  %v2434_v25 = vsel %vm10259_vm7, %v10257_v11, 0.0  ;;  %vm10260_vm0 = vcmp.eq.s32.totalorder %v6175_v55, %v10243_v38  ;;  %vm10262_vm5 = vcmp.eq.s32.totalorder %v5101_v3, %v10245_v45  ;;  %v7829_v35 = vpop.permute.xlu0 %2568 }
 0x340   : > { %v2435_v46 = vsel %vm10260_vm0, %v10257_v11, 0.0  ;;  %v2413_v30 = vsel %vm10262_vm5, %v10261_v29, 0.0  ;;  %v2414_v40 = vsel %vm2286_vm12, %v10261_v29, 0.0  ;;  %v2415_v19 = vsel %vm2287_vm15, %v10261_v29, 0.0  ;;  %10266 = vst [vmem:[#allocation68_spill] sm:$0xff] %v7829_v35 }
 0x341   : > { %v2416_v24 = vsel %vm2288_vm6, %v10261_v29, 0.0  ;;  %vm10264_vm4 = vcmp.eq.s32.totalorder %v5101_v3, %v10246_v56  ;;  %v2422_v15 = vsel %vm2294_vm9, %v10263_v8, 0.0  ;;  %v2423_v54 = vsel %vm2295_vm13, %v10263_v8, 0.0  ;;  %4524 = vset.pattern.permute.xlu1 %v9997_v32 }
 0x342   : > { %v2421_v38 = vsel %vm10264_vm4, %v10263_v8, 0.0  ;;  %vm10265_vm11 = vcmp.eq.s32.totalorder %v6178_v28, %v10246_v56  ;;  %v2477_v51 = vadd.f32 %v2413_v30, %v7615_v2  ;;  %2872 = vperm.xlu1 %4524, %v4628_v58   ;;  %v7834_v60 = vadd.f32 %v2433_v44, %v7575_v39  ;;  %v10273_v44 = vld [vmem:[#allocation29_spill] sm:$0xff] }
 0x343   : > { %v2424_v45 = vsel %vm10265_vm11, %v10263_v8, 0.0  ;;  %v7837_v11 = vadd.f32 %v2434_v25, %v7580_v10  ;;  %v7840_v29 = vadd.f32 %v2435_v46, %v7583_v59  ;;  %v2478_v56 = vadd.f32 %v2414_v40, %v7619_v31  ;;  %v10271_v31 = vld [vmem:[#allocation95_spill] sm:$0xff]  ;;  %v10279_v46 = vld [vmem:[#allocation84_spill] sm:$0xff] }
 0x344   : > { %10267 = vst [vmem:[#allocation70_spill] sm:$0xff] %v7834_v60  ;;  %v2479_v8 = vadd.f32 %v2415_v19, %v7623_v43  ;;  %v2480_v1 = vadd.f32 %v2416_v24, %v7627_v21  ;;  %v7846_v35 = vadd.f32 %v2436_v0, %v7586_v48  ;;  %v7849_v2 = vadd.f32 %v2421_v38, %v7631_v42  ;;  %v10272_v21 = vld [vmem:[#allocation160_spill] sm:$0xff]  ;;  %v7872_v42 = vpop.permute.xlu1 %2662  ;;  %v10283_v19 = vld [vmem:[#allocation81_spill] sm:$0xff] }
 0x345   : > { %10268 = vst [vmem:[#allocation96_spill] sm:$0xff] %v7837_v11  ;;  %10269 = vst [vmem:[#allocation118_spill] sm:$0xff] %v7840_v29  ;;  %v7852_v39 = vadd.f32 %v2422_v15, %v7634_v12  ;;  %v7855_v10 = vadd.f32 %v2423_v54, %v7649_v63  ;;  %v7858_v59 = vadd.f32 %v2424_v45, %v7653_v33  ;;  %v7874_v12 = vpop.permute.xlu0 %2571  ;;  %v10275_v63 = vld [vmem:[#allocation161_spill] sm:$0xff] }
 0x346   : > { %10270 = vst [vmem:[#allocation66_spill] sm:$0xff] %v7846_v35  ;;  %v7862_v43 = vadd.f32 %v10271_v31, %v7675_v23  ;;  %v7866_v48 = vadd.f32 %v10272_v21, %v7680_v62  ;;  %vm2589_vm8 = vcmp.eq.s32.totalorder %v5101_v3, %v10273_v44  ;;  %vm2590_vm3 = vcmp.eq.s32.totalorder %v6170_v14, %v10273_v44  ;;  %v10276_v23 = vld [vmem:[#allocation162_spill] sm:$0xff]  ;;  %v10278_v62 = vld [vmem:[#allocation25_spill] sm:$0xff] }
 0x347   : > { %10274 = vst [vmem:[#allocation120_spill] sm:$0xff] %v7874_v12  ;;  %v7878_v33 = vadd.f32 %v10275_v63, %v7684_v16  ;;  %v7882_v25 = vadd.f32 %v10276_v23, %v7688_v22  ;;  %vm2591_vm10 = vcmp.eq.s32.totalorder %v6175_v55, %v10273_v44  ;;  %vm2585_vm9 = vcmp.eq.s32.totalorder %v5101_v3, %v10278_v62  ;;  %v10280_v16 = vld [vmem:[#allocation40_spill] sm:$0xff]  ;;  %v10284_v12 = vld [vmem:[#allocation115_spill] sm:$0xff] }
 0x348   : > { %2994 = vperm.xlu1 %4524, %v10255_v41   ;;  %vm2891_vm6 = vcmp.eq.s32.totalorder %v6175_v55, %v10279_v46  ;;  %vm2587_vm14 = vcmp.eq.s32.totalorder %v6175_v55, %v10278_v62  ;;  %vm2890_vm15 = vcmp.eq.s32.totalorder %v6170_v14, %v10279_v46  ;;  %vm2892_vm13 = vcmp.eq.s32.totalorder %v6178_v28, %v10279_v46  ;;  %v10281_v41 = vld [vmem:[#allocation26_spill] sm:$0xff]  ;;  %v7923_v38 = vpop.permute.xlu1 %2851 }
 0x349   : > { %10277 = vst [vmem:[#allocation65_spill] sm:$0xff] %v7882_v25  ;;  %vm2592_vm12 = vcmp.eq.s32.totalorder %v6178_v28, %v10273_v44  ;;  %v2717_v22 = vsel %vm2589_vm8, %v10280_v16, 0.0  ;;  %v2718_v30 = vsel %vm2590_vm3, %v10280_v16, 0.0  ;;  %vm2889_vm2 = vcmp.eq.s32.totalorder %v5101_v3, %v10279_v46  ;;  %v7908_v40 = vpop.permute.xlu0 %2574 }
 0x34a   : > { %vm2594_vm1 = vcmp.eq.s32.totalorder %v6170_v14, %v10281_v41  ;;  %v2719_v0 = vsel %vm2591_vm10, %v10280_v16, 0.0  ;;  %vm2588_vm7 = vcmp.eq.s32.totalorder %v6178_v28, %v10278_v62  ;;  %10282 = vst [vmem:[#allocation67_spill] sm:$0xff] %v7908_v40  ;;  %vm2586_vm0 = vcmp.eq.s32.totalorder %v6170_v14, %v10278_v62 }
 0x34b   : > { %vm2593_vm5 = vcmp.eq.s32.totalorder %v5101_v3, %v10281_v41  ;;  %vm2595_vm4 = vcmp.eq.s32.totalorder %v6175_v55, %v10281_v41  ;;  %vm2596_vm11 = vcmp.eq.s32.totalorder %v6178_v28, %v10281_v41  ;;  %v3019_v24 = vsel %vm2891_vm6, %v10283_v19, 0.0  ;;  %v4629_v41 = vld [vmem:[%s5088_s14 + $0x58] sm:$0xff] }
 0x34c   : > { %4525 = vset.pattern.permute.xlu1 %v10016_v34  ;;  %v7929_v15 = vsel %vm2890_vm15, %v10283_v19, 0.0  ;;  %v3020_v54 = vsel %vm2892_vm13, %v10283_v19, 0.0  ;;  %v2720_v45 = vsel %vm2592_vm12, %v10280_v16, 0.0  ;;  %v2781_v31 = vadd.f32 %v2717_v22, %v2477_v51 }
 0x34d   : > { %v2782_v21 = vadd.f32 %v2718_v30, %v2478_v56  ;;  %3176 = vperm.xlu1 %4525, %v4628_v58   ;;  %v3017_v63 = vsel %vm2889_vm2, %v10283_v19, 0.0  ;;  %v2783_v23 = vadd.f32 %v2719_v0, %v2479_v8  ;;  %v2715_v40 = vsel %vm2587_vm14, %v7636_v6, 0.0  ;;  %v7959_v56 = vpop.permute.xlu0 %2577  ;;  %v7965_v8 = vpop.permute.xlu1 %2966  ;;  %v10286_v0 = vld [vmem:[#allocation62_spill] sm:$0xff] }
 0x34e   : > { %vm2894_vm8 = vcmp.eq.s32.totalorder %v6170_v14, %v10284_v12  ;;  %vm2896_vm3 = vcmp.eq.s32.totalorder %v6178_v28, %v10284_v12  ;;  %v2713_v51 = vsel %vm2585_vm9, %v7636_v6, 0.0  ;;  %v2716_v58 = vsel %vm2588_vm7, %v7636_v6, 0.0  ;;  %10285 = vst [vmem:[#allocation125_spill] sm:$0xff] %v7959_v56  ;;  %v10287_v56 = vld [vmem:[#allocation42_spill] sm:$0xff] }
 0x34f   : > { %vm2893_vm10 = vcmp.eq.s32.totalorder %v5101_v3, %v10284_v12  ;;  %vm2895_vm6 = vcmp.eq.s32.totalorder %v6175_v55, %v10284_v12  ;;  %v3022_v44 = vsel %vm2894_vm8, %v7577_v37, 0.0  ;;  %v3024_v46 = vsel %vm2896_vm3, %v7577_v37, 0.0 }
 0x350   : > { %v3021_v16 = vsel %vm2893_vm10, %v7577_v37, 0.0  ;;  %v3023_v22 = vsel %vm2895_vm6, %v7577_v37, 0.0  ;;  %v2784_v30 = vadd.f32 %v2720_v45, %v2480_v1  ;;  %vm2601_vm9 = vcmp.eq.s32.totalorder %v5101_v3, %v10286_v0  ;;  %v10288_v1 = vld [vmem:[#allocation50_spill] sm:$0xff] }
 0x351   : > { %v2779_v19 = vadd.f32 %v2715_v40, %v7744_v4  ;;  %vm2597_vm14 = vcmp.eq.s32.totalorder %v5101_v3, %v10287_v56  ;;  %4526 = vset.pattern.permute.xlu1 %v10252_v36  ;;  %v2714_v12 = vsel %vm2586_vm0, %v7636_v6, 0.0  ;;  %vm2603_vm15 = vcmp.eq.s32.totalorder %v6175_v55, %v10286_v0  ;;  %v7988_v40 = vpop.permute.xlu0 %2580 }
 0x352   : > { %vm2604_vm13 = vcmp.eq.s32.totalorder %v6178_v28, %v10286_v0  ;;  %v2777_v37 = vadd.f32 %v2713_v51, %v7705_v17  ;;  %v2780_v4 = vadd.f32 %v2716_v58, %v7747_v50  ;;  %2694 = vperm.xlu1 %4526, %v10288_v1   ;;  %10289 = vst [vmem:[#allocation127_spill] sm:$0xff] %v7988_v40  ;;  %v2722_v35 = vsel %vm2594_vm1, %v7657_v18, 0.0  ;;  %v10290_v17 = vld [vmem:[#allocation38_spill] sm:$0xff] }
 0x353   : > { %v7990_v45 = vadd.f32 %v3022_v44, %v2782_v21  ;;  %v7992_v61 = vadd.f32 %v3024_v46, %v2784_v30  ;;  %v7994_v62 = vadd.f32 %v3021_v16, %v2781_v31  ;;  %v7996_v6 = vadd.f32 %v3023_v22, %v2783_v23  ;;  %v8027_v23 = vpop.permute.xlu1 %2666  ;;  %v10293_v22 = vld [vmem:[#allocation19_spill] sm:$0xff] }
 0x354   : > { %vm3195_vm12 = vcmp.eq.s32.totalorder %v6175_v55, %v10290_v17  ;;  %v2778_v50 = vadd.f32 %v2714_v12, %v7776_v57  ;;  %vm3194_vm2 = vcmp.eq.s32.totalorder %v6170_v14, %v10290_v17  ;;  %vm3196_vm7 = vcmp.eq.s32.totalorder %v6178_v28, %v10290_v17  ;;  %v10294_v12 = vld [vmem:[#allocation28_spill] sm:$0xff] }
 0x355   : > { %vm3193_vm0 = vcmp.eq.s32.totalorder %v5101_v3, %v10290_v17  ;;  %vm2898_vm8 = vcmp.eq.s32.totalorder %v6170_v14, %v7737_v52  ;;  %vm2900_vm1 = vcmp.eq.s32.totalorder %v6178_v28, %v7737_v52  ;;  %v2721_v57 = vsel %vm2593_vm5, %v7657_v18, 0.0 }
 0x356   : > { %v2723_v31 = vsel %vm2595_vm4, %v7657_v18, 0.0  ;;  %v2724_v21 = vsel %vm2596_vm11, %v7657_v18, 0.0  ;;  %v3083_v51 = vadd.f32 %v3019_v24, %v2779_v19  ;;  %vm2598_vm3 = vcmp.eq.s32.totalorder %v6170_v14, %v10287_v56  ;;  %4527 = vset.pattern.permute.xlu1 %v9997_v32  ;;  %v8045_v24 = vpop.permute.xlu0 %2583 }
 0x357   : > { %v3084_v58 = vadd.f32 %v3020_v54, %v2780_v4  ;;  %v3081_v44 = vadd.f32 %v3017_v63, %v2777_v37  ;;  %vm2897_vm5 = vcmp.eq.s32.totalorder %v5101_v3, %v7737_v52  ;;  %vm2899_vm4 = vcmp.eq.s32.totalorder %v6175_v55, %v7737_v52  ;;  %2875 = vperm.xlu1 %4527, %v4629_v41   ;;  %v10292_v63 = vld [vmem:[#allocation109_spill] sm:$0xff] }
 0x358   : > { %vm2599_vm10 = vcmp.eq.s32.totalorder %v6175_v55, %v10287_v56  ;;  %vm2600_vm11 = vcmp.eq.s32.totalorder %v6178_v28, %v10287_v56  ;;  %v2729_v18 = vsel %vm2601_vm9, %v8027_v23, 0.0  ;;  %10291 = vst [vmem:[#allocation132_spill] sm:$0xff] %v8045_v24  ;;  %v2786_v54 = vadd.f32 %v2722_v35, %v7753_v27  ;;  %v10298_v56 = vld [vmem:[#allocation108_spill] sm:$0xff] }
 0x359   : > { %v3026_v46 = vsel %vm2898_vm8, %v10292_v63, 0.0  ;;  %v3028_v16 = vsel %vm2900_vm1, %v10292_v63, 0.0  ;;  %vm1084_vm6 = vcmp.eq.s32.totalorder %v6178_v28, %v10293_v22  ;;  %v2731_v30 = vsel %vm2603_vm15, %v8027_v23, 0.0 }
 0x35a   : > { %v3082_v27 = vadd.f32 %v7929_v15, %v2778_v50  ;;  %v2788_v35 = vadd.f32 %v2724_v21, %v7759_v49  ;;  %v2785_v19 = vadd.f32 %v2721_v57, %v7741_v13  ;;  %vm1403_vm9 = vcmp.eq.s32.totalorder %v6175_v55, %v10294_v12  ;;  %v8085_v50 = vpop.permute.xlu1 %2854 }
 0x35b   : > { %v2732_v37 = vsel %vm2604_vm13, %v8027_v23, 0.0  ;;  %v3025_v4 = vsel %vm2897_vm5, %v10292_v63, 0.0  ;;  %v2787_v24 = vadd.f32 %v2723_v31, %v7756_v5  ;;  %v3027_v13 = vsel %vm2899_vm4, %v10292_v63, 0.0  ;;  %2998 = vperm.xlu1 %4527, %v10288_v1  }
 0x35c   : > { %v2725_v49 = vsel %vm2597_vm14, %v7872_v42, 0.0  ;;  %v2793_v15 = vadd.f32 %v2729_v18, %v7765_v53  ;;  %v8087_v57 = vadd.f32 %v3026_v46, %v2786_v54  ;;  %v8089_v21 = vadd.f32 %v3028_v16, %v2788_v35  ;;  %v10295_v53 = vld [vmem:[#allocation86_spill] sm:$0xff] }
 0x35d   : > { %vm1404_vm15 = vcmp.eq.s32.totalorder %v6178_v28, %v10294_v12  ;;  %vm2602_vm13 = vcmp.eq.s32.totalorder %v6170_v14, %v10286_v0  ;;  %v2795_v52 = vadd.f32 %v2731_v30, %v7771_v26  ;;  %vm2905_vm8 = vcmp.eq.s32.totalorder %v5101_v3, %v8085_v50  ;;  %v3259_v26 = vpop.permute.xlu0 %3258 }
 0x35e   : > { %vm2907_vm14 = vcmp.eq.s32.totalorder %v6175_v55, %v8085_v50  ;;  %vm2908_vm1 = vcmp.eq.s32.totalorder %v6178_v28, %v8085_v50  ;;  %v2796_v5 = vadd.f32 %v2732_v37, %v7774_v9  ;;  %v3033_v31 = vsel %vm2905_vm8, %v10295_v53, 0.0  ;;  %v8124_v29 = vpop.permute.xlu1 %3158 }
 0x35f   : > { %v3035_v18 = vsel %vm2907_vm14, %v10295_v53, 0.0  ;;  %v3036_v54 = vsel %vm2908_vm1, %v10295_v53, 0.0  ;;  %v3323_v63 = vsel %vm3195_vm12, %v3259_v26, 0.0  ;;  %v3322_v46 = vsel %vm3194_vm2, %v3259_v26, 0.0  ;;  %4528 = vset.pattern.permute.xlu1 %v10016_v34 }
 0x360   : > { %v3324_v1 = vsel %vm3196_vm7, %v3259_v26, 0.0  ;;  %v3321_v9 = vsel %vm3193_vm0, %v3259_v26, 0.0  ;;  %v3387_v16 = vadd.f32 %v3323_v63, %v3083_v51  ;;  %v3386_v30 = vadd.f32 %v3322_v46, %v3082_v27  ;;  %3179 = vperm.xlu1 %4528, %v4629_v41   ;;  %v4633_v63 = vld [vmem:[#allocation7 + $0x1e8] sm:$0xff] }
 0x361   : > { %v3388_v35 = vadd.f32 %v3324_v1, %v3084_v58  ;;  %v3385_v37 = vadd.f32 %v3321_v9, %v3081_v44  ;;  %v2726_v40 = vsel %vm2598_vm3, %v7872_v42, 0.0  ;;  %v8126_v60 = vadd.f32 %v3036_v54, %v2796_v5  ;;  %v3150_v58 = vpop.permute.xlu0 %3149  ;;  %v4630_v5 = vld [vmem:[#allocation7 + $0x178] sm:$0xff]  ;;  %v4634_v9 = vld [vmem:[#allocation7 + $0x168] sm:$0xff] }
 0x362   : > { %v8128_v11 = vadd.f32 %v3033_v31, %v2793_v15  ;;  %v8130_v25 = vadd.f32 %v3035_v18, %v2795_v52  ;;  %v2727_v17 = vsel %vm2599_vm10, %v7872_v42, 0.0  ;;  %v2728_v51 = vsel %vm2600_vm11, %v7872_v42, 0.0  ;;  %v10296_v15 = vld [vmem:[#allocation88_spill] sm:$0xff]  ;;  %3577 = vmatprep.mubr.f32.mxu1 %v3386_v30  ;;  %v10297_v42 = vld [vmem:[#allocation57_spill] sm:$0xff] }
 0x363   : > { %v8140_v44 = vadd.f32 %v3025_v4, %v2785_v19  ;;  %v8142_v27 = vadd.f32 %v3027_v13, %v2787_v24  ;;  %v8148_v52 = vsel %vm1084_vm6, %v10296_v15, 0.0  ;;  %vm3201_vm12 = vcmp.eq.s32.totalorder %v5101_v3, %v7810_v20  ;;  %3722 = vmatprep.mubr.f32.mxu0 %v3388_v35  ;;  %3578 = vmatmul.mubr.f32.vlgmr.msra.gmra.mxu1 %v3385_v37  ;;  %v10299_v19 = vld [vmem:[#allocation52_spill] sm:$0xff]  ;;  %v4632_v31 = vld [vmem:[#allocation7 + $0x170] sm:$0xff] }
 0x364   : > { %vm3202_vm2 = vcmp.eq.s32.totalorder %v6170_v14, %v7810_v20  ;;  %vm3203_vm7 = vcmp.eq.s32.totalorder %v6175_v55, %v7810_v20  ;;  %vm1705_vm0 = vcmp.eq.s32.totalorder %v5101_v3, %v10297_v42  ;;  %v8162_v41 = vsel %vm1403_vm9, %v10298_v56, 0.0  ;;  %3723 = vmatmul.mubr.f32.vlgmr.msra.gmra.mxu0 %v3387_v16  ;;  %4376 = vmatpush3.msra.mxu1 %v4630_v5 }
 0x365   : > { %vm3204_vm3 = vcmp.eq.s32.totalorder %v6178_v28, %v7810_v20  ;;  %v8167_v24 = vadd.f32 %v2725_v49, %v7849_v2  ;;  %v2790_v22 = vadd.f32 %v2726_v40, %v7852_v39  ;;  %v8173_v4 = vadd.f32 %v2727_v17, %v7855_v10  ;;  %4529 = vset.pattern.permute.xlu1 %v10252_v36  ;;  %v10300_v39 = vld [vmem:[#allocation55_spill] sm:$0xff]  ;;  %v8193_v10 = vpop.permute.xlu1 %2670  ;;  %v4631_v40 = vld [vmem:[#allocation7 + $0x1f0] sm:$0xff]  ;;  %v10301_v49 = vld [vmem:[#allocation46_spill] sm:$0xff] }
 0x366   : > { %v2792_v13 = vadd.f32 %v2728_v51, %v7858_v59  ;;  %vm2901_vm4 = vcmp.eq.s32.totalorder %v5101_v3, %v7923_v38  ;;  %vm3197_vm10 = vcmp.eq.s32.totalorder %v5101_v3, %v3150_v58  ;;  %v8183_v2 = vsel %vm1404_vm15, %v10298_v56, 0.0  ;;  %v3263_v59 = vpop.permute.xlu0 %3262  ;;  %4361 = vmatprep.subr.mxu1 %v4631_v40  ;;  %2698 = vperm.xlu1 %4529, %v10301_v49   ;;  %v4635_v51 = vld [vmem:[#allocation7 + $0x1e0] sm:$0xff] }
 0x367   : > { %vm3198_vm11 = vcmp.eq.s32.totalorder %v6170_v14, %v3150_v58  ;;  %vm3199_vm6 = vcmp.eq.s32.totalorder %v6175_v55, %v3150_v58  ;;  %vm3200_vm9 = vcmp.eq.s32.totalorder %v6178_v28, %v3150_v58  ;;  %vm2902_vm15 = vcmp.eq.s32.totalorder %v6170_v14, %v7923_v38  ;;  %4377 = vmatpush3.msra.mxu1 %v4632_v31  ;;  %v10302_v31 = vld [vmem:[#allocation117_spill] sm:$0xff] }
 0x368   : > { %vm2903_vm1 = vcmp.eq.s32.totalorder %v6175_v55, %v7923_v38  ;;  %vm2904_vm5 = vcmp.eq.s32.totalorder %v6178_v28, %v7923_v38  ;;  %v3029_v12 = vsel %vm2901_vm4, %v7965_v8, 0.0  ;;  %v3030_v18 = vsel %vm2902_vm15, %v7965_v8, 0.0  ;;  %4362 = vmatprep.subr.mxu1 %v4633_v63 }
 0x369   : > { %v3032_v54 = vsel %vm2904_vm5, %v7965_v8, 0.0  ;;  %v2730_v26 = vsel %vm2602_vm13, %v8027_v23, 0.0  ;;  %vm2906_vm14 = vcmp.eq.s32.totalorder %v6170_v14, %v8085_v50  ;;  %vm2607_vm8 = vcmp.eq.s32.totalorder %v6175_v55, %v10300_v39  ;;  %4378 = vmatpush3.msra.mxu1 %v4634_v9  ;;  %v8231_v15 = vpop.permute.xlu1 %2857  ;;  %v4640_v9 = vld [vmem:[#allocation7 + $0x1d0] sm:$0xff] }
 0x36a   : > { %vm2608_vm4 = vcmp.eq.s32.totalorder %v6178_v28, %v10300_v39  ;;  %v3326_v46 = vsel %vm3198_vm11, %v3263_v59, 0.0  ;;  %v3328_v1 = vsel %vm3200_vm9, %v3263_v59, 0.0  ;;  %v3325_v0 = vsel %vm3197_vm10, %v3263_v59, 0.0  ;;  %v3267_v35 = vpop.permute.xlu0 %3266  ;;  %4363 = vmatprep.subr.mxu1 %v4635_v51  ;;  %4530 = vset.pattern.permute.xlu1 %v9997_v32  ;;  %v4642_v51 = vld [vmem:[#allocation7 + $0x1c8] sm:$0xff] }
 0x36b   : > { %v3327_v23 = vsel %vm3199_vm6, %v3263_v59, 0.0  ;;  %v3390_v16 = vadd.f32 %v3326_v46, %v7990_v45  ;;  %v3392_v30 = vadd.f32 %v3328_v1, %v7992_v61  ;;  %v3389_v37 = vadd.f32 %v3325_v0, %v7994_v62 }
 0x36c   : > { %v3391_v17 = vadd.f32 %v3327_v23, %v7996_v6  ;;  %v3330_v58 = vsel %vm3202_vm2, %v3267_v35, 0.0  ;;  %v3332_v45 = vsel %vm3204_vm3, %v3267_v35, 0.0  ;;  %v3329_v61 = vsel %vm3201_vm12, %v3267_v35, 0.0  ;;  %v4636_v6 = vld [vmem:[#allocation7 + $0x160] sm:$0xff] }
 0x36d   : > { %v3331_v62 = vsel %vm3203_vm7, %v3267_v35, 0.0  ;;  %4379 = vmatpush3.msra.mxu1 %v4636_v6  ;;  %v3031_v56 = vsel %vm2903_vm1, %v7965_v8, 0.0  ;;  %v3034_v5 = vsel %vm2906_vm14, %v10295_v53, 0.0  ;;  %3582 = vmatprep.mubr.f32.mxu1 %v3390_v16  ;;  %v3094_v59 = vadd.f32 %v3030_v18, %v2790_v22  ;;  %v10303_v53 = vld [vmem:[#allocation122_spill] sm:$0xff] }
 0x36e   : > { %3727 = vmatprep.mubr.f32.mxu0 %v3392_v30  ;;  %v3096_v40 = vadd.f32 %v3032_v54, %v2792_v13  ;;  %v8257_v20 = vsel %vm1705_vm0, %v10302_v31, 0.0  ;;  %vm2610_vm13 = vcmp.eq.s32.totalorder %v6170_v14, %v7590_v47  ;;  %v2794_v38 = vadd.f32 %v2730_v26, %v7768_v7  ;;  %3583 = vmatmul.mubr.f32.gmra.mxu1 %v3389_v37  ;;  %v8271_v13 = vld [vmem:[%s5088_s14 + $0x60] sm:$0xff]  ;;  %v3156_v18 = vpop.permute.xlu0 %3155 }
 0x36f   : > { %3728 = vmatmul.mubr.f32.gmra.mxu0 %v3391_v17  ;;  %v3394_v8 = vadd.f32 %v3330_v58, %v8087_v57  ;;  %v3396_v50 = vadd.f32 %v3332_v45, %v8089_v21  ;;  %vm10304_vm12 = vcmp.eq.s32.totalorder %v6175_v55, %v10299_v19  ;;  %2878 = vperm.xlu1 %4530, %v8271_v13   ;;  %v4638_v57 = vld [vmem:[#allocation7 + $0x1d8] sm:$0xff]  ;;  %v2736_v46 = vsel %vm2608_vm4, %v8193_v10, 0.0  ;;  %v4643_v45 = vld [vmem:[#allocation7 + $0x148] sm:$0xff] }
 0x370   : > { %v8268_v22 = vsel %vm10304_vm12, %v10303_v53, 0.0  ;;  %v3393_v54 = vadd.f32 %v3329_v61, %v8140_v44  ;;  %v3395_v7 = vadd.f32 %v3331_v62, %v8142_v27  ;;  %v3093_v26 = vadd.f32 %v3029_v12, %v8167_v24  ;;  %4364 = vmatprep.subr.mxu1 %v4638_v57  ;;  %v8287_v44 = vpop.permute.xlu1 %2974  ;;  %v4639_v12 = vld [vmem:[#allocation7 + $0x158] sm:$0xff]  ;;  %v10307_v61 = vld [vmem:[#allocation65_spill] sm:$0xff] }
 0x371   : > { %vm2609_vm2 = vcmp.eq.s32.totalorder %v5101_v3, %v7590_v47  ;;  %vm10305_vm7 = vcmp.eq.s32.totalorder %v5101_v3, %v10300_v39  ;;  %vm10306_vm0 = vcmp.eq.s32.totalorder %v6170_v14, %v10300_v39  ;;  %3587 = vmatprep.mubr.f32.mxu1 %v3394_v8  ;;  %3732 = vmatprep.mubr.f32.mxu0 %v3396_v50 }
 0x372   : > { %v2733_v21 = vsel %vm10305_vm7, %v8193_v10, 0.0  ;;  %v2734_v63 = vsel %vm10306_vm0, %v8193_v10, 0.0  ;;  %v3095_v27 = vadd.f32 %v3031_v56, %v8173_v4  ;;  %v3098_v24 = vadd.f32 %v3034_v5, %v2794_v38  ;;  %4380 = vmatpush3.msra.mxu1 %v4639_v12  ;;  %v3271_v23 = vpop.permute.xlu0 %3270 }
 0x373   : > { %vm2611_vm3 = vcmp.eq.s32.totalorder %v6175_v55, %v7590_v47  ;;  %vm2612_vm5 = vcmp.eq.s32.totalorder %v6178_v28, %v7590_v47  ;;  %vm3205_vm10 = vcmp.eq.s32.totalorder %v5101_v3, %v3156_v18  ;;  %vm3206_vm11 = vcmp.eq.s32.totalorder %v6170_v14, %v3156_v18  ;;  %3588 = vmatmul.mubr.f32.gmra.mxu1 %v3393_v54  ;;  %v10310_v47 = vld [vmem:[#allocation156_spill] sm:$0xff] }
 0x374   : > { %vm3207_vm6 = vcmp.eq.s32.totalorder %v6175_v55, %v3156_v18  ;;  %vm3208_vm9 = vcmp.eq.s32.totalorder %v6178_v28, %v3156_v18  ;;  %vm3209_vm14 = vcmp.eq.s32.totalorder %v5101_v3, %v8124_v29  ;;  %vm3210_vm15 = vcmp.eq.s32.totalorder %v6170_v14, %v8124_v29  ;;  %3733 = vmatmul.mubr.f32.gmra.mxu0 %v3395_v7 }
 0x375   : > { %vm3211_vm1 = vcmp.eq.s32.totalorder %v6175_v55, %v8124_v29  ;;  %v2735_v4 = vsel %vm2607_vm8, %v8193_v10, 0.0  ;;  %vm3212_vm12 = vcmp.eq.s32.totalorder %v6178_v28, %v8124_v29  ;;  %v2797_v1 = vadd.f32 %v2733_v21, %v7862_v43  ;;  %3002 = vperm.xlu1 %4530, %v10301_v49   ;;  %4365 = vmatprep.subr.mxu1 %v4640_v9  ;;  %v4641_v43 = vld [vmem:[#allocation7 + $0x150] sm:$0xff]  ;;  %v2675_v10 = vpop.permute.xlu1 %2674  ;;  %v4644_v21 = vld [vmem:[#allocation7 + $0x1c0] sm:$0xff]  ;;  %v10313_v9 = vld [vmem:[#allocation118_spill] sm:$0xff] }
 0x376   : > { %v2798_v0 = vadd.f32 %v2734_v63, %v7866_v48  ;;  %v3334_v16 = vsel %vm3206_vm11, %v3271_v23, 0.0  ;;  %v3336_v30 = vsel %vm3208_vm9, %v3271_v23, 0.0  ;;  %v3333_v35 = vsel %vm3205_vm10, %v3271_v23, 0.0  ;;  %4381 = vmatpush3.msra.mxu1 %v4641_v43  ;;  %v3275_v5 = vpop.permute.xlu0 %3274 }
 0x377   : > { %v3335_v39 = vsel %vm3207_vm6, %v3271_v23, 0.0  ;;  %vm1704_vm8 = vcmp.eq.s32.totalorder %v6178_v28, %v10299_v19  ;;  %v2799_v48 = vadd.f32 %v2735_v4, %v7878_v33  ;;  %v3398_v49 = vadd.f32 %v3334_v16, %v3094_v59  ;;  %4366 = vmatprep.subr.mxu1 %v4642_v51  ;;  %v4645_v19 = vld [vmem:[#allocation7 + $0x140] sm:$0xff] }
 0x378   : > { %v3400_v37 = vadd.f32 %v3336_v30, %v3096_v40  ;;  %v3397_v17 = vadd.f32 %v3333_v35, %v3093_v26  ;;  %vm2909_vm4 = vcmp.eq.s32.totalorder %v5101_v3, %v8231_v15  ;;  %vm2910_vm7 = vcmp.eq.s32.totalorder %v6170_v14, %v8231_v15  ;;  %4382 = vmatpush3.msra.mxu1 %v4643_v45  ;;  %v10314_v30 = vld [vmem:[#allocation66_spill] sm:$0xff] }
 0x379   : > { %vm2911_vm0 = vcmp.eq.s32.totalorder %v6175_v55, %v8231_v15  ;;  %v3399_v58 = vadd.f32 %v3335_v39, %v3095_v27  ;;  %v2800_v33 = vadd.f32 %v2736_v46, %v10307_v61  ;;  %v3037_v62 = vsel %vm2909_vm4, %v8287_v44, 0.0  ;;  %4531 = vset.pattern.permute.xlu1 %v10016_v34  ;;  %3592 = vmatprep.mubr.f32.mxu1 %v3398_v49  ;;  %v2861_v7 = vpop.permute.xlu1 %2860  ;;  %v10311_v46 = vld [vmem:[#allocation51_spill] sm:$0xff] }
 0x37a   : > { %v3038_v6 = vsel %vm2910_vm7, %v8287_v44, 0.0  ;;  %v3039_v56 = vsel %vm2911_vm0, %v8287_v44, 0.0  ;;  %3182 = vperm.xlu1 %4531, %v8271_v13   ;;  %v3338_v59 = vsel %vm3210_vm15, %v3275_v5, 0.0  ;;  %v3340_v40 = vsel %vm3212_vm12, %v3275_v5, 0.0  ;;  %3737 = vmatprep.mubr.f32.mxu0 %v3400_v37  ;;  %v3162_v63 = vpop.permute.xlu0 %3161 }
 0x37b   : > { %v3337_v38 = vsel %vm3209_vm14, %v3275_v5, 0.0  ;;  %v3339_v8 = vsel %vm3211_vm1, %v3275_v5, 0.0  ;;  %vm2912_vm10 = vcmp.eq.s32.totalorder %v6178_v28, %v8231_v15  ;;  %v2738_v50 = vsel %vm2610_vm13, %v2675_v10, 0.0  ;;  %3593 = vmatmul.mubr.f32.gmra.mxu1 %v3397_v17  ;;  %3738 = vmatmul.mubr.f32.gmra.mxu0 %v3399_v58  ;;  %v4646_v17 = vld [vmem:[#allocation7 + $0x1b8] sm:$0xff] }
 0x37c   : > { %v3402_v13 = vadd.f32 %v3338_v59, %v3098_v24  ;;  %v3404_v18 = vadd.f32 %v3340_v40, %v8126_v60  ;;  %v3040_v54 = vsel %vm2912_vm10, %v8287_v44, 0.0  ;;  %v3401_v26 = vadd.f32 %v3337_v38, %v8128_v11  ;;  %4367 = vmatprep.subr.mxu1 %v4644_v21  ;;  %v10308_v44 = vld [vmem:[#allocation72_spill] sm:$0xff]  ;;  %v4649_v38 = vld [vmem:[#allocation7 + $0x1b0] sm:$0xff] }
 0x37d   : > { %v3403_v29 = vadd.f32 %v3339_v8, %v8130_v25  ;;  %v3102_v57 = vadd.f32 %v3038_v6, %v2798_v0  ;;  %v2737_v15 = vsel %vm2609_vm2, %v2675_v10, 0.0  ;;  %vm2914_vm13 = vcmp.eq.s32.totalorder %v6170_v14, %v2861_v7  ;;  %v10309_v24 = vld [vmem:[#allocation96_spill] sm:$0xff]  ;;  %v10312_v0 = vld [vmem:[#allocation70_spill] sm:$0xff]  ;;  %v3165_v39 = vpop.permute.xlu1 %3164  ;;  %4383 = vmatpush3.msra.mxu1 %v4645_v19 }
 0x37e   : > { %3597 = vmatprep.mubr.f32.mxu1 %v3402_v13  ;;  %v3101_v60 = vadd.f32 %v3037_v62, %v2797_v1  ;;  %v3103_v27 = vadd.f32 %v3039_v56, %v2799_v48  ;;  %vm2005_vm11 = vcmp.eq.s32.totalorder %v5101_v3, %v10308_v44  ;;  %v2739_v11 = vsel %vm2611_vm3, %v2675_v10, 0.0  ;;  %4532 = vset.pattern.permute.xlu1 %v10252_v36  ;;  %v3279_v43 = vpop.permute.xlu0 %3278  ;;  %v8424_v62 = vld [vmem:[%s5088_s14 + $0x68] sm:$0xff]  ;;  %v10322_v19 = vld [vmem:[#allocation106_spill] sm:$0xff] }
 0x37f   : > { %v2740_v25 = vsel %vm2612_vm5, %v2675_v10, 0.0  ;;  %v2802_v12 = vadd.f32 %v2738_v50, %v10309_v24  ;;  %vm2913_vm2 = vcmp.eq.s32.totalorder %v5101_v3, %v2861_v7  ;;  %3742 = vmatprep.mubr.f32.mxu0 %v3404_v18  ;;  %vm2006_vm6 = vcmp.eq.s32.totalorder %v6170_v14, %v10308_v44  ;;  %2702 = vperm.xlu1 %4532, %v10311_v46  }
 0x380   : > { %vm2007_vm9 = vcmp.eq.s32.totalorder %v6175_v55, %v10308_v44  ;;  %vm2008_vm3 = vcmp.eq.s32.totalorder %v6178_v28, %v10308_v44  ;;  %vm2915_vm14 = vcmp.eq.s32.totalorder %v6175_v55, %v2861_v7  ;;  %vm2916_vm5 = vcmp.eq.s32.totalorder %v6178_v28, %v2861_v7  ;;  %3598 = vmatmul.mubr.f32.gmra.mxu1 %v3401_v26  ;;  %v10315_v7 = vld [vmem:[#allocation131_spill] sm:$0xff] }
 0x381   : > { %v3042_v4 = vsel %vm2914_vm13, %v10310_v47, 0.0  ;;  %vm3213_vm15 = vcmp.eq.s32.totalorder %v5101_v3, %v3162_v63  ;;  %v8393_v1 = vsel %vm1704_vm8, %v10303_v53, 0.0  ;;  %vm3214_vm1 = vcmp.eq.s32.totalorder %v6170_v14, %v3162_v63  ;;  %3743 = vmatmul.mubr.f32.gmra.mxu0 %v3403_v29  ;;  %4368 = vmatprep.subr.mxu1 %v4646_v17  ;;  %v2679_v8 = vpop.permute.xlu1 %2678  ;;  %v10318_v44 = vld [vmem:[#allocation159_spill] sm:$0xff] }
 0x382   : > { %vm3215_vm12 = vcmp.eq.s32.totalorder %v6175_v55, %v3162_v63  ;;  %vm3216_vm4 = vcmp.eq.s32.totalorder %v6178_v28, %v3162_v63  ;;  %v2801_v23 = vadd.f32 %v2737_v15, %v10312_v0  ;;  %v2803_v16 = vadd.f32 %v2739_v11, %v10313_v9  ;;  %v3283_v40 = vpop.permute.xlu0 %3282  ;;  %v10316_v15 = vld [vmem:[#allocation47_spill] sm:$0xff] }
 0x383   : > { %v2804_v35 = vadd.f32 %v2740_v25, %v10314_v30  ;;  %v3104_v48 = vadd.f32 %v3040_v54, %v2800_v33  ;;  %v3041_v53 = vsel %vm2913_vm2, %v10310_v47, 0.0  ;;  %v3043_v10 = vsel %vm2915_vm14, %v10310_v47, 0.0  ;;  %4533 = vset.pattern.permute.xlu1 %v9997_v32  ;;  %v4647_v33 = vld [vmem:[#allocation7 + $0x138] sm:$0xff] }
 0x384   : > { %v3044_v49 = vsel %vm2916_vm5, %v10310_v47, 0.0  ;;  %v3106_v37 = vadd.f32 %v3042_v4, %v2802_v12  ;;  %vm1706_vm8 = vcmp.eq.s32.totalorder %v6170_v14, %v10297_v42  ;;  %v3342_v51 = vsel %vm3214_vm1, %v3279_v43, 0.0  ;;  %4384 = vmatpush3.msra.mxu1 %v4647_v33  ;;  %2881 = vperm.xlu1 %4533, %v8424_v62   ;;  %v4650_v47 = vld [vmem:[#allocation7 + $0x130] sm:$0xff]  ;;  %v10317_v4 = vld [vmem:[#allocation54_spill] sm:$0xff] }
 0x385   : > { %v3344_v58 = vsel %vm3216_vm4, %v3279_v43, 0.0  ;;  %v3341_v45 = vsel %vm3213_vm15, %v3279_v43, 0.0  ;;  %v3343_v61 = vsel %vm3215_vm12, %v3279_v43, 0.0  ;;  %vm1707_vm7 = vcmp.eq.s32.totalorder %v6175_v55, %v10297_v42  ;;  %4369 = vmatprep.subr.mxu1 %v4649_v38 }
 0x386   : > { %v3406_v6 = vadd.f32 %v3342_v51, %v3102_v57  ;;  %v3408_v56 = vadd.f32 %v3344_v58, %v3104_v48  ;;  %v3405_v5 = vadd.f32 %v3341_v45, %v3101_v60  ;;  %v3407_v59 = vadd.f32 %v3343_v61, %v3103_v27  ;;  %4385 = vmatpush3.msra.mxu1 %v4650_v47  ;;  %v10325_v51 = vld [vmem:[#allocation163_spill] sm:$0xff]  ;;  %v10326_v45 = vld [vmem:[#allocation164_spill] sm:$0xff] }
 0x387   : > { %vm3217_vm0 = vcmp.eq.s32.totalorder %v5101_v3, %v3165_v39  ;;  %vm3218_vm10 = vcmp.eq.s32.totalorder %v6170_v14, %v3165_v39  ;;  %vm3219_vm13 = vcmp.eq.s32.totalorder %v6175_v55, %v3165_v39  ;;  %vm3220_vm2 = vcmp.eq.s32.totalorder %v6178_v28, %v3165_v39  ;;  %v10321_v39 = vld [vmem:[#allocation111_spill] sm:$0xff] }
 0x388   : > { %3602 = vmatprep.mubr.f32.mxu1 %v3406_v6  ;;  %3747 = vmatprep.mubr.f32.mxu0 %v3408_v56  ;;  %v3346_v50 = vsel %vm3218_vm10, %v3283_v40, 0.0  ;;  %v3348_v13 = vsel %vm3220_vm2, %v3283_v40, 0.0  ;;  %v3345_v18 = vsel %vm3217_vm0, %v3283_v40, 0.0  ;;  %v3347_v54 = vsel %vm3219_vm13, %v3283_v40, 0.0  ;;  %v4652_v6 = vld [vmem:[#allocation7 + $0x128] sm:$0xff] }
 0x389   : > { %v2133_v26 = vsel %vm2005_vm11, %v10315_v7, 0.0  ;;  %3603 = vmatmul.mubr.f32.gmra.mxu1 %v3405_v5  ;;  %3748 = vmatmul.mubr.f32.gmra.mxu0 %v3407_v59  ;;  %v3108_v29 = vadd.f32 %v3044_v49, %v2804_v35  ;;  %v3105_v57 = vadd.f32 %v3041_v53, %v2801_v23  ;;  %v3107_v21 = vadd.f32 %v3043_v10, %v2803_v16  ;;  %v10319_v23 = vld [vmem:[#allocation167_spill] sm:$0xff]  ;;  %v10320_v16 = vld [vmem:[#allocation157_spill] sm:$0xff]  ;;  %v4651_v35 = vld [vmem:[#allocation7 + $0x1a8] sm:$0xff] }
 0x38a   : > { %v1895_v63 = vadd.f32 %v8268_v22, %v10316_v15  ;;  %v2134_v60 = vsel %vm2006_vm6, %v10315_v7, 0.0  ;;  %v2135_v27 = vsel %vm2007_vm9, %v10315_v7, 0.0  ;;  %v2136_v11 = vsel %vm2008_vm3, %v10315_v7, 0.0  ;;  %3006 = vperm.xlu1 %4533, %v10311_v46   ;;  %4370 = vmatprep.subr.mxu1 %v4651_v35 }
 0x38b   : > { %vm1708_vm11 = vcmp.eq.s32.totalorder %v6178_v28, %v10297_v42  ;;  %v3410_v22 = vadd.f32 %v3346_v50, %v3106_v37  ;;  %v3412_v25 = vadd.f32 %v3348_v13, %v3108_v29  ;;  %v3409_v24 = vadd.f32 %v3345_v18, %v3105_v57  ;;  %v10324_v37 = vld [vmem:[#allocation33_spill] sm:$0xff]  ;;  %4386 = vmatpush3.msra.mxu1 %v4652_v6  ;;  %v4653_v50 = vld [vmem:[#allocation7 + $0x1a0] sm:$0xff] }
 0x38c   : > { %v3411_v12 = vadd.f32 %v3347_v54, %v3107_v21  ;;  %vm1709_vm6 = vcmp.eq.s32.totalorder %v5101_v3, %v10317_v4  ;;  %vm1710_vm9 = vcmp.eq.s32.totalorder %v6170_v14, %v10317_v4  ;;  %vm1711_vm3 = vcmp.eq.s32.totalorder %v6175_v55, %v10317_v4  ;;  %4371 = vmatprep.subr.mxu1 %v4653_v50 }
 0x38d   : > { %vm1712_vm14 = vcmp.eq.s32.totalorder %v6178_v28, %v10317_v4  ;;  %v8462_v46 = vadd.f32 %v8162_v41, %v10318_v44  ;;  %v8466_v0 = vadd.f32 %v8183_v2, %v8148_v52  ;;  %v1896_v9 = vadd.f32 %v8393_v1, %v10319_v23  ;;  %3607 = vmatprep.mubr.f32.mxu1 %v3410_v22  ;;  %v2864_v41 = vpop.permute.xlu1 %2863  ;;  %v10323_v2 = vld [vmem:[#allocation41_spill] sm:$0xff] }
 0x38e   : > { %v2197_v30 = vadd.f32 %v2133_v26, %v10320_v16  ;;  %v2198_v43 = vadd.f32 %v2134_v60, %v10321_v39  ;;  %v2199_v48 = vadd.f32 %v2135_v27, %v1895_v63  ;;  %vm2613_vm5 = vcmp.eq.s32.totalorder %v5101_v3, %v10322_v19  ;;  %3752 = vmatprep.mubr.f32.mxu0 %v3412_v25  ;;  %v10329_v26 = vld [vmem:[#allocation74_spill] sm:$0xff]  ;;  %v10330_v63 = vld [vmem:[#allocation48_spill] sm:$0xff]  ;;  %v3287_v16 = vpop.permute.xlu0 %3286  ;;  %v4658_v4 = vld [vmem:[#allocation7 + $0x110] sm:$0xff] }
 0x38f   : > { %v8478_v52 = vsel %vm1706_vm8, %v10302_v31, 0.0  ;;  %v8482_v1 = vadd.f32 %v8257_v20, %v10323_v2  ;;  %v2200_v53 = vadd.f32 %v2136_v11, %v1896_v9  ;;  %v2741_v10 = vsel %vm2613_vm5, %v2679_v8, 0.0  ;;  %4534 = vset.pattern.permute.xlu1 %v10016_v34  ;;  %3608 = vmatmul.mubr.f32.gmra.mxu1 %v3409_v24  ;;  %v10327_v20 = vld [vmem:[#allocation165_spill] sm:$0xff]  ;;  %v4655_v60 = vld [vmem:[#allocation7 + $0x198] sm:$0xff]  ;;  %v10331_v27 = vld [vmem:[#allocation124_spill] sm:$0xff] }
 0x390   : > { %v8489_v49 = vsel %vm1707_vm7, %v10302_v31, 0.0  ;;  %v2501_v17 = vadd.f32 %v10324_v37, %v2197_v30  ;;  %v2502_v58 = vadd.f32 %v10325_v51, %v2198_v43  ;;  %v2503_v61 = vadd.f32 %v10326_v45, %v2199_v48  ;;  %3753 = vmatmul.mubr.f32.gmra.mxu0 %v3411_v12  ;;  %3185 = vperm.xlu1 %4534, %v8424_v62   ;;  %v10328_v62 = vld [vmem:[#allocation69_spill] sm:$0xff]  ;;  %v4656_v25 = vld [vmem:[#allocation7 + $0x118] sm:$0xff]  ;;  %v4659_v48 = vld [vmem:[#allocation7 + $0x188] sm:$0xff] }
 0x391   : > { %v2504_v33 = vadd.f32 %v10327_v20, %v2200_v53  ;;  %vm2614_vm15 = vcmp.eq.s32.totalorder %v6170_v14, %v10322_v19  ;;  %vm2615_vm1 = vcmp.eq.s32.totalorder %v6175_v55, %v10322_v19  ;;  %vm2616_vm12 = vcmp.eq.s32.totalorder %v6178_v28, %v10322_v19  ;;  %v2983_v38 = vpop.permute.xlu1 %2982  ;;  %v4657_v9 = vld [vmem:[#allocation7 + $0x190] sm:$0xff]  ;;  %v10332_v37 = vld [vmem:[#allocation27_spill] sm:$0xff]  ;;  %v10333_v45 = vld [vmem:[#allocation44_spill] sm:$0xff] }
 0x392   : > { %v2742_v56 = vsel %vm2614_vm15, %v2679_v8, 0.0  ;;  %v2743_v5 = vsel %vm2615_vm1, %v2679_v8, 0.0  ;;  %v2744_v59 = vsel %vm2616_vm12, %v2679_v8, 0.0  ;;  %v2805_v40 = vadd.f32 %v2741_v10, %v2501_v17  ;;  %v4654_v8 = vld [vmem:[#allocation7 + $0x120] sm:$0xff]  ;;  %v4660_v19 = vld [vmem:[%s5088_s14 + $0x70] sm:$0xff]  ;;  %v4661_v20 = vld [vmem:[#allocation7 + $0x108] sm:$0xff] }
 0x393   : > { %vm2009_vm4 = vcmp.eq.s32.totalorder %v5101_v3, %v10328_v62  ;;  %vm2010_vm8 = vcmp.eq.s32.totalorder %v6170_v14, %v10328_v62  ;;  %vm2011_vm7 = vcmp.eq.s32.totalorder %v6175_v55, %v10328_v62  ;;  %vm2917_vm10 = vcmp.eq.s32.totalorder %v5101_v3, %v2864_v41  ;;  %4387 = vmatpush3.msra.mxu1 %v4654_v8  ;;  %v10339_v8 = vld [vmem:[#allocation133_spill] sm:$0xff] }
 0x394   : > { %vm2918_vm13 = vcmp.eq.s32.totalorder %v6170_v14, %v2864_v41  ;;  %vm2919_vm2 = vcmp.eq.s32.totalorder %v6175_v55, %v2864_v41  ;;  %vm2920_vm5 = vcmp.eq.s32.totalorder %v6178_v28, %v2864_v41  ;;  %4535 = vset.pattern.permute.xlu1 %v10252_v36  ;;  %v3045_v13 = vsel %vm2917_vm10, %v2983_v38, 0.0  ;;  %4372 = vmatprep.subr.mxu1 %v4655_v60  ;;  %v10340_v60 = vld [vmem:[#allocation149_spill] sm:$0xff] }
 0x395   : > { %v3046_v18 = vsel %vm2918_vm13, %v2983_v38, 0.0  ;;  %v3047_v54 = vsel %vm2919_vm2, %v2983_v38, 0.0  ;;  %v3048_v7 = vsel %vm2920_vm5, %v2983_v38, 0.0  ;;  %vm2013_vm15 = vcmp.eq.s32.totalorder %v5101_v3, %v10329_v26  ;;  %2706 = vperm.xlu1 %4535, %v10330_v63   ;;  %4388 = vmatpush3.msra.mxu1 %v4656_v25  ;;  %v3168_v24 = vpop.permute.xlu1 %3167  ;;  %v10338_v38 = vld [vmem:[#allocation174_spill] sm:$0xff] }
 0x396   : > { %vm2014_vm1 = vcmp.eq.s32.totalorder %v6170_v14, %v10329_v26  ;;  %vm2015_vm12 = vcmp.eq.s32.totalorder %v6175_v55, %v10329_v26  ;;  %vm2016_vm0 = vcmp.eq.s32.totalorder %v6178_v28, %v10329_v26  ;;  %v1836_v29 = vsel %vm1708_vm11, %v10302_v31, 0.0  ;;  %4373 = vmatprep.subr.mxu1 %v4657_v9  ;;  %v4663_v26 = vld [vmem:[#allocation7 + $0x100] sm:$0xff] }
 0x397   : > { %v2806_v57 = vadd.f32 %v2742_v56, %v2502_v58  ;;  %v2807_v21 = vadd.f32 %v2743_v5, %v2503_v61  ;;  %v2808_v15 = vadd.f32 %v2744_v59, %v2504_v33  ;;  %v1837_v11 = vsel %vm1709_vm6, %v10331_v27, 0.0  ;;  %4389 = vmatpush3.msra.mxu1 %v4658_v4  ;;  %v10334_v33 = vld [vmem:[#allocation140_spill] sm:$0xff]  ;;  %v10337_v59 = vld [vmem:[#allocation173_spill] sm:$0xff] }
 0x398   : > { %v1838_v22 = vsel %vm1710_vm9, %v10331_v27, 0.0  ;;  %v1839_v42 = vsel %vm1711_vm3, %v10331_v27, 0.0  ;;  %v1840_v31 = vsel %vm1712_vm14, %v10331_v27, 0.0  ;;  %v3109_v44 = vadd.f32 %v3045_v13, %v2805_v40  ;;  %4374 = vmatprep.subr.mxu1 %v4659_v48 }
 0x399   : > { %v3110_v12 = vadd.f32 %v3046_v18, %v2806_v57  ;;  %v3112_v47 = vadd.f32 %v3048_v7, %v2808_v15  ;;  %v3111_v23 = vadd.f32 %v3047_v54, %v2807_v21  ;;  %vm3221_vm11 = vcmp.eq.s32.totalorder %v5101_v3, %v3168_v24  ;;  %4536 = vset.pattern.permute.xlu1 %v9997_v32  ;;  %v4662_v15 = vld [vmem:[#allocation7 + $0x180] sm:$0xff] }
 0x39a   : > { %vm3222_vm6 = vcmp.eq.s32.totalorder %v6170_v14, %v3168_v24  ;;  %vm3223_vm9 = vcmp.eq.s32.totalorder %v6175_v55, %v3168_v24  ;;  %vm3224_vm3 = vcmp.eq.s32.totalorder %v6178_v28, %v3168_v24  ;;  %v3349_v39 = vsel %vm3221_vm11, %v3287_v16, 0.0  ;;  %2884 = vperm.xlu1 %4536, %v4660_v19   ;;  %4390 = vmatpush3.msra.mxu1 %v4661_v20 }
 0x39b   : > { %v3350_v30 = vsel %vm3222_vm6, %v3287_v16, 0.0  ;;  %v3352_v35 = vsel %vm3224_vm3, %v3287_v16, 0.0  ;;  %v3351_v43 = vsel %vm3223_vm9, %v3287_v16, 0.0  ;;  %v3413_v53 = vadd.f32 %v3349_v39, %v3109_v44  ;;  %4375 = vmatprep.subr.mxu1 %v4662_v15 }
 0x39c   : > { %v3414_v41 = vadd.f32 %v3350_v30, %v3110_v12  ;;  %v3416_v2 = vadd.f32 %v3352_v35, %v3112_v47  ;;  %v3415_v10 = vadd.f32 %v3351_v43, %v3111_v23  ;;  %v1898_v17 = vadd.f32 %v8478_v52, %v10332_v37  ;;  %v2683_v52 = vpop.permute.xlu1 %2682  ;;  %4391 = vmatpush3.msra.mxu1 %v4663_v26 }
 0x39d   : > { %v1899_v51 = vadd.f32 %v8489_v49, %v8462_v46  ;;  %v1900_v58 = vadd.f32 %v1836_v29, %v8466_v0  ;;  %v1901_v61 = vadd.f32 %v1837_v11, %v10333_v45  ;;  %v2137_v6 = vsel %vm2009_vm4, %v10334_v33, 0.0  ;;  %v10336_v49 = vld [vmem:[#allocation36_spill] sm:$0xff] }
 0x39e   : > { %v2138_v56 = vsel %vm2010_vm8, %v10334_v33, 0.0  ;;  %v2139_v46 = vsel %vm2011_vm7, %v10334_v33, 0.0  ;;  %vm10335_vm14 = vcmp.eq.s32.totalorder %v6178_v28, %v10328_v62  ;;  %3612 = vmatprep.mubr.f32.mxu1 %v3414_v41  ;;  %3757 = vmatprep.mubr.f32.mxu0 %v3416_v2  ;;  %v1902_v5 = vadd.f32 %v1838_v22, %v10336_v49 }
 0x39f   : > { %v2140_v0 = vsel %vm10335_vm14, %v10334_v33, 0.0  ;;  %v1903_v40 = vadd.f32 %v1839_v42, %v10337_v59  ;;  %v1904_v50 = vadd.f32 %v1840_v31, %v10338_v38  ;;  %3613 = vmatmul.mubr.f32.gmra.mxu1 %v3413_v53  ;;  %3758 = vmatmul.mubr.f32.gmra.mxu0 %v3415_v10  ;;  %v2141_v13 = vsel %vm2013_vm15, %v10339_v8, 0.0  ;;  %v10342_v31 = vld [vmem:[#allocation116_spill] sm:$0xff] }
 0x3a0   : > { %v2142_v62 = vsel %vm2014_vm1, %v10339_v8, 0.0  ;;  %v2143_v18 = vsel %vm2015_vm12, %v10339_v8, 0.0  ;;  %v2144_v54 = vsel %vm2016_vm0, %v10339_v8, 0.0  ;;  %3010 = vperm.xlu1 %4536, %v10330_v63   ;;  %v2201_v7 = vadd.f32 %v2137_v6, %v8482_v1  ;;  %v10341_v1 = vld [vmem:[#allocation91_spill] sm:$0xff]  ;;  %v2867_v42 = vpop.permute.xlu1 %2866 }
 0x3a1   : > { %v2202_v29 = vadd.f32 %v2138_v56, %v1898_v17  ;;  %v2203_v57 = vadd.f32 %v2139_v46, %v1899_v51  ;;  %v2204_v21 = vadd.f32 %v2140_v0, %v1900_v58  ;;  %vm2313_vm4 = vcmp.eq.s32.totalorder %v5101_v3, %v10340_v60  ;;  %v10343_v51 = vld [vmem:[#allocation53_spill] sm:$0xff]  ;;  %v10344_v58 = vld [vmem:[#allocation64_spill] sm:$0xff]  ;;  %v10346_v56 = vld [vmem:[#allocation35_spill] sm:$0xff]  ;;  %v3291_v46 = vpop.permute.xlu0 %3290 }
 0x3a2   : > { %vm2314_vm8 = vcmp.eq.s32.totalorder %v6170_v14, %v10340_v60  ;;  %vm2315_vm7 = vcmp.eq.s32.totalorder %v6175_v55, %v10340_v60  ;;  %vm2316_vm0 = vcmp.eq.s32.totalorder %v6178_v28, %v10340_v60  ;;  %v2441_v63 = vsel %vm2313_vm4, %v10341_v1, 0.0  ;;  %v10347_v0 = vld [vmem:[#allocation30_spill] sm:$0xff] }
 0x3a3   : > { %v2442_v27 = vsel %vm2314_vm8, %v10341_v1, 0.0  ;;  %v2443_v11 = vsel %vm2315_vm7, %v10341_v1, 0.0  ;;  %v2444_v22 = vsel %vm2316_vm0, %v10341_v1, 0.0  ;;  %vm2617_vm10 = vcmp.eq.s32.totalorder %v5101_v3, %v10342_v31 }
 0x3a4   : > { %vm2618_vm13 = vcmp.eq.s32.totalorder %v6170_v14, %v10342_v31  ;;  %vm2619_vm2 = vcmp.eq.s32.totalorder %v6175_v55, %v10342_v31  ;;  %vm2620_vm5 = vcmp.eq.s32.totalorder %v6178_v28, %v10342_v31  ;;  %4538 = vset.pattern.permute.xlu1 %v10016_v34  ;;  %v8614_v25 = vadd.f32 %v2141_v13, %v1901_v61  ;;  %v2987_v43 = vpop.permute.xlu1 %2986  ;;  %v10352_v31 = vld [vmem:[#allocation59_spill] sm:$0xff] }
 0x3a5   : > { %v8616_v24 = vadd.f32 %v2142_v62, %v1902_v5  ;;  %v8618_v12 = vadd.f32 %v2143_v18, %v1903_v40  ;;  %v8620_v47 = vadd.f32 %v2144_v54, %v1904_v50  ;;  %3188 = vperm.xlu1 %4538, %v4660_v19   ;;  %v2505_v44 = vadd.f32 %v2441_v63, %v2201_v7  ;;  %v4664_v40 = vld [vmem:[%s5088_s14 + $0x78] sm:$0xff]  ;;  %v10349_v18 = vld [vmem:[#allocation169_spill] sm:$0xff]  ;;  %s3878_s14 = scalar_lea.sflag [#allocation4], %s5073_s10 }
 0x3a6   : > { %v2506_v23 = vadd.f32 %v2442_v27, %v2202_v29  ;;  %v2507_v9 = vadd.f32 %v2443_v11, %v2203_v57  ;;  %v2508_v16 = vadd.f32 %v2444_v22, %v2204_v21  ;;  %v2745_v4 = vsel %vm2617_vm10, %v2683_v52, 0.0  ;;  %v10350_v7 = vld [vmem:[#allocation170_spill] sm:$0xff]  ;;  %v10351_v57 = vld [vmem:[#allocation171_spill] sm:$0xff] }
 0x3a7   : > { %v2746_v30 = vsel %vm2618_vm13, %v2683_v52, 0.0  ;;  %v2747_v35 = vsel %vm2619_vm2, %v2683_v52, 0.0  ;;  %v2748_v39 = vsel %vm2620_vm5, %v2683_v52, 0.0  ;;  %vm2921_vm15 = vcmp.eq.s32.totalorder %v5101_v3, %v2867_v42 }
 0x3a8   : > { %vm2922_vm1 = vcmp.eq.s32.totalorder %v6170_v14, %v2867_v42  ;;  %vm2923_vm12 = vcmp.eq.s32.totalorder %v6175_v55, %v2867_v42  ;;  %vm2924_vm11 = vcmp.eq.s32.totalorder %v6178_v28, %v2867_v42  ;;  %v3049_v48 = vsel %vm2921_vm15, %v2987_v43, 0.0  ;;  %v3171_v45 = vpop.permute.xlu1 %3170 }
 0x3a9   : > { %4539 = vset.pattern.permute.xlu1 %v10252_v36  ;;  %v3050_v19 = vsel %vm2922_vm1, %v2987_v43, 0.0  ;;  %v3051_v41 = vsel %vm2923_vm12, %v2987_v43, 0.0  ;;  %v3052_v2 = vsel %vm2924_vm11, %v2987_v43, 0.0  ;;  %v2809_v53 = vadd.f32 %v2745_v4, %v2505_v44  ;;  %v10345_v36 = vld [vmem:[#allocation20_spill] sm:$0xff] }
 0x3aa   : > { %v2810_v10 = vadd.f32 %v2746_v30, %v2506_v23  ;;  %v2811_v37 = vadd.f32 %v2747_v35, %v2507_v9  ;;  %v2812_v17 = vadd.f32 %v2748_v39, %v2508_v16  ;;  %2710 = vperm.xlu1 %4539, %v10343_v51   ;;  %vm2621_vm6 = vcmp.eq.s32.totalorder %v5101_v3, %v10344_v58  ;;  %v10356_v16 = vld [vmem:[#allocation103_spill] sm:$0xff]  ;;  %v10358_v39 = vld [vmem:[#allocation110_spill] sm:$0xff] }
 0x3ab   : > { %vm2622_vm9 = vcmp.eq.s32.totalorder %v6170_v14, %v10344_v58  ;;  %vm2623_vm3 = vcmp.eq.s32.totalorder %v6175_v55, %v10344_v58  ;;  %vm2624_vm14 = vcmp.eq.s32.totalorder %v6178_v28, %v10344_v58  ;;  %vm1089_vm4 = vcmp.eq.s32.totalorder %v5101_v3, %v10345_v36 }
 0x3ac   : > { %vm1090_vm8 = vcmp.eq.s32.totalorder %v6170_v14, %v10345_v36  ;;  %v3114_v61 = vadd.f32 %v3050_v19, %v2810_v10  ;;  %v3116_v20 = vadd.f32 %v3052_v2, %v2812_v17  ;;  %v3113_v33 = vadd.f32 %v3049_v48, %v2809_v53  ;;  %v2687_v15 = vpop.permute.xlu1 %2686  ;;  %v10362_v2 = vld [vmem:[#allocation97_spill] sm:$0xff] }
 0x3ad   : > { %v3115_v6 = vadd.f32 %v3051_v41, %v2811_v37  ;;  %vm1091_vm7 = vcmp.eq.s32.totalorder %v6175_v55, %v10345_v36  ;;  %vm1092_vm0 = vcmp.eq.s32.totalorder %v6178_v28, %v10345_v36  ;;  %vm3225_vm13 = vcmp.eq.s32.totalorder %v5101_v3, %v3171_v45 }
 0x3ae   : > { %vm3226_vm2 = vcmp.eq.s32.totalorder %v6170_v14, %v3171_v45  ;;  %vm3227_vm5 = vcmp.eq.s32.totalorder %v6175_v55, %v3171_v45  ;;  %vm3228_vm15 = vcmp.eq.s32.totalorder %v6178_v28, %v3171_v45  ;;  %vm1409_vm1 = vcmp.eq.s32.totalorder %v5101_v3, %v10347_v0  ;;  %4540 = vset.pattern.permute.xlu1 %v9997_v32  ;;  %v10348_v32 = vld [vmem:[#allocation168_spill] sm:$0xff] }
 0x3af   : > { %v3354_v52 = vsel %vm3226_vm2, %v3291_v46, 0.0  ;;  %v3356_v49 = vsel %vm3228_vm15, %v3291_v46, 0.0  ;;  %v3353_v5 = vsel %vm3225_vm13, %v3291_v46, 0.0  ;;  %v3355_v59 = vsel %vm3227_vm5, %v3291_v46, 0.0  ;;  %2887 = vperm.xlu1 %4540, %v4664_v40  }
 0x3b0   : > { %v3418_v38 = vadd.f32 %v3354_v52, %v3114_v61  ;;  %v3420_v50 = vadd.f32 %v3356_v49, %v3116_v20  ;;  %v3417_v8 = vadd.f32 %v3353_v5, %v3113_v33  ;;  %v3419_v13 = vadd.f32 %v3355_v59, %v3115_v6  ;;  %v2870_v35 = vpop.permute.xlu1 %2869  ;;  %v10364_v5 = vld [vmem:[#allocation71_spill] sm:$0xff] }
 0x3b1   : > { %vm1414_vm12 = vcmp.eq.s32.totalorder %v6170_v14, %v10346_v56  ;;  %vm1415_vm11 = vcmp.eq.s32.totalorder %v6175_v55, %v10346_v56  ;;  %vm1416_vm10 = vcmp.eq.s32.totalorder %v6178_v28, %v10346_v56  ;;  %v2509_v62 = vadd.f32 %v10348_v32, %v8614_v25  ;;  %v10353_v25 = vld [vmem:[#allocation80_spill] sm:$0xff]  ;;  %v10365_v59 = vld [vmem:[#allocation119_spill] sm:$0xff] }
 0x3b2   : > { %v2510_v54 = vadd.f32 %v10349_v18, %v8616_v24  ;;  %v2511_v29 = vadd.f32 %v10350_v7, %v8618_v12  ;;  %v2512_v21 = vadd.f32 %v10351_v57, %v8620_v47  ;;  %3617 = vmatprep.mubr.f32.mxu1 %v3418_v38  ;;  %3762 = vmatprep.mubr.f32.mxu0 %v3420_v50  ;;  %v2749_v60 = vsel %vm2621_vm6, %v2687_v15, 0.0  ;;  %v10354_v24 = vld [vmem:[#allocation56_spill] sm:$0xff]  ;;  %v10355_v12 = vld [vmem:[#allocation90_spill] sm:$0xff] }
 0x3b3   : > { %v2750_v26 = vsel %vm2622_vm9, %v2687_v15, 0.0  ;;  %v2751_v1 = vsel %vm2623_vm3, %v2687_v15, 0.0  ;;  %v2752_v63 = vsel %vm2624_vm14, %v2687_v15, 0.0  ;;  %3618 = vmatmul.mubr.f32.gmra.mxu1 %v3417_v8  ;;  %3763 = vmatmul.mubr.f32.gmra.mxu0 %v3419_v13  ;;  %v8687_v27 = vadd.f32 %v2749_v60, %v2509_v62  ;;  %v10370_v13 = vld [vmem:[#allocation126_spill] sm:$0xff]  ;;  %v3295_v60 = vpop.permute.xlu0 %3294 }
 0x3b4   : > { %3014 = vperm.xlu1 %4540, %v10343_v51   ;;  %v8689_v11 = vadd.f32 %v2750_v26, %v2510_v54  ;;  %v8691_v22 = vadd.f32 %v2751_v1, %v2511_v29  ;;  %v2816_v42 = vadd.f32 %v2752_v63, %v2512_v21  ;;  %vm1093_vm13 = vcmp.eq.s32.totalorder %v5101_v3, %v10353_v25  ;;  %v2991_v46 = vpop.permute.xlu1 %2990 }
 0x3b5   : > { %vm1094_vm2 = vcmp.eq.s32.totalorder %v6170_v14, %v10353_v25  ;;  %vm1717_vm5 = vcmp.eq.s32.totalorder %v5101_v3, %v10354_v24  ;;  %vm1718_vm15 = vcmp.eq.s32.totalorder %v6170_v14, %v10354_v24  ;;  %vm1719_vm9 = vcmp.eq.s32.totalorder %v6175_v55, %v10354_v24 }
 0x3b6   : > { %vm1095_vm14 = vcmp.eq.s32.totalorder %v6175_v55, %v10353_v25  ;;  %vm1096_vm6 = vcmp.eq.s32.totalorder %v6178_v28, %v10353_v25  ;;  %v1233_v47 = vsel %vm1089_vm4, %v10355_v12, 0.0  ;;  %v1234_v44 = vsel %vm1090_vm8, %v10355_v12, 0.0 }
 0x3b7   : > { %v1235_v23 = vsel %vm1091_vm7, %v10355_v12, 0.0  ;;  %v1236_v9 = vsel %vm1092_vm0, %v10355_v12, 0.0  ;;  %vm10357_vm3 = vcmp.eq.s32.totalorder %v5101_v3, %v10346_v56  ;;  %v1542_v30 = vsel %vm1414_vm12, %v10356_v16, 0.0 }
 0x3b8   : > { %v1541_v4 = vsel %vm10357_vm3, %v10356_v16, 0.0  ;;  %v1537_v43 = vsel %vm1409_vm1, %v10358_v39, 0.0  ;;  %vm10359_vm4 = vcmp.eq.s32.totalorder %v6170_v14, %v10347_v0  ;;  %vm10360_vm8 = vcmp.eq.s32.totalorder %v6175_v55, %v10347_v0  ;;  %4541 = vset.pattern.permute.xlu1 %v10016_v34  ;;  %v3174_v7 = vpop.permute.xlu1 %3173 }
 0x3b9   : > { %v1538_v48 = vsel %vm10359_vm4, %v10358_v39, 0.0  ;;  %v1539_v19 = vsel %vm10360_vm8, %v10358_v39, 0.0  ;;  %vm10361_vm7 = vcmp.eq.s32.totalorder %v6178_v28, %v10347_v0  ;;  %v1237_v53 = vsel %vm1093_vm13, %v10362_v2, 0.0  ;;  %3318 = vperm.xlu1 %4541, %v10343_v51   ;;  %v10363_v51 = vld [vmem:[#allocation76_spill] sm:$0xff] }
 0x3ba   : > { %v1540_v41 = vsel %vm10361_vm7, %v10358_v39, 0.0  ;;  %v1238_v10 = vsel %vm1094_vm2, %v10362_v2, 0.0  ;;  %v1239_v37 = vsel %vm1095_vm14, %v10362_v2, 0.0  ;;  %v1240_v34 = vsel %vm1096_vm6, %v10362_v2, 0.0  ;;  %v10372_v39 = vld [vmem:[#allocation135_spill] sm:$0xff] }
 0x3bb   : > { %v1543_v17 = vsel %vm1415_vm11, %v10356_v16, 0.0  ;;  %v1544_v58 = vsel %vm1416_vm10, %v10356_v16, 0.0  ;;  %v1605_v36 = vadd.f32 %v1541_v4, %v1237_v53  ;;  %v1606_v45 = vadd.f32 %v1542_v30, %v1238_v10  ;;  %v10374_v10 = vld [vmem:[#allocation151_spill] sm:$0xff] }
 0x3bc   : > { %v1601_v61 = vadd.f32 %v1537_v43, %v1233_v47  ;;  %v1602_v20 = vadd.f32 %v1538_v48, %v1234_v44  ;;  %v1603_v33 = vadd.f32 %v1539_v19, %v1235_v23  ;;  %v1604_v6 = vadd.f32 %v1540_v41, %v1236_v9  ;;  %v2691_v16 = vpop.permute.xlu1 %2690  ;;  %v10373_v48 = vld [vmem:[#allocation142_spill] sm:$0xff] }
 0x3bd   : > { %vm2925_vm0 = vcmp.eq.s32.totalorder %v5101_v3, %v2870_v35  ;;  %vm2926_vm1 = vcmp.eq.s32.totalorder %v6170_v14, %v2870_v35  ;;  %vm2927_vm12 = vcmp.eq.s32.totalorder %v6175_v55, %v2870_v35  ;;  %vm2928_vm11 = vcmp.eq.s32.totalorder %v6178_v28, %v2870_v35 }
 0x3be   : > { %vm2021_vm6 = vcmp.eq.s32.totalorder %v5101_v3, %v10363_v51  ;;  %v3053_v56 = vsel %vm2925_vm0, %v2991_v46, 0.0  ;;  %v3054_v0 = vsel %vm2926_vm1, %v2991_v46, 0.0  ;;  %v3055_v52 = vsel %vm2927_vm12, %v2991_v46, 0.0 }
 0x3bf   : > { %v3056_v49 = vsel %vm2928_vm11, %v2991_v46, 0.0  ;;  %vm2017_vm10 = vcmp.eq.s32.totalorder %v5101_v3, %v10364_v5  ;;  %vm2018_vm3 = vcmp.eq.s32.totalorder %v6170_v14, %v10364_v5  ;;  %vm2019_vm14 = vcmp.eq.s32.totalorder %v6175_v55, %v10364_v5 }
 0x3c0   : > { %vm2020_vm13 = vcmp.eq.s32.totalorder %v6178_v28, %v10364_v5  ;;  %vm10366_vm2 = vcmp.eq.s32.totalorder %v5101_v3, %v10352_v31  ;;  %vm10367_vm4 = vcmp.eq.s32.totalorder %v6170_v14, %v10352_v31  ;;  %vm10368_vm8 = vcmp.eq.s32.totalorder %v6175_v55, %v10352_v31 }
 0x3c1   : > { %v1841_v40 = vsel %vm10366_vm2, %v10365_v59, 0.0  ;;  %v1842_v38 = vsel %vm10367_vm4, %v10365_v59, 0.0  ;;  %v1843_v50 = vsel %vm10368_vm8, %v10365_v59, 0.0  ;;  %vm10369_vm7 = vcmp.eq.s32.totalorder %v6178_v28, %v10352_v31 }
 0x3c2   : > { %v1844_v8 = vsel %vm10369_vm7, %v10365_v59, 0.0  ;;  %v1845_v32 = vsel %vm1717_vm5, %v10370_v13, 0.0  ;;  %v1846_v62 = vsel %vm1718_vm15, %v10370_v13, 0.0  ;;  %v1847_v18 = vsel %vm1719_vm9, %v10370_v13, 0.0 }
 0x3c3   : > { %vm10371_vm0 = vcmp.eq.s32.totalorder %v6178_v28, %v10354_v24  ;;  %v3118_v29 = vadd.f32 %v3054_v0, %v8689_v11  ;;  %v3120_v57 = vadd.f32 %v3056_v49, %v2816_v42  ;;  %v3117_v21 = vadd.f32 %v3053_v56, %v8687_v27 }
 0x3c4   : > { %v1848_v54 = vsel %vm10371_vm0, %v10370_v13, 0.0  ;;  %v3119_v15 = vadd.f32 %v3055_v52, %v8691_v22  ;;  %vm3229_vm5 = vcmp.eq.s32.totalorder %v5101_v3, %v3174_v7  ;;  %vm3230_vm15 = vcmp.eq.s32.totalorder %v6170_v14, %v3174_v7 }
 0x3c5   : > { %vm3231_vm9 = vcmp.eq.s32.totalorder %v6175_v55, %v3174_v7  ;;  %vm3232_vm1 = vcmp.eq.s32.totalorder %v6178_v28, %v3174_v7  ;;  %vm2022_vm12 = vcmp.eq.s32.totalorder %v6170_v14, %v10363_v51  ;;  %vm2023_vm11 = vcmp.eq.s32.totalorder %v6175_v55, %v10363_v51 }
 0x3c6   : > { %vm2024_vm2 = vcmp.eq.s32.totalorder %v6178_v28, %v10363_v51  ;;  %v3358_v26 = vsel %vm3230_vm15, %v3295_v60, 0.0  ;;  %v3360_v1 = vsel %vm3232_vm1, %v3295_v60, 0.0  ;;  %v3357_v63 = vsel %vm3229_vm5, %v3295_v60, 0.0 }
 0x3c7   : > { %v3359_v27 = vsel %vm3231_vm9, %v3295_v60, 0.0  ;;  %v3422_v11 = vadd.f32 %v3358_v26, %v3118_v29  ;;  %v3424_v22 = vadd.f32 %v3360_v1, %v3120_v57  ;;  %v3421_v42 = vadd.f32 %v3357_v63, %v3117_v21  ;;  %v10377_v63 = vld [vmem:[#allocation24_spill] sm:$0xff] }
 0x3c8   : > { %v3423_v31 = vadd.f32 %v3359_v27, %v3119_v15  ;;  %v1607_v25 = vadd.f32 %v1543_v17, %v1239_v37  ;;  %v1608_v24 = vadd.f32 %v1544_v58, %v1240_v34  ;;  %v1905_v12 = vadd.f32 %v1841_v40, %v1601_v61  ;;  %v10375_v37 = vld [vmem:[#allocation93_spill] sm:$0xff] }
 0x3c9   : > { %v1906_v47 = vadd.f32 %v1842_v38, %v1602_v20  ;;  %v1907_v44 = vadd.f32 %v1843_v50, %v1603_v33  ;;  %v1908_v23 = vadd.f32 %v1844_v8, %v1604_v6  ;;  %v1909_v9 = vadd.f32 %v1845_v32, %v1605_v36  ;;  %3622 = vmatprep.mubr.f32.mxu1 %v3422_v11  ;;  %v2873_v6 = vpop.permute.xlu1 %2872  ;;  %v10376_v38 = vld [vmem:[#allocation68_spill] sm:$0xff] }
 0x3ca   : > { %3767 = vmatprep.mubr.f32.mxu0 %v3424_v22  ;;  %v1910_v4 = vadd.f32 %v1846_v62, %v1606_v45  ;;  %v1911_v30 = vadd.f32 %v1847_v18, %v1607_v25  ;;  %v1912_v35 = vadd.f32 %v1848_v54, %v1608_v24  ;;  %v2149_v43 = vsel %vm2021_vm6, %v10372_v39, 0.0  ;;  %3623 = vmatmul.mubr.f32.gmra.mxu1 %v3421_v42  ;;  %v3299_v24 = vpop.permute.xlu0 %3298 }
 0x3cb   : > { %3768 = vmatmul.mubr.f32.gmra.mxu0 %v3423_v31  ;;  %v2145_v19 = vsel %vm2017_vm10, %v10373_v48, 0.0  ;;  %v2146_v41 = vsel %vm2018_vm3, %v10373_v48, 0.0  ;;  %v2147_v2 = vsel %vm2019_vm14, %v10373_v48, 0.0  ;;  %v2148_v53 = vsel %vm2020_vm13, %v10373_v48, 0.0 }
 0x3cc   : > { %vm2321_vm6 = vcmp.eq.s32.totalorder %v5101_v3, %v10374_v10  ;;  %vm2322_vm10 = vcmp.eq.s32.totalorder %v6170_v14, %v10374_v10  ;;  %vm2323_vm4 = vcmp.eq.s32.totalorder %v6175_v55, %v10374_v10  ;;  %vm2324_vm3 = vcmp.eq.s32.totalorder %v6178_v28, %v10374_v10 }
 0x3cd   : > { %v2449_v34 = vsel %vm2321_vm6, %v10375_v37, 0.0  ;;  %v2450_v17 = vsel %vm2322_vm10, %v10375_v37, 0.0  ;;  %v2451_v58 = vsel %vm2323_vm4, %v10375_v37, 0.0  ;;  %v2452_v36 = vsel %vm2324_vm3, %v10375_v37, 0.0  ;;  %v2995_v32 = vpop.permute.xlu1 %2994 }
 0x3ce   : > { %v2209_v45 = vadd.f32 %v2145_v19, %v1905_v12  ;;  %v2210_v61 = vadd.f32 %v2146_v41, %v1906_v47  ;;  %v2211_v20 = vadd.f32 %v2147_v2, %v1907_v44  ;;  %v2212_v33 = vadd.f32 %v2148_v53, %v1908_v23  ;;  %v10380_v19 = vld [vmem:[#allocation172_spill] sm:$0xff] }
 0x3cf   : > { %v2150_v46 = vsel %vm2022_vm12, %v10372_v39, 0.0  ;;  %v2151_v56 = vsel %vm2023_vm11, %v10372_v39, 0.0  ;;  %v2152_v0 = vsel %vm2024_vm2, %v10372_v39, 0.0  ;;  %v2213_v52 = vadd.f32 %v2149_v43, %v1909_v9  ;;  %v10379_v43 = vld [vmem:[#allocation101_spill] sm:$0xff]  ;;  %v10381_v2 = vld [vmem:[#allocation120_spill] sm:$0xff] }
 0x3d0   : > { %v2513_v49 = vadd.f32 %v2449_v34, %v2209_v45  ;;  %v2514_v5 = vadd.f32 %v2450_v17, %v2210_v61  ;;  %v2515_v59 = vadd.f32 %v2451_v58, %v2211_v20  ;;  %v2516_v40 = vadd.f32 %v2452_v36, %v2212_v33  ;;  %v10382_v20 = vld [vmem:[#allocation32_spill] sm:$0xff]  ;;  %v10383_v33 = vld [vmem:[#allocation21_spill] sm:$0xff] }
 0x3d1   : > { %vm2625_vm14 = vcmp.eq.s32.totalorder %v5101_v3, %v10376_v38  ;;  %vm2626_vm13 = vcmp.eq.s32.totalorder %v6170_v14, %v10376_v38  ;;  %vm2627_vm8 = vcmp.eq.s32.totalorder %v6175_v55, %v10376_v38  ;;  %vm2628_vm7 = vcmp.eq.s32.totalorder %v6178_v28, %v10376_v38  ;;  %v3177_v11 = vpop.permute.xlu1 %3176  ;;  %v10388_v38 = vld [vmem:[#allocation98_spill] sm:$0xff] }
 0x3d2   : > { %v2753_v50 = vsel %vm2625_vm14, %v2691_v16, 0.0  ;;  %v2754_v51 = vsel %vm2626_vm13, %v2691_v16, 0.0  ;;  %v2755_v8 = vsel %vm2627_vm8, %v2691_v16, 0.0  ;;  %v2756_v13 = vsel %vm2628_vm7, %v2691_v16, 0.0 }
 0x3d3   : > { %vm2929_vm0 = vcmp.eq.s32.totalorder %v5101_v3, %v2873_v6  ;;  %vm2930_vm5 = vcmp.eq.s32.totalorder %v6170_v14, %v2873_v6  ;;  %vm2931_vm15 = vcmp.eq.s32.totalorder %v6175_v55, %v2873_v6  ;;  %vm2932_vm9 = vcmp.eq.s32.totalorder %v6178_v28, %v2873_v6 }
 0x3d4   : > { %v3057_v62 = vsel %vm2929_vm0, %v2995_v32, 0.0  ;;  %v3058_v18 = vsel %vm2930_vm5, %v2995_v32, 0.0  ;;  %v3059_v54 = vsel %vm2931_vm15, %v2995_v32, 0.0  ;;  %v3060_v7 = vsel %vm2932_vm9, %v2995_v32, 0.0 }
 0x3d5   : > { %v2817_v29 = vadd.f32 %v2753_v50, %v2513_v49  ;;  %v2818_v57 = vadd.f32 %v2754_v51, %v2514_v5  ;;  %v2819_v21 = vadd.f32 %v2755_v8, %v2515_v59  ;;  %v2820_v15 = vadd.f32 %v2756_v13, %v2516_v40  ;;  %v2695_v53 = vpop.permute.xlu1 %2694  ;;  %v10387_v40 = vld [vmem:[#allocation61_spill] sm:$0xff] }
 0x3d6   : > { %v2214_v60 = vadd.f32 %v2150_v46, %v1910_v4  ;;  %v2215_v26 = vadd.f32 %v2151_v56, %v1911_v30  ;;  %v2216_v1 = vadd.f32 %v2152_v0, %v1912_v35  ;;  %v2517_v27 = vadd.f32 %v10377_v63, %v2213_v52  ;;  %v10378_v35 = vld [vmem:[#allocation100_spill] sm:$0xff]  ;;  %v10384_v46 = vld [vmem:[#allocation82_spill] sm:$0xff]  ;;  %v10385_v56 = vld [vmem:[#allocation37_spill] sm:$0xff] }
 0x3d7   : > { %v3122_v22 = vadd.f32 %v3058_v18, %v2818_v57  ;;  %v3124_v42 = vadd.f32 %v3060_v7, %v2820_v15  ;;  %v3121_v31 = vadd.f32 %v3057_v62, %v2817_v29  ;;  %v3123_v25 = vadd.f32 %v3059_v54, %v2819_v21  ;;  %v10386_v0 = vld [vmem:[#allocation92_spill] sm:$0xff]  ;;  %v10389_v29 = vld [vmem:[#allocation105_spill] sm:$0xff] }
 0x3d8   : > { %vm3233_vm1 = vcmp.eq.s32.totalorder %v5101_v3, %v3177_v11  ;;  %vm3234_vm12 = vcmp.eq.s32.totalorder %v6170_v14, %v3177_v11  ;;  %vm3235_vm11 = vcmp.eq.s32.totalorder %v6175_v55, %v3177_v11  ;;  %vm3236_vm2 = vcmp.eq.s32.totalorder %v6178_v28, %v3177_v11 }
 0x3d9   : > { %v3362_v12 = vsel %vm3234_vm12, %v3299_v24, 0.0  ;;  %v3364_v47 = vsel %vm3236_vm2, %v3299_v24, 0.0  ;;  %v3361_v44 = vsel %vm3233_vm1, %v3299_v24, 0.0  ;;  %v3363_v23 = vsel %vm3235_vm11, %v3299_v24, 0.0  ;;  %v2876_v6 = vpop.permute.xlu1 %2875 }
 0x3da   : > { %v3426_v9 = vadd.f32 %v3362_v12, %v3122_v22  ;;  %v3428_v16 = vadd.f32 %v3364_v47, %v3124_v42  ;;  %v3425_v4 = vadd.f32 %v3361_v44, %v3121_v31  ;;  %v3427_v30 = vadd.f32 %v3363_v23, %v3123_v25  ;;  %v10393_v22 = vld [vmem:[#allocation58_spill] sm:$0xff]  ;;  %v10394_v42 = vld [vmem:[#allocation73_spill] sm:$0xff]  ;;  %v3303_v44 = vpop.permute.xlu0 %3302 }
 0x3db   : > { %v2518_v39 = vadd.f32 %v10378_v35, %v2214_v60  ;;  %v2519_v48 = vadd.f32 %v10379_v43, %v2215_v26  ;;  %v2520_v41 = vadd.f32 %v10380_v19, %v2216_v1  ;;  %vm2629_vm6 = vcmp.eq.s32.totalorder %v5101_v3, %v10381_v2  ;;  %v10390_v26 = vld [vmem:[#allocation112_spill] sm:$0xff] }
 0x3dc   : > { %vm2630_vm10 = vcmp.eq.s32.totalorder %v6170_v14, %v10381_v2  ;;  %vm2631_vm4 = vcmp.eq.s32.totalorder %v6175_v55, %v10381_v2  ;;  %vm2632_vm3 = vcmp.eq.s32.totalorder %v6178_v28, %v10381_v2  ;;  %3627 = vmatprep.mubr.f32.mxu1 %v3426_v9  ;;  %3772 = vmatprep.mubr.f32.mxu0 %v3428_v16  ;;  %v2757_v10 = vsel %vm2629_vm6, %v2695_v53, 0.0 }
 0x3dd   : > { %v2758_v37 = vsel %vm2630_vm10, %v2695_v53, 0.0  ;;  %v2759_v34 = vsel %vm2631_vm4, %v2695_v53, 0.0  ;;  %v2760_v17 = vsel %vm2632_vm3, %v2695_v53, 0.0  ;;  %3628 = vmatmul.mubr.f32.gmra.mxu1 %v3425_v4  ;;  %3773 = vmatmul.mubr.f32.gmra.mxu0 %v3427_v30  ;;  %v2821_v58 = vadd.f32 %v2757_v10, %v2517_v27  ;;  %v2999_v32 = vpop.permute.xlu1 %2998  ;;  %v10396_v10 = vld [vmem:[#allocation77_spill] sm:$0xff] }
 0x3de   : > { %v2822_v36 = vadd.f32 %v2758_v37, %v2518_v39  ;;  %v2823_v45 = vadd.f32 %v2759_v34, %v2519_v48  ;;  %v2824_v61 = vadd.f32 %v2760_v17, %v2520_v41  ;;  %vm1417_vm14 = vcmp.eq.s32.totalorder %v5101_v3, %v10382_v20  ;;  %v10395_v41 = vld [vmem:[#allocation121_spill] sm:$0xff]  ;;  %v10397_v17 = vld [vmem:[#allocation67_spill] sm:$0xff] }
 0x3df   : > { %vm1418_vm13 = vcmp.eq.s32.totalorder %v6170_v14, %v10382_v20  ;;  %vm1097_vm0 = vcmp.eq.s32.totalorder %v5101_v3, %v10383_v33  ;;  %vm1098_vm5 = vcmp.eq.s32.totalorder %v6170_v14, %v10383_v33  ;;  %vm1099_vm15 = vcmp.eq.s32.totalorder %v6175_v55, %v10383_v33 }
 0x3e0   : > { %vm1100_vm9 = vcmp.eq.s32.totalorder %v6178_v28, %v10383_v33  ;;  %vm1101_vm1 = vcmp.eq.s32.totalorder %v5101_v3, %v10384_v46  ;;  %vm1102_vm12 = vcmp.eq.s32.totalorder %v6170_v14, %v10384_v46  ;;  %vm1103_vm11 = vcmp.eq.s32.totalorder %v6175_v55, %v10384_v46 }
 0x3e1   : > { %vm1104_vm2 = vcmp.eq.s32.totalorder %v6178_v28, %v10384_v46  ;;  %vm1421_vm6 = vcmp.eq.s32.totalorder %v5101_v3, %v10385_v56  ;;  %vm1422_vm10 = vcmp.eq.s32.totalorder %v6170_v14, %v10385_v56  ;;  %vm1423_vm4 = vcmp.eq.s32.totalorder %v6175_v55, %v10385_v56  ;;  %v3180_v31 = vpop.permute.xlu1 %3179 }
 0x3e2   : > { %vm1424_vm3 = vcmp.eq.s32.totalorder %v6178_v28, %v10385_v56  ;;  %v1241_v52 = vsel %vm1097_vm0, %v10386_v0, 0.0  ;;  %v1242_v49 = vsel %vm1098_vm5, %v10386_v0, 0.0  ;;  %v8949_v5 = vsel %vm1099_vm15, %v10386_v0, 0.0 }
 0x3e3   : > { %v8952_v59 = vsel %vm1100_vm9, %v10386_v0, 0.0  ;;  %vm1721_vm7 = vcmp.eq.s32.totalorder %v5101_v3, %v10387_v40  ;;  %vm1722_vm8 = vcmp.eq.s32.totalorder %v6170_v14, %v10387_v40  ;;  %v8959_v50 = vsel %vm1101_vm1, %v10388_v38, 0.0 }
 0x3e4   : > { %v8962_v51 = vsel %vm1102_vm12, %v10388_v38, 0.0  ;;  %v8965_v8 = vsel %vm1103_vm11, %v10388_v38, 0.0  ;;  %v8968_v13 = vsel %vm1104_vm2, %v10388_v38, 0.0  ;;  %vm1723_vm0 = vcmp.eq.s32.totalorder %v6175_v55, %v10387_v40  ;;  %v10398_v38 = vld [vmem:[#allocation128_spill] sm:$0xff] }
 0x3e5   : > { %vm1724_vm5 = vcmp.eq.s32.totalorder %v6178_v28, %v10387_v40  ;;  %vm2933_vm15 = vcmp.eq.s32.totalorder %v5101_v3, %v2876_v6  ;;  %vm2934_vm9 = vcmp.eq.s32.totalorder %v6170_v14, %v2876_v6  ;;  %vm2935_vm1 = vcmp.eq.s32.totalorder %v6175_v55, %v2876_v6 }
 0x3e6   : > { %vm2936_vm12 = vcmp.eq.s32.totalorder %v6178_v28, %v2876_v6  ;;  %v3061_v62 = vsel %vm2933_vm15, %v2999_v32, 0.0  ;;  %v3062_v18 = vsel %vm2934_vm9, %v2999_v32, 0.0  ;;  %v3063_v54 = vsel %vm2935_vm1, %v2999_v32, 0.0 }
 0x3e7   : > { %v3064_v7 = vsel %vm2936_vm12, %v2999_v32, 0.0  ;;  %v1549_v57 = vsel %vm1421_vm6, %v10389_v29, 0.0  ;;  %v1550_v21 = vsel %vm1422_vm10, %v10389_v29, 0.0  ;;  %v1551_v15 = vsel %vm1423_vm4, %v10389_v29, 0.0 }
 0x3e8   : > { %v1552_v60 = vsel %vm1424_vm3, %v10389_v29, 0.0  ;;  %v1545_v1 = vsel %vm1417_vm14, %v10390_v26, 0.0  ;;  %v1546_v63 = vsel %vm1418_vm13, %v10390_v26, 0.0  ;;  %vm10391_vm11 = vcmp.eq.s32.totalorder %v6175_v55, %v10382_v20 }
 0x3e9   : > { %v1547_v27 = vsel %vm10391_vm11, %v10390_v26, 0.0  ;;  %vm10392_vm2 = vcmp.eq.s32.totalorder %v6178_v28, %v10382_v20  ;;  %vm1725_vm6 = vcmp.eq.s32.totalorder %v5101_v3, %v10393_v22  ;;  %vm1726_vm14 = vcmp.eq.s32.totalorder %v6170_v14, %v10393_v22 }
 0x3ea   : > { %v1548_v11 = vsel %vm10392_vm2, %v10390_v26, 0.0  ;;  %vm2027_vm10 = vcmp.eq.s32.totalorder %v6175_v55, %v10394_v42  ;;  %vm2028_vm13 = vcmp.eq.s32.totalorder %v6178_v28, %v10394_v42  ;;  %v3126_v25 = vadd.f32 %v3062_v18, %v2822_v36  ;;  %v10401_v18 = vld [vmem:[#allocation23_spill] sm:$0xff] }
 0x3eb   : > { %v3128_v24 = vadd.f32 %v3064_v7, %v2824_v61  ;;  %v3125_v12 = vadd.f32 %v3061_v62, %v2821_v58  ;;  %v3127_v47 = vadd.f32 %v3063_v54, %v2823_v45  ;;  %vm2025_vm4 = vcmp.eq.s32.totalorder %v5101_v3, %v10394_v42  ;;  %v2699_v58 = vpop.permute.xlu1 %2698  ;;  %v10400_v62 = vld [vmem:[#allocation152_spill] sm:$0xff] }
 0x3ec   : > { %vm2026_vm3 = vcmp.eq.s32.totalorder %v6170_v14, %v10394_v42  ;;  %vm3237_vm15 = vcmp.eq.s32.totalorder %v5101_v3, %v3180_v31  ;;  %vm3238_vm9 = vcmp.eq.s32.totalorder %v6170_v14, %v3180_v31  ;;  %vm3239_vm1 = vcmp.eq.s32.totalorder %v6175_v55, %v3180_v31 }
 0x3ed   : > { %vm3240_vm12 = vcmp.eq.s32.totalorder %v6178_v28, %v3180_v31  ;;  %v3366_v23 = vsel %vm3238_vm9, %v3303_v44, 0.0  ;;  %v3365_v16 = vsel %vm3237_vm15, %v3303_v44, 0.0  ;;  %v3367_v4 = vsel %vm3239_vm1, %v3303_v44, 0.0 }
 0x3ee   : > { %v3368_v9 = vsel %vm3240_vm12, %v3303_v44, 0.0  ;;  %v3430_v30 = vadd.f32 %v3366_v23, %v3126_v25  ;;  %v3429_v39 = vadd.f32 %v3365_v16, %v3125_v12  ;;  %v3431_v43 = vadd.f32 %v3367_v4, %v3127_v47 }
 0x3ef   : > { %v3432_v35 = vadd.f32 %v3368_v9, %v3128_v24  ;;  %vm1727_vm11 = vcmp.eq.s32.totalorder %v6175_v55, %v10393_v22  ;;  %vm1728_vm2 = vcmp.eq.s32.totalorder %v6178_v28, %v10393_v22  ;;  %v1609_v48 = vadd.f32 %v1545_v1, %v1241_v52 }
 0x3f0   : > { %v1610_v19 = vadd.f32 %v1546_v63, %v1242_v49  ;;  %v1849_v2 = vsel %vm1721_vm7, %v10395_v41, 0.0  ;;  %v1850_v53 = vsel %vm1722_vm8, %v10395_v41, 0.0  ;;  %vm2029_vm15 = vcmp.eq.s32.totalorder %v5101_v3, %v10396_v10  ;;  %3632 = vmatprep.mubr.f32.mxu1 %v3430_v30 }
 0x3f1   : > { %vm2030_vm9 = vcmp.eq.s32.totalorder %v6170_v14, %v10396_v10  ;;  %v1851_v37 = vsel %vm1723_vm0, %v10395_v41, 0.0  ;;  %v1852_v34 = vsel %vm1724_vm5, %v10395_v41, 0.0  ;;  %vm2635_vm7 = vcmp.eq.s32.totalorder %v6175_v55, %v10397_v17  ;;  %3777 = vmatprep.mubr.f32.mxu0 %v3432_v35  ;;  %3633 = vmatmul.mubr.f32.gmra.mxu1 %v3429_v39 }
 0x3f2   : > { %vm2636_vm8 = vcmp.eq.s32.totalorder %v6178_v28, %v10397_v17  ;;  %v1611_v36 = vadd.f32 %v1547_v27, %v8949_v5  ;;  %v1612_v45 = vadd.f32 %v1548_v11, %v8952_v59  ;;  %v2763_v61 = vsel %vm2635_vm7, %v2699_v58, 0.0  ;;  %3778 = vmatmul.mubr.f32.gmra.mxu0 %v3431_v43  ;;  %v10402_v11 = vld [vmem:[#allocation137_spill] sm:$0xff] }
 0x3f3   : > { %v2764_v20 = vsel %vm2636_vm8, %v2699_v58, 0.0  ;;  %v1613_v33 = vadd.f32 %v1549_v57, %v8959_v50  ;;  %v1614_v6 = vadd.f32 %v1550_v21, %v8962_v51  ;;  %v1615_v46 = vadd.f32 %v1551_v15, %v8965_v8  ;;  %v10399_v50 = vld [vmem:[#allocation144_spill] sm:$0xff] }
 0x3f4   : > { %v1616_v56 = vadd.f32 %v1552_v60, %v8968_v13  ;;  %v1913_v0 = vadd.f32 %v1849_v2, %v1609_v48  ;;  %v1914_v52 = vadd.f32 %v1850_v53, %v1610_v19  ;;  %v1915_v49 = vadd.f32 %v1851_v37, %v1611_v36  ;;  %v2879_v60 = vpop.permute.xlu1 %2878 }
 0x3f5   : > { %v1916_v40 = vadd.f32 %v1852_v34, %v1612_v45  ;;  %v1853_v5 = vsel %vm1725_vm6, %v10398_v38, 0.0  ;;  %v1854_v59 = vsel %vm1726_vm14, %v10398_v38, 0.0  ;;  %v2155_v51 = vsel %vm2027_vm10, %v10399_v50, 0.0 }
 0x3f6   : > { %v2156_v8 = vsel %vm2028_vm13, %v10399_v50, 0.0  ;;  %v2153_v13 = vsel %vm2025_vm4, %v10399_v50, 0.0  ;;  %v2154_v32 = vsel %vm2026_vm3, %v10399_v50, 0.0  ;;  %vm2331_vm0 = vcmp.eq.s32.totalorder %v6175_v55, %v10400_v62  ;;  %v10405_v50 = vld [vmem:[#allocation177_spill] sm:$0xff] }
 0x3f7   : > { %vm2332_vm5 = vcmp.eq.s32.totalorder %v6178_v28, %v10400_v62  ;;  %vm2031_vm6 = vcmp.eq.s32.totalorder %v6175_v55, %v10396_v10  ;;  %vm2032_vm14 = vcmp.eq.s32.totalorder %v6178_v28, %v10396_v10  ;;  %vm2329_vm10 = vcmp.eq.s32.totalorder %v5101_v3, %v10400_v62 }
 0x3f8   : > { %vm2330_vm13 = vcmp.eq.s32.totalorder %v6170_v14, %v10400_v62  ;;  %v2459_v54 = vsel %vm2331_vm0, %v10401_v18, 0.0  ;;  %v2460_v7 = vsel %vm2332_vm5, %v10401_v18, 0.0  ;;  %v2219_v29 = vadd.f32 %v2155_v51, %v1915_v49  ;;  %v3003_v23 = vpop.permute.xlu1 %3002 }
 0x3f9   : > { %v2220_v57 = vadd.f32 %v2156_v8, %v1916_v40  ;;  %v2457_v21 = vsel %vm2329_vm10, %v10401_v18, 0.0  ;;  %v2458_v15 = vsel %vm2330_vm13, %v10401_v18, 0.0  ;;  %v1855_v26 = vsel %vm1727_vm11, %v10398_v38, 0.0  ;;  %v10403_v40 = vld [vmem:[#allocation175_spill] sm:$0xff]  ;;  %v10406_v8 = vld [vmem:[#allocation178_spill] sm:$0xff] }
 0x3fa   : > { %v1856_v1 = vsel %vm1728_vm2, %v10398_v38, 0.0  ;;  %v2217_v63 = vadd.f32 %v2153_v13, %v1913_v0  ;;  %v2218_v27 = vadd.f32 %v2154_v32, %v1914_v52  ;;  %v2157_v42 = vsel %vm2029_vm15, %v10402_v11, 0.0  ;;  %v10407_v32 = vld [vmem:[#allocation125_spill] sm:$0xff] }
 0x3fb   : > { %v2158_v31 = vsel %vm2030_vm9, %v10402_v11, 0.0  ;;  %v2523_v25 = vadd.f32 %v2459_v54, %v2219_v29  ;;  %v2524_v24 = vadd.f32 %v2460_v7, %v2220_v57  ;;  %vm2633_vm4 = vcmp.eq.s32.totalorder %v5101_v3, %v10397_v17 }
 0x3fc   : > { %vm2634_vm3 = vcmp.eq.s32.totalorder %v6170_v14, %v10397_v17  ;;  %v2521_v22 = vadd.f32 %v2457_v21, %v2217_v63  ;;  %v2522_v12 = vadd.f32 %v2458_v15, %v2218_v27  ;;  %vm2939_vm1 = vcmp.eq.s32.totalorder %v6175_v55, %v2879_v60 }
 0x3fd   : > { %v2827_v47 = vadd.f32 %v2763_v61, %v2523_v25  ;;  %v2828_v44 = vadd.f32 %v2764_v20, %v2524_v24  ;;  %vm2940_vm12 = vcmp.eq.s32.totalorder %v6178_v28, %v2879_v60  ;;  %v2761_v9 = vsel %vm2633_vm4, %v2699_v58, 0.0  ;;  %v9136_v61 = vpop.permute.xlu1 %3182  ;;  %v9138_v20 = vpop.permute.xlu0 %3306 }
 0x3fe   : > { %v2762_v16 = vsel %vm2634_vm3, %v2699_v58, 0.0  ;;  %v3067_v4 = vsel %vm2939_vm1, %v3003_v23, 0.0  ;;  %v3068_v30 = vsel %vm2940_vm12, %v3003_v23, 0.0  ;;  %vm2937_vm11 = vcmp.eq.s32.totalorder %v5101_v3, %v2879_v60 }
 0x3ff   : > { %vm2938_vm2 = vcmp.eq.s32.totalorder %v6170_v14, %v2879_v60  ;;  %v9124_v35 = vadd.f32 %v3067_v4, %v2827_v47  ;;  %v9126_v39 = vadd.f32 %v3068_v30, %v2828_v44  ;;  %v1917_v43 = vadd.f32 %v1853_v5, %v1613_v33  ;;  %v10404_v5 = vld [vmem:[#allocation176_spill] sm:$0xff]  ;;  %v10412_v4 = vld [vmem:[#allocation63_spill] sm:$0xff] }
 0x400   : > { %v1918_v48 = vadd.f32 %v1854_v59, %v1614_v6  ;;  %v3065_v19 = vsel %vm2937_vm11, %v3003_v23, 0.0  ;;  %v3066_v41 = vsel %vm2938_vm2, %v3003_v23, 0.0  ;;  %v2159_v2 = vsel %vm2031_vm6, %v10402_v11, 0.0  ;;  %v10411_v23 = vld [vmem:[#allocation60_spill] sm:$0xff]  ;;  %v10413_v30 = vld [vmem:[#allocation75_spill] sm:$0xff] }
 0x401   : > { %v2160_v53 = vsel %vm2032_vm14, %v10402_v11, 0.0  ;;  %v2825_v37 = vadd.f32 %v2761_v9, %v2521_v22  ;;  %v2826_v34 = vadd.f32 %v2762_v16, %v2522_v12  ;;  %v1919_v17 = vadd.f32 %v1855_v26, %v1615_v46  ;;  %v2703_v62 = vpop.permute.xlu1 %2702  ;;  %v10408_v11 = vld [vmem:[#allocation34_spill] sm:$0xff]  ;;  %v9186_v24 = vpop.permute.xlu0 %3310 }
 0x402   : > { %v1920_v58 = vadd.f32 %v1856_v1, %v1616_v56  ;;  %v2221_v36 = vadd.f32 %v2157_v42, %v1917_v43  ;;  %v2222_v45 = vadd.f32 %v2158_v31, %v1918_v48  ;;  %vm3241_vm15 = vcmp.eq.s32.totalorder %v5101_v3, %v9136_v61  ;;  %v10409_v42 = vld [vmem:[#allocation22_spill] sm:$0xff]  ;;  %v10410_v31 = vld [vmem:[#allocation39_spill] sm:$0xff]  ;;  %v10414_v43 = vld [vmem:[#allocation85_spill] sm:$0xff] }
 0x403   : > { %vm3242_vm9 = vcmp.eq.s32.totalorder %v6170_v14, %v9136_v61  ;;  %v3130_v33 = vadd.f32 %v3066_v41, %v2826_v34  ;;  %v3129_v6 = vadd.f32 %v3065_v19, %v2825_v37  ;;  %v2223_v10 = vadd.f32 %v2159_v2, %v1919_v17  ;;  %v10415_v19 = vld [vmem:[#allocation79_spill] sm:$0xff]  ;;  %v10416_v41 = vld [vmem:[#allocation94_spill] sm:$0xff] }
 0x404   : > { %v2224_v0 = vadd.f32 %v2160_v53, %v1920_v58  ;;  %v3370_v52 = vsel %vm3242_vm9, %v9138_v20, 0.0  ;;  %v3369_v46 = vsel %vm3241_vm15, %v9138_v20, 0.0  ;;  %v2525_v38 = vadd.f32 %v10403_v40, %v2221_v36  ;;  %v10417_v37 = vld [vmem:[#allocation114_spill] sm:$0xff]  ;;  %v10418_v58 = vld [vmem:[#allocation107_spill] sm:$0xff] }
 0x405   : > { %v3434_v56 = vadd.f32 %v3370_v52, %v3130_v33  ;;  %v3433_v49 = vadd.f32 %v3369_v46, %v3129_v6  ;;  %v2526_v59 = vadd.f32 %v10404_v5, %v2222_v45  ;;  %v2527_v51 = vadd.f32 %v10405_v50, %v2223_v10  ;;  %v9162_v26 = vpop.permute.xlu1 %2881  ;;  %v10419_v10 = vld [vmem:[#allocation99_spill] sm:$0xff] }
 0x406   : > { %v2528_v13 = vadd.f32 %v10406_v8, %v2224_v0  ;;  %vm2637_vm7 = vcmp.eq.s32.totalorder %v5101_v3, %v10407_v32  ;;  %vm2638_vm8 = vcmp.eq.s32.totalorder %v6170_v14, %v10407_v32  ;;  %vm2639_vm0 = vcmp.eq.s32.totalorder %v6175_v55, %v10407_v32  ;;  %v10420_v46 = vld [vmem:[#allocation123_spill] sm:$0xff] }
 0x407   : > { %vm2640_vm5 = vcmp.eq.s32.totalorder %v6178_v28, %v10407_v32  ;;  %3637 = vmatprep.mubr.f32.mxu1 %v3434_v56  ;;  %v2765_v18 = vsel %vm2637_vm7, %v2703_v62, 0.0  ;;  %v2766_v54 = vsel %vm2638_vm8, %v2703_v62, 0.0  ;;  %v2767_v7 = vsel %vm2639_vm0, %v2703_v62, 0.0 }
 0x408   : > { %v2768_v29 = vsel %vm2640_vm5, %v2703_v62, 0.0  ;;  %3638 = vmatmul.mubr.f32.gmra.mxu1 %v3433_v49  ;;  %v2829_v57 = vadd.f32 %v2765_v18, %v2525_v38  ;;  %v2830_v21 = vadd.f32 %v2766_v54, %v2526_v59  ;;  %v9158_v15 = vadd.f32 %v2767_v7, %v2527_v51  ;;  %v10421_v54 = vld [vmem:[#allocation146_spill] sm:$0xff] }
 0x409   : > { %v9160_v60 = vadd.f32 %v2768_v29, %v2528_v13  ;;  %v9164_v1 = vpop.permute.xlu1 %3006  ;;  %vm2941_vm6 = vcmp.eq.s32.totalorder %v5101_v3, %v9162_v26  ;;  %vm2942_vm14 = vcmp.eq.s32.totalorder %v6170_v14, %v9162_v26  ;;  %vm1425_vm10 = vcmp.eq.s32.totalorder %v5101_v3, %v10408_v11 }
 0x40a   : > { %v3069_v63 = vsel %vm2941_vm6, %v9164_v1, 0.0  ;;  %v3070_v27 = vsel %vm2942_vm14, %v9164_v1, 0.0  ;;  %vm1426_vm13 = vcmp.eq.s32.totalorder %v6170_v14, %v10408_v11  ;;  %vm1105_vm4 = vcmp.eq.s32.totalorder %v5101_v3, %v10409_v42 }
 0x40b   : > { %vm1106_vm3 = vcmp.eq.s32.totalorder %v6170_v14, %v10409_v42  ;;  %vm1429_vm1 = vcmp.eq.s32.totalorder %v5101_v3, %v10410_v31  ;;  %vm1430_vm12 = vcmp.eq.s32.totalorder %v6170_v14, %v10410_v31  ;;  %v3134_v22 = vadd.f32 %v3070_v27, %v2830_v21  ;;  %v10427_v27 = vld [vmem:[#allocation153_spill] sm:$0xff] }
 0x40c   : > { %v3133_v12 = vadd.f32 %v3069_v63, %v2829_v57  ;;  %vm1431_vm15 = vcmp.eq.s32.totalorder %v6175_v55, %v10410_v31  ;;  %vm1432_vm9 = vcmp.eq.s32.totalorder %v6178_v28, %v10410_v31  ;;  %vm1729_vm6 = vcmp.eq.s32.totalorder %v5101_v3, %v10412_v4  ;;  %v10424_v57 = vld [vmem:[#allocation130_spill] sm:$0xff] }
 0x40d   : > { %v9184_v25 = vpop.permute.xlu1 %3185  ;;  %vm1730_vm14 = vcmp.eq.s32.totalorder %v6170_v14, %v10412_v4  ;;  %vm1109_vm8 = vcmp.eq.s32.totalorder %v5101_v3, %v10414_v43  ;;  %vm1110_vm0 = vcmp.eq.s32.totalorder %v6170_v14, %v10414_v43  ;;  %vm1111_vm5 = vcmp.eq.s32.totalorder %v6175_v55, %v10414_v43 }
 0x40e   : > { %vm3245_vm11 = vcmp.eq.s32.totalorder %v5101_v3, %v9184_v25  ;;  %vm3246_vm2 = vcmp.eq.s32.totalorder %v6170_v14, %v9184_v25  ;;  %vm1112_vm7 = vcmp.eq.s32.totalorder %v6178_v28, %v10414_v43  ;;  %v1249_v2 = vsel %vm1105_vm4, %v10416_v41, 0.0  ;;  %v10431_v43 = vld [vmem:[#allocation127_spill] sm:$0xff] }
 0x40f   : > { %v3374_v47 = vsel %vm3246_vm2, %v9186_v24, 0.0  ;;  %v3373_v44 = vsel %vm3245_vm11, %v9186_v24, 0.0  ;;  %vm2037_vm11 = vcmp.eq.s32.totalorder %v5101_v3, %v10415_v19  ;;  %vm2038_vm2 = vcmp.eq.s32.totalorder %v6170_v14, %v10415_v19 }
 0x410   : > { %v3438_v9 = vadd.f32 %v3374_v47, %v3134_v22  ;;  %v3437_v16 = vadd.f32 %v3373_v44, %v3133_v12  ;;  %v1250_v53 = vsel %vm1106_vm3, %v10416_v41, 0.0  ;;  %v1553_v34 = vsel %vm1425_vm10, %v10417_v37, 0.0  ;;  %v10430_v12 = vld [vmem:[#allocation166_spill] sm:$0xff] }
 0x411   : > { %v9222_v48 = vpop.permute.xlu1 %2706  ;;  %v1554_v17 = vsel %vm1426_vm13, %v10417_v37, 0.0  ;;  %v1557_v36 = vsel %vm1429_vm1, %v10418_v58, 0.0  ;;  %v1558_v45 = vsel %vm1430_vm12, %v10418_v58, 0.0  ;;  %v1559_v33 = vsel %vm1431_vm15, %v10418_v58, 0.0 }
 0x412   : > { %3642 = vmatprep.mubr.f32.mxu1 %v3438_v9  ;;  %v1560_v6 = vsel %vm1432_vm9, %v10418_v58, 0.0  ;;  %v1253_v0 = vsel %vm1109_vm8, %v10419_v10, 0.0  ;;  %v1254_v52 = vsel %vm1110_vm0, %v10419_v10, 0.0  ;;  %v1857_v56 = vsel %vm1729_vm6, %v10420_v46, 0.0 }
 0x413   : > { %3643 = vmatmul.mubr.f32.gmra.mxu1 %v3437_v16  ;;  %v1858_v49 = vsel %vm1730_vm14, %v10420_v46, 0.0  ;;  %vm2039_vm10 = vcmp.eq.s32.totalorder %v6175_v55, %v10415_v19  ;;  %vm2040_vm13 = vcmp.eq.s32.totalorder %v6178_v28, %v10415_v19  ;;  %v1255_v40 = vsel %vm1111_vm5, %v10419_v10, 0.0 }
 0x414   : > { %v1256_v38 = vsel %vm1112_vm7, %v10419_v10, 0.0  ;;  %v1617_v5 = vadd.f32 %v1553_v34, %v1249_v2  ;;  %v1618_v59 = vadd.f32 %v1554_v17, %v1250_v53  ;;  %v1621_v50 = vadd.f32 %v1557_v36, %v1253_v0  ;;  %v10432_v53 = vld [vmem:[#allocation139_spill] sm:$0xff] }
 0x415   : > { %v1622_v51 = vadd.f32 %v1558_v45, %v1254_v52  ;;  %v1623_v8 = vadd.f32 %v1559_v33, %v1255_v40  ;;  %v1624_v13 = vadd.f32 %v1560_v6, %v1256_v38  ;;  %v9288_v32 = vpop.permute.xlu1 %2884  ;;  %vm10422_vm4 = vcmp.eq.s32.totalorder %v5101_v3, %v10413_v30 }
 0x416   : > { %v1921_v62 = vadd.f32 %v1857_v56, %v1617_v5  ;;  %v1922_v18 = vadd.f32 %v1858_v49, %v1618_v59  ;;  %v2161_v7 = vsel %vm10422_vm4, %v10421_v54, 0.0  ;;  %vm10423_vm3 = vcmp.eq.s32.totalorder %v6170_v14, %v10413_v30 }
 0x417   : > { %v2162_v29 = vsel %vm10423_vm3, %v10421_v54, 0.0  ;;  %vm10425_vm1 = vcmp.eq.s32.totalorder %v5101_v3, %v10411_v23  ;;  %vm10426_vm12 = vcmp.eq.s32.totalorder %v6170_v14, %v10411_v23  ;;  %vm2337_vm15 = vcmp.eq.s32.totalorder %v5101_v3, %v10427_v27 }
 0x418   : > { %v1861_v21 = vsel %vm10425_vm1, %v10424_v57, 0.0  ;;  %v1862_v63 = vsel %vm10426_vm12, %v10424_v57, 0.0  ;;  %vm2338_vm9 = vcmp.eq.s32.totalorder %v6170_v14, %v10427_v27  ;;  %vm1427_vm7 = vcmp.eq.s32.totalorder %v6175_v55, %v10408_v11 }
 0x419   : > { %vm1428_vm8 = vcmp.eq.s32.totalorder %v6178_v28, %v10408_v11  ;;  %vm10428_vm0 = vcmp.eq.s32.totalorder %v6175_v55, %v10411_v23  ;;  %vm10429_vm5 = vcmp.eq.s32.totalorder %v6178_v28, %v10411_v23  ;;  %v2465_v47 = vsel %vm2337_vm15, %v10430_v12, 0.0 }
 0x41a   : > { %v1863_v31 = vsel %vm10428_vm0, %v10424_v57, 0.0  ;;  %v1864_v22 = vsel %vm10429_vm5, %v10424_v57, 0.0  ;;  %v2466_v44 = vsel %vm2338_vm9, %v10430_v12, 0.0  ;;  %v2225_v9 = vadd.f32 %v2161_v7, %v1921_v62  ;;  %v9356_v62 = vpop.permute.xlu0 %3314 }
 0x41b   : > { %v2226_v16 = vadd.f32 %v2162_v29, %v1922_v18  ;;  %vm2641_vm6 = vcmp.eq.s32.totalorder %v5101_v3, %v10431_v43  ;;  %vm2642_vm14 = vcmp.eq.s32.totalorder %v6170_v14, %v10431_v43  ;;  %v9328_v2 = vpop.permute.xlu1 %3010  ;;  %v2165_v23 = vsel %vm2037_vm11, %v10432_v53, 0.0 }
 0x41c   : > { %v2166_v34 = vsel %vm2038_vm2, %v10432_v53, 0.0  ;;  %v2769_v17 = vsel %vm2641_vm6, %v9222_v48, 0.0  ;;  %v2770_v58 = vsel %vm2642_vm14, %v9222_v48, 0.0  ;;  %v2529_v36 = vadd.f32 %v2465_v47, %v2225_v9 }
 0x41d   : > { %v2530_v45 = vadd.f32 %v2466_v44, %v2226_v16  ;;  %vm2945_vm4 = vcmp.eq.s32.totalorder %v5101_v3, %v9288_v32  ;;  %vm2946_vm3 = vcmp.eq.s32.totalorder %v6170_v14, %v9288_v32  ;;  %v1925_v33 = vadd.f32 %v1861_v21, %v1621_v50  ;;  %v10434_v44 = vld [vmem:[#allocation102_spill] sm:$0xff]  ;;  %v10435_v16 = vld [vmem:[#allocation104_spill] sm:$0xff] }
 0x41e   : > { %v1926_v6 = vadd.f32 %v1862_v63, %v1622_v51  ;;  %v3073_v10 = vsel %vm2945_vm4, %v9328_v2, 0.0  ;;  %v3074_v0 = vsel %vm2946_vm3, %v9328_v2, 0.0  ;;  %v2167_v52 = vsel %vm2039_vm10, %v10432_v53, 0.0 }
 0x41f   : > { %v2168_v56 = vsel %vm2040_vm13, %v10432_v53, 0.0  ;;  %v2833_v49 = vadd.f32 %v2769_v17, %v2529_v36  ;;  %v2834_v40 = vadd.f32 %v2770_v58, %v2530_v45  ;;  %v1927_v38 = vadd.f32 %v1863_v31, %v1623_v8  ;;  %v10437_v17 = vld [vmem:[#allocation132_spill] sm:$0xff] }
 0x420   : > { %v1928_v5 = vadd.f32 %v1864_v22, %v1624_v13  ;;  %v2229_v59 = vadd.f32 %v2165_v23, %v1925_v33  ;;  %v2230_v50 = vadd.f32 %v2166_v34, %v1926_v6  ;;  %v9354_v51 = vpop.permute.xlu1 %3188  ;;  %v1555_v13 = vsel %vm1427_vm7, %v10417_v37, 0.0  ;;  %v10433_v22 = vld [vmem:[#allocation49_spill] sm:$0xff]  ;;  %v10436_v23 = vld [vmem:[#allocation43_spill] sm:$0xff] }
 0x421   : > { %vm3249_vm11 = vcmp.eq.s32.totalorder %v5101_v3, %v9354_v51  ;;  %vm3250_vm2 = vcmp.eq.s32.totalorder %v6170_v14, %v9354_v51  ;;  %v3138_v18 = vadd.f32 %v3074_v0, %v2834_v40  ;;  %v3137_v7 = vadd.f32 %v3073_v10, %v2833_v49 }
 0x422   : > { %v2231_v19 = vadd.f32 %v2167_v52, %v1927_v38  ;;  %v2232_v29 = vadd.f32 %v2168_v56, %v1928_v5  ;;  %v3378_v57 = vsel %vm3250_vm2, %v9356_v62, 0.0  ;;  %v3377_v8 = vsel %vm3249_vm11, %v9356_v62, 0.0 }
 0x423   : > { %v1556_v21 = vsel %vm1428_vm8, %v10417_v37, 0.0  ;;  %v3442_v63 = vadd.f32 %v3378_v57, %v3138_v18  ;;  %v3441_v31 = vadd.f32 %v3377_v8, %v3137_v7  ;;  %v2533_v47 = vadd.f32 %v10433_v22, %v2229_v59  ;;  %v4176_v18 = vpop.f32.mrf.mxu1 }
 0x424   : > { %v2534_v9 = vadd.f32 %v10434_v44, %v2230_v50  ;;  %v2535_v53 = vadd.f32 %v10435_v16, %v2231_v19  ;;  %v2536_v34 = vadd.f32 %v10436_v23, %v2232_v29  ;;  %vm2645_vm10 = vcmp.eq.s32.totalorder %v5101_v3, %v10437_v17  ;;  %v4256_v7 = vpop.f32.mrf.mxu0 }
 0x425   : > { %vm2646_vm13 = vcmp.eq.s32.totalorder %v6170_v14, %v10437_v17  ;;  %vm2647_vm1 = vcmp.eq.s32.totalorder %v6175_v55, %v10437_v17  ;;  %vm2648_vm12 = vcmp.eq.s32.totalorder %v6178_v28, %v10437_v17  ;;  %v2711_v11 = vpop.permute.xlu1 %2710  ;;  %3647 = vmatprep.mubr.f32.mxu1 %v3442_v63  ;;  %vm1107_vm15 = vcmp.eq.s32.totalorder %v6175_v55, %v10409_v42 }
 0x426   : > { %v2773_v37 = vsel %vm2645_vm10, %v2711_v11, 0.0  ;;  %v2774_v58 = vsel %vm2646_vm13, %v2711_v11, 0.0  ;;  %v2775_v36 = vsel %vm2647_vm1, %v2711_v11, 0.0  ;;  %v2776_v45 = vsel %vm2648_vm12, %v2711_v11, 0.0  ;;  %3648 = vmatmul.mubr.f32.gmra.mxu1 %v3441_v31 }
 0x427   : > { %v2837_v33 = vadd.f32 %v2773_v37, %v2533_v47  ;;  %v2838_v6 = vadd.f32 %v2774_v58, %v2534_v9  ;;  %v9384_v10 = vadd.f32 %v2775_v36, %v2535_v53  ;;  %v9386_v0 = vadd.f32 %v2776_v45, %v2536_v34  ;;  %v9435_v47 = vld [vmem:[%s9664_s5] ss:$0 sm:$0xff]  ;;  %v9446_v53 = vld [vmem:[%s9664_s5 + $0x1] ss:$0 sm:$0xff] }
 0x428   : > { %vm1108_vm9 = vcmp.eq.s32.totalorder %v6178_v28, %v10409_v42  ;;  %vm1731_vm7 = vcmp.eq.s32.totalorder %v6175_v55, %v10412_v4  ;;  %vm1732_vm8 = vcmp.eq.s32.totalorder %v6178_v28, %v10412_v4  ;;  %v1251_v52 = vsel %vm1107_vm15, %v10416_v41, 0.0 }
 0x429   : > { %v1252_v56 = vsel %vm1108_vm9, %v10416_v41, 0.0  ;;  %v1859_v49 = vsel %vm1731_vm7, %v10420_v46, 0.0  ;;  %v1860_v40 = vsel %vm1732_vm8, %v10420_v46, 0.0  ;;  %vm2035_vm0 = vcmp.eq.s32.totalorder %v6175_v55, %v10413_v30  ;;  %v9412_v46 = vpop.permute.xlu0 %3191 }
 0x42a   : > { %vm2036_vm5 = vcmp.eq.s32.totalorder %v6178_v28, %v10413_v30  ;;  %v1619_v42 = vadd.f32 %v1555_v13, %v1251_v52  ;;  %v1620_v38 = vadd.f32 %v1556_v21, %v1252_v56  ;;  %v9404_v5 = vpop.permute.xlu1 %2887  ;;  %v2163_v4 = vsel %vm2035_vm0, %v10421_v54, 0.0 }
 0x42b   : > { %v2164_v59 = vsel %vm2036_vm5, %v10421_v54, 0.0  ;;  %vm2339_vm6 = vcmp.eq.s32.totalorder %v6175_v55, %v10427_v27  ;;  %vm2340_vm14 = vcmp.eq.s32.totalorder %v6178_v28, %v10427_v27  ;;  %v4177_v54 = vpop.f32.mrf.mxu1  ;;  %vm3243_vm4 = vcmp.eq.s32.totalorder %v6175_v55, %v9136_v61  ;;  %v4257_v27 = vpop.f32.mrf.mxu0 }
 0x42c   : > { %v1923_v50 = vadd.f32 %v1859_v49, %v1619_v42  ;;  %v1924_v41 = vadd.f32 %v1860_v40, %v1620_v38  ;;  %v2467_v29 = vsel %vm2339_vm6, %v10430_v12, 0.0  ;;  %v2468_v57 = vsel %vm2340_vm14, %v10430_v12, 0.0 }
 0x42d   : > { %vm3244_vm3 = vcmp.eq.s32.totalorder %v6178_v28, %v9136_v61  ;;  %vm2949_vm11 = vcmp.eq.s32.totalorder %v5101_v3, %v9404_v5  ;;  %vm2950_vm2 = vcmp.eq.s32.totalorder %v6170_v14, %v9404_v5  ;;  %v4178_v21 = vadd.f32 %v4177_v54, %v4176_v18 }
 0x42e   : > { %v2227_v30 = vadd.f32 %v2163_v4, %v1923_v50  ;;  %v2228_v19 = vadd.f32 %v2164_v59, %v1924_v41  ;;  %v4258_v63 = vadd.f32 %v4257_v27, %v4256_v7  ;;  %vm3253_vm10 = vcmp.eq.s32.totalorder %v5101_v3, %v9412_v46  ;;  %v4179_v61 = vpop.f32.mrf.mxu1 }
 0x42f   : > { %v9416_v8 = vpop.permute.xlu1 %3014  ;;  %vm3254_vm13 = vcmp.eq.s32.totalorder %v6170_v14, %v9412_v46  ;;  %v3371_v44 = vsel %vm3243_vm4, %v9138_v20, 0.0  ;;  %vm2944_vm1 = vcmp.eq.s32.totalorder %v6178_v28, %v9162_v26  ;;  %v3372_v14 = vsel %vm3244_vm3, %v9138_v20, 0.0  ;;  %v4259_v20 = vpop.f32.mrf.mxu0 }
 0x430   : > { %v3077_v13 = vsel %vm2949_vm11, %v9416_v8, 0.0  ;;  %v3078_v12 = vsel %vm2950_vm2, %v9416_v8, 0.0  ;;  %v9430_v31 = vadd.f32 %v2467_v29, %v2227_v30  ;;  %v2532_v22 = vadd.f32 %v2468_v57, %v2228_v19  ;;  %v4180_v52 = vpop.f32.mrf.mxu1 }
 0x431   : > { %v3725_v9 = vadd.f32 %v4258_v63, %v4178_v21  ;;  %v3072_v16 = vsel %vm2944_vm1, %v9164_v1, 0.0  ;;  %v3142_v34 = vadd.f32 %v3078_v12, %v2838_v6  ;;  %v3141_v17 = vadd.f32 %v3077_v13, %v2837_v33  ;;  %v4260_v56 = vpop.f32.mrf.mxu0 }
 0x432   : > { %vm3248_vm12 = vcmp.eq.s32.totalorder %v6178_v28, %v9184_v25  ;;  %vm2643_vm15 = vcmp.eq.s32.totalorder %v6175_v55, %v10431_v43  ;;  %vm2943_vm9 = vcmp.eq.s32.totalorder %v6175_v55, %v9162_v26  ;;  %vm2644_vm7 = vcmp.eq.s32.totalorder %v6178_v28, %v10431_v43 }
 0x433   : > { %v3808_v11 = vmul.f32 %v9435_v47, %v3725_v9  ;;  %v3071_v33 = vsel %vm2943_vm9, %v9164_v1, 0.0  ;;  %vm3247_vm8 = vcmp.eq.s32.totalorder %v6175_v55, %v9184_v25  ;;  %v3435_v6 = vadd.f32 %v3371_v44, %v9124_v35  ;;  %v4182_v35 = vpop.f32.mrf.mxu1 }
 0x434   : > { %v9448_v23 = vpop.permute.xlu1 %3318  ;;  %v3436_v26 = vadd.f32 %v3372_v14, %v9126_v39  ;;  %v3136_v49 = vadd.f32 %v3072_v16, %v9160_v60  ;;  %v3376_v40 = vsel %vm3248_vm12, %v9186_v24, 0.0  ;;  %v2772_v1 = vsel %vm2644_vm7, %v9222_v48, 0.0  ;;  %v4262_v39 = vpop.f32.mrf.mxu0 }
 0x435   : > { %v3381_v37 = vsel %vm3253_vm10, %v9448_v23, 0.0  ;;  %v3382_v58 = vsel %vm3254_vm13, %v9448_v23, 0.0  ;;  %v3829_v3 = vadd.f32 %v9446_v53, %v3808_v11  ;;  %v4181_v38 = vadd.f32 %v4180_v52, %v4179_v61  ;;  %v4183_v25 = vpop.f32.mrf.mxu1 }
 0x436   : > { %v3446_v36 = vadd.f32 %v3382_v58, %v3142_v34  ;;  %v3445_v45 = vadd.f32 %v3381_v37, %v3141_v17  ;;  %v4261_v4 = vadd.f32 %v4260_v56, %v4259_v20  ;;  %vm2948_vm0 = vcmp.eq.s32.totalorder %v6178_v28, %v9288_v32 }
 0x437   : > { %v3845_v42 = vmax.f32 %v3829_v3, 0.0  ;;  %vm3252_vm5 = vcmp.eq.s32.totalorder %v6178_v28, %v9354_v51  ;;  %v3135_v60 = vadd.f32 %v3071_v33, %v9158_v15  ;;  %v3375_v59 = vsel %vm3247_vm8, %v9186_v24, 0.0  ;;  %v4263_v24 = vpop.f32.mrf.mxu0 }
 0x438   : > { %3652 = vmatprep.mubr.f32.mxu1 %v3446_v36  ;;  %v2771_v50 = vsel %vm2643_vm15, %v9222_v48, 0.0  ;;  %vm2947_vm6 = vcmp.eq.s32.totalorder %v6175_v55, %v9288_v32  ;;  %v3076_v41 = vsel %vm2948_vm0, %v9328_v2, 0.0  ;;  %v3730_v15 = vadd.f32 %v4261_v4, %v4181_v38 }
 0x439   : > { %3653 = vmatmul.mubr.f32.gmra.mxu1 %v3445_v45  ;;  %3861 = vst [vmem:[%s9497_s12] sm:$0xff] %v3845_v42  ;;  %v2836_v18 = vadd.f32 %v2772_v1, %v2532_v22  ;;  %v3075_v7 = vsel %vm2947_vm6, %v9328_v2, 0.0  ;;  %vm3251_vm14 = vcmp.eq.s32.totalorder %v6175_v55, %v9354_v51  ;;  %v3440_v43 = vadd.f32 %v3376_v40, %v3136_v49 }
 0x43a   : > { %3782 = vmatprep.mubr.f32.mxu1 %v3436_v26  ;;  %v3809_v48 = vmul.f32 %v9435_v47, %v3730_v15  ;;  %v4184_v30 = vadd.f32 %v4183_v25, %v4182_v35  ;;  %v4264_v32 = vadd.f32 %v4263_v24, %v4262_v39  ;;  %v3380_v19 = vsel %vm3252_vm5, %v9356_v62, 0.0 }
 0x43b   : > { %v2835_v29 = vadd.f32 %v2771_v50, %v9430_v31  ;;  %vm2952_vm4 = vcmp.eq.s32.totalorder %v6178_v28, %v9404_v5  ;;  %v3140_v2 = vadd.f32 %v3076_v41, %v2836_v18  ;;  %v3439_v13 = vadd.f32 %v3375_v59, %v3135_v60  ;;  %v4185_v9 = vpop.f32.mrf.mxu1 }
 0x43c   : > { %v3080_v57 = vsel %vm2952_vm4, %v9416_v8, 0.0  ;;  %v3830_v54 = vadd.f32 %v9446_v53, %v3809_v48  ;;  %v3735_v27 = vadd.f32 %v4264_v32, %v4184_v30  ;;  %vm3256_vm3 = vcmp.eq.s32.totalorder %v6178_v28, %v9412_v46  ;;  %v4265_v28 = vpop.f32.mrf.mxu0 }
 0x43d   : > { %3783 = vmatmul.mubr.f32.vlgmr.msra.gmra.mxu1 %v3435_v6  ;;  %v3444_v12 = vadd.f32 %v3380_v19, %v3140_v2  ;;  %v3139_v21 = vadd.f32 %v3075_v7, %v2835_v29  ;;  %v3379_v63 = vsel %vm3251_vm14, %v9356_v62, 0.0  ;;  %vm2951_vm11 = vcmp.eq.s32.totalorder %v6175_v55, %v9404_v5  ;;  %v4186_v62 = vpop.f32.mrf.mxu1 }
 0x43e   : > { %3787 = vmatprep.mubr.f32.mxu1 %v3440_v43  ;;  %v3384_v31 = vsel %vm3256_vm3, %v9448_v23, 0.0  ;;  %v3846_v22 = vmax.f32 %v3830_v54, 0.0  ;;  %v3810_v44 = vmul.f32 %v9435_v47, %v3735_v27  ;;  %v3079_v16 = vsel %vm2951_vm11, %v9416_v8, 0.0  ;;  %v4266_v11 = vpop.f32.mrf.mxu0 }
 0x43f   : > { %v3144_v34 = vadd.f32 %v3080_v57, %v9386_v0  ;;  %vm3255_vm2 = vcmp.eq.s32.totalorder %v6175_v55, %v9412_v46  ;;  %v3443_v5 = vadd.f32 %v3379_v63, %v3139_v21  ;;  %v4187_v14 = vadd.f32 %v4186_v62, %v4185_v9 }
 0x440   : > { %3862 = vst [vmem:[%s9497_s12 + $0x8] sm:$0xff] %v3846_v22  ;;  %v3831_v51 = vadd.f32 %v9446_v53, %v3810_v44  ;;  %v3383_v17 = vsel %vm3255_vm2, %v9448_v23, 0.0  ;;  %v4267_v8 = vadd.f32 %v4266_v11, %v4265_v28  ;;  %v3143_v61 = vadd.f32 %v3079_v16, %v9384_v10  ;;  %v4188_v0 = vpop.f32.mrf.mxu1 }
 0x441   : > { %3788 = vmatmul.mubr.f32.gmra.mxu1 %v3439_v13  ;;  %v3448_v37 = vadd.f32 %v3384_v31, %v3144_v34  ;;  %v4268_v20 = vpop.f32.mrf.mxu0 }
 0x442   : > { %3792 = vmatprep.mubr.f32.mxu1 %v3444_v12  ;;  %v3847_v58 = vmax.f32 %v3831_v51, 0.0  ;;  %v3740_v55 = vadd.f32 %v4267_v8, %v4187_v14  ;;  %v3447_v46 = vadd.f32 %v3383_v17, %v3143_v61  ;;  %v4189_v36 = vpop.f32.mrf.mxu1 }
 0x443   : > { %v4269_v45 = vpop.f32.mrf.mxu0  ;;  %v4190_v23 = vadd.f32 %v4189_v36, %v4188_v0 }
 0x444   : > { %3863 = vst [vmem:[%s9497_s12 + $0x10] sm:$0xff] %v3847_v58  ;;  %v3811_v33 = vmul.f32 %v9435_v47, %v3740_v55  ;;  %v4270_v3 = vadd.f32 %v4269_v45, %v4268_v20 }
 0x445   : > { %3793 = vmatmul.mubr.f32.gmra.mxu1 %v3443_v5 }
 0x446   : > { %3797 = vmatprep.mubr.f32.mxu1 %v3448_v37  ;;  %v3832_v6 = vadd.f32 %v9446_v53, %v3811_v33  ;;  %v3745_v52 = vadd.f32 %v4270_v3, %v4190_v23 }
 0x448   : > { %v3848_v56 = vmax.f32 %v3832_v6, 0.0  ;;  %v3812_v10 = vmul.f32 %v9435_v47, %v3745_v52 }
 0x449   : > { %3798 = vmatmul.mubr.f32.gmra.mxu1 %v3447_v46  ;;  %v4191_v26 = vpop.f32.mrf.mxu1  ;;  %v4271_v49 = vpop.f32.mrf.mxu0 }
 0x44a   : > { %3864 = vst [vmem:[%s9497_s12 + $0x18] sm:$0xff] %v3848_v56  ;;  %v3833_v40 = vadd.f32 %v9446_v53, %v3812_v10 }
 0x44b   : > { %v4192_v1 = vpop.f32.mrf.mxu1  ;;  %v4272_v42 = vpop.f32.mrf.mxu0 }
 0x44c   : > { %v4193_v38 = vadd.f32 %v4192_v1, %v4191_v26  ;;  %v4273_v4 = vadd.f32 %v4272_v42, %v4271_v49  ;;  %v3849_v35 = vmax.f32 %v3833_v40, 0.0 }
 0x44e   : > { %v3750_v39 = vadd.f32 %v4273_v4, %v4193_v38  ;;  %3865 = vst [vmem:[%s9497_s12 + $0x20] sm:$0xff] %v3849_v35 }
 0x44f   : > { %v4194_v60 = vpop.f32.mrf.mxu1 }
 0x450   : > { %v4274_v59 = vpop.f32.mrf.mxu0  ;;  %v3813_v50 = vmul.f32 %v9435_v47, %v3750_v39 }
 0x451   : > { %v4195_v41 = vpop.f32.mrf.mxu1 }
 0x452   : > { %v4196_v15 = vadd.f32 %v4195_v41, %v4194_v60  ;;  %v4275_v18 = vpop.f32.mrf.mxu0  ;;  %v3834_v7 = vadd.f32 %v9446_v53, %v3813_v50 }
 0x453   : > { %v4276_v25 = vadd.f32 %v4275_v18, %v4274_v59 }
 0x454   : > { %v3850_v24 = vmax.f32 %v3834_v7, 0.0 }
 0x455   : > { %v3755_v43 = vadd.f32 %v4276_v25, %v4196_v15 }
 0x456   : > { %3866 = vst [vmem:[%s9497_s12 + $0x28] sm:$0xff] %v3850_v24 }
 0x457   : > { %v3814_v48 = vmul.f32 %v9435_v47, %v3755_v43 }
 0x459   : > { %v3835_v30 = vadd.f32 %v9446_v53, %v3814_v48 }
 0x45b   : > { %v3851_v32 = vmax.f32 %v3835_v30, 0.0 }
 0x45d   : > { %3867 = vst [vmem:[%s9497_s12 + $0x30] sm:$0xff] %v3851_v32 }
 0x45f   : > { %v4197_v19 = vpop.f32.mrf.mxu1  ;;  %v4277_v29 = vpop.f32.mrf.mxu0 }
 0x461   : > { %v4198_v2 = vpop.f32.mrf.mxu1  ;;  %v4278_v57 = vpop.f32.mrf.mxu0 }
 0x462   : > { %v4199_v54 = vadd.f32 %v4198_v2, %v4197_v19  ;;  %v4279_v27 = vadd.f32 %v4278_v57, %v4277_v29 }
 0x464   : > { %v3760_v13 = vadd.f32 %v4279_v27, %v4199_v54 }
 0x466   : > { %v3815_v12 = vmul.f32 %v9435_v47, %v3760_v13 }
 0x468   : > { %v3836_v21 = vadd.f32 %v9446_v53, %v3815_v12 }
 0x46a   : > { %v3852_v63 = vmax.f32 %v3836_v21, 0.0 }
 0x46c   : > { %3868 = vst [vmem:[%s9497_s12 + $0x38] sm:$0xff] %v3852_v63 }
 0x473   : > { %v4200_v31 = vpop.f32.mrf.mxu1  ;;  %v4280_v22 = vpop.f32.mrf.mxu0 }
 0x475   : > { %v4201_v44 = vpop.f32.mrf.mxu1  ;;  %v4281_v9 = vpop.f32.mrf.mxu0 }
 0x476   : > { %v4202_v16 = vadd.f32 %v4201_v44, %v4200_v31  ;;  %v4282_v28 = vadd.f32 %v4281_v9, %v4280_v22 }
 0x478   : > { %v3765_v34 = vadd.f32 %v4282_v28, %v4202_v16 }
 0x47a   : > { %v3816_v51 = vmul.f32 %v9435_v47, %v3765_v34 }
 0x47c   : > { %v3837_v62 = vadd.f32 %v9446_v53, %v3816_v51 }
 0x47e   : > { %v3853_v5 = vmax.f32 %v3837_v62, 0.0 }
 0x480   : > { %3869 = vst [vmem:[%s9497_s12 + $0x40] sm:$0xff] %v3853_v5 }
 0x48a   : > { %v4203_v17 = vpop.f32.mrf.mxu1 }
 0x48b   : > { %v4283_v14 = vpop.f32.mrf.mxu0 }
 0x48c   : > { %v4204_v11 = vpop.f32.mrf.mxu1 }
 0x48d   : > { %v4284_v37 = vpop.f32.mrf.mxu0  ;;  %v4205_v58 = vadd.f32 %v4204_v11, %v4203_v17 }
 0x48e   : > { %v4285_v8 = vadd.f32 %v4284_v37, %v4283_v14 }
 0x490   : > { %v3770_v61 = vadd.f32 %v4285_v8, %v4205_v58 }
 0x492   : > { %v3817_v0 = vmul.f32 %v9435_v47, %v3770_v61 }
 0x494   : > { %v3838_v20 = vadd.f32 %v9446_v53, %v3817_v0 }
 0x496   : > { %v3854_v55 = vmax.f32 %v3838_v20, 0.0 }
 0x498   : > { %3870 = vst [vmem:[%s9497_s12 + $0x48] sm:$0xff] %v3854_v55 }
 0x49d   : > { %v4206_v46 = vpop.f32.mrf.mxu1  ;;  %v4286_v36 = vpop.f32.mrf.mxu0 }
 0x49e   : > { %4760 = shalt.err (!%p4757_p11)
}
 0x49f   : > { %s4761_s0 = scalar_lea.hbm %s9559_s9, 2048  ;;  %s4765_s18 = scalar_lea.hbm %s9665_s6, 8192 }
 0x4a0   : > { %p4762_p1 = scmp.ne.s32.totalorder %s9559_s9, %s4761_s0  ;;  %p4766_p7 = scmp.lt.s32.totalorder %s9559_s9, %s9665_s6 }
 0x4a1   : > { %p4767_p8 = scmp.lt.s32.totalorder %s4765_s18, %s4761_s0 }
 0x4a2   : > { %p4763_p4 = pnand %p4762_p1, %p10438_p9 }
 0x4a3   : > { %p4768_p10 = por %p4767_p8, %p4766_p7 }
 0x4a4   : > { %p4764_p3 = pneg %p4763_p4 }
 0x4a6   : > { %p4769_p6 = pnand %p4768_p10, %p4764_p3 }
 0x4a8   : > { %4772 = shalt.err (!%p4769_p6)
}
 0x4a9   : > { %s4868_s16 = smov 128   ;;  %s4869_s15 = smov 8   ;;  %v4207_v45 = vpop.f32.mrf.mxu1  ;;  %v4287_v33 = vpop.f32.mrf.mxu0 }
 0x4aa   : > { %4403 = dma.vmem_to_hbm [thread:$0]  (%p10438_p9), %s9562_s21, 2048, %s9559_s9, %s3878_s14, %s4868_s16, %s4868_s16, %s4869_s15   ;;  %v4208_v23 = vadd.f32 %v4207_v45, %v4206_v46  ;;  %v4288_v3 = vadd.f32 %v4287_v33, %v4286_v36 }
 0x4ab   : > { %s3912_s26 = sshll.u32 %s9497_s12, 4  ;;  %s9613_s14 = scalar_lea.hbm %s9666_s7, %s4110_s23  ;;  %s9615_s26 = int_to_ptr.vmem [resolvable:$true] %s3912_s26 }
 0x4ac   : > { %v3775_v6 = vadd.f32 %v4288_v3, %v4208_v23  ;;  %s3883_s30 = scalar_lea.sflag [#allocation10], %s5073_s10  ;;  %s4773_s29 = scalar_lea.vmem %s9615_s26, 2048 }
 0x4ad   : > { %p4774_p12 = scmp.ne.s32.totalorder %s9615_s26, %s4773_s29  ;;  %s4870_s19 = smov [#allocation9]  }
 0x4ae   : > { %v3818_v52 = vmul.f32 %v9435_v47, %v3775_v6  ;;  %s4777_s20 = sshll.u32 %s4870_s19, 4  ;;  %s4778_s20 = int_to_ptr.vmem [resolvable:$false] %s4777_s20 }
 0x4af   : > { %p4775_p13 = pnand %p4774_p12, %p10438_p9  ;;  %s4779_s28 = scalar_lea.vmem %s4778_s20, 4096 }
 0x4b0   : > { %v3839_v56 = vadd.f32 %v9446_v53, %v3818_v52  ;;  %p4780_p5 = scmp.lt.s32.totalorder %s9615_s26, %s4778_s20  ;;  %p4781_p2 = scmp.lt.s32.totalorder %s4779_s28, %s4773_s29 }
 0x4b1   : > { %v4209_v26 = vpop.f32.mrf.mxu1  ;;  %p4776_p0 = pneg %p4775_p13 }
 0x4b2   : > { %v3855_v10 = vmax.f32 %v3839_v56, 0.0  ;;  %v4289_v49 = vpop.f32.mrf.mxu0  ;;  %p4782_p11 = por %p4781_p2, %p4780_p5 }
 0x4b3   : > { %v4210_v40 = vpop.f32.mrf.mxu1 }
 0x4b4   : > { %3871 = vst [vmem:[%s9497_s12 + $0x50] sm:$0xff] %v3855_v10  ;;  %v4290_v1 = vpop.f32.mrf.mxu0  ;;  %v4211_v42 = vadd.f32 %v4210_v40, %v4209_v26  ;;  %p4783_p1 = pnand %p4782_p11, %p4776_p0 }
 0x4b5   : > { %v4291_v38 = vadd.f32 %v4290_v1, %v4289_v49 }
 0x4b7   : > { %v3780_v4 = vadd.f32 %v4291_v38, %v4211_v42 }
 0x4b9   : > { %v3819_v35 = vmul.f32 %v9435_v47, %v3780_v4 }
 0x4bb   : > { %v3840_v39 = vadd.f32 %v9446_v53, %v3819_v35 }
 0x4bd   : > { %v3856_v60 = vmax.f32 %v3840_v39, 0.0 }
 0x4bf   : > { %3872 = vst [vmem:[%s9497_s12 + $0x58] sm:$0xff] %v3856_v60 }
 0x4c8   : > { %v4212_v59 = vpop.f32.mrf.mxu1 }
 0x4ca   : > { %v4213_v50 = vpop.f32.mrf.mxu1 }
 0x4cb   : > { %v4214_v30 = vadd.f32 %v4213_v50, %v4212_v59 }
 0x4d3   : > { %v4215_v41 = vpop.f32.mrf.mxu1 }
 0x4d5   : > { %v4216_v15 = vpop.f32.mrf.mxu1 }
 0x4d6   : > { %v4217_v57 = vadd.f32 %v4216_v15, %v4215_v41 }
 0x4e6   : > { %v4218_v18 = vpop.f32.mrf.mxu1 }
 0x4e8   : > { %v4219_v7 = vpop.f32.mrf.mxu1 }
 0x4e9   : > { %v4220_v31 = vadd.f32 %v4219_v7, %v4218_v18 }
 0x4f9   : > { %v4221_v25 = vpop.f32.mrf.mxu1 }
 0x4fb   : > { %v4222_v24 = vpop.f32.mrf.mxu1 }
 0x4fc   : > { %v4223_v62 = vadd.f32 %v4222_v24, %v4221_v25 }
 0x4fd   : > { %v4292_v43 = vpop.f32.mrf.mxu1 }
 0x4ff   : > { %v4293_v48 = vpop.f32.mrf.mxu1 }
 0x500   : > { %v4294_v32 = vadd.f32 %v4293_v48, %v4292_v43 }
 0x501   : > { %v4295_v19 = vpop.f32.mrf.mxu1 }
 0x502   : > { %v3785_v29 = vadd.f32 %v4294_v32, %v4214_v30 }
 0x503   : > { %v4296_v2 = vpop.f32.mrf.mxu1 }
 0x504   : > { %v3820_v54 = vmul.f32 %v9435_v47, %v3785_v29  ;;  %v4297_v27 = vadd.f32 %v4296_v2, %v4295_v19 }
 0x505   : > { %v4298_v13 = vpop.f32.mrf.mxu1 }
 0x506   : > { %v3841_v12 = vadd.f32 %v9446_v53, %v3820_v54  ;;  %v3790_v21 = vadd.f32 %v4297_v27, %v4217_v57 }
 0x507   : > { %v4299_v63 = vpop.f32.mrf.mxu1 }
 0x508   : > { %v3857_v22 = vmax.f32 %v3841_v12, 0.0  ;;  %v3821_v44 = vmul.f32 %v9435_v47, %v3790_v21  ;;  %v4300_v9 = vadd.f32 %v4299_v63, %v4298_v13 }
 0x509   : > { %v4301_v16 = vpop.f32.mrf.mxu1 }
 0x50a   : > { %3873 = vst [vmem:[%s9497_s12 + $0x60] sm:$0xff] %v3857_v22  ;;  %v3842_v28 = vadd.f32 %v9446_v53, %v3821_v44  ;;  %v3795_v34 = vadd.f32 %v4300_v9, %v4220_v31 }
 0x50b   : > { %v4302_v51 = vpop.f32.mrf.mxu1 }
 0x50c   : > { %v3858_v5 = vmax.f32 %v3842_v28, 0.0  ;;  %v3822_v17 = vmul.f32 %v9435_v47, %v3795_v34  ;;  %v4303_v14 = vadd.f32 %v4302_v51, %v4301_v16 }
 0x50e   : > { %3874 = vst [vmem:[%s9497_s12 + $0x68] sm:$0xff] %v3858_v5  ;;  %v3843_v11 = vadd.f32 %v9446_v53, %v3822_v17  ;;  %v3800_v37 = vadd.f32 %v4303_v14, %v4223_v62 }
 0x510   : > { %v3859_v58 = vmax.f32 %v3843_v11, 0.0  ;;  %v3823_v8 = vmul.f32 %v9435_v47, %v3800_v37 }
 0x512   : > { %3875 = vst [vmem:[%s9497_s12 + $0x70] sm:$0xff] %v3859_v58  ;;  %v3844_v61 = vadd.f32 %v9446_v53, %v3823_v8 }
 0x514   : > { %v3860_v0 = vmax.f32 %v3844_v61, 0.0 }
 0x516   : > { %3876 = vst [vmem:[%s9497_s12 + $0x78] sm:$0xff] %v3860_v0 }
 0x517   : > { %4786 = shalt.err (!%p4783_p1)
}
 0x518   : > { %s4787_s12 = scalar_lea.hbm %s9613_s14, 2048  ;;  %s4791_s0 = scalar_lea.hbm %s9666_s7, 8192 }
 0x519   : > { %p4788_p4 = scmp.ne.s32.totalorder %s9613_s14, %s4787_s12  ;;  %p4792_p8 = scmp.lt.s32.totalorder %s9613_s14, %s9666_s7 }
 0x51a   : > { %p4793_p10 = scmp.lt.s32.totalorder %s4791_s0, %s4787_s12 }
 0x51b   : > { %p4789_p3 = pnand %p4788_p4, %p10438_p9 }
 0x51c   : > { %p4794_p6 = por %p4793_p10, %p4792_p8 }
 0x51d   : > { %p4790_p7 = pneg %p4789_p3 }
 0x51f   : > { %p4795_p12 = pnand %p4794_p6, %p4790_p7 }
 0x521   : > { %4798 = shalt.err (!%p4795_p12)
}
 0x522   : > { %4404 = dma.vmem_to_hbm [thread:$0]  (%p10438_p9), %s9615_s26, 2048, %s9613_s14, %s3883_s30, %s4868_s16, %s4868_s16, %s4869_s15  }
 0x523 PF: > { %p4428_p13 = scmp.ge.s32.totalorder %s4849_s27, 2  ;;  %s3927_s18 = sand.u32 1, %s4837_s24  }
 0x524   : > { %p10439_p0 = scmp.ne.s32.totalorder %s9875_s8, 0  ;;  %s3928_s11 = scalar_lea.sflag [#allocation4], %s3927_s18 }
 0x526   : > { %p4419_p5 = pnand %p4428_p13, %p10439_p0 }
 0x528   : > { %p4420_p2 = pneg %p4419_p5 }
 0x52a   : > { %4828 = dma.done.wait (%p4420_p2), %s3928_s11, 2048  }
 0x52b   : > { %4830 = vsyncadd (%p4420_p2), %s3928_s11, 4294965248  ;;  %s3937_s13 = scalar_lea.sflag [#allocation10], %s3927_s18 }
 0x52c   : > { %4832 = dma.done.wait (%p4420_p2), %s3937_s13, 2048  }
 0x52d   : > { %4834 = vsyncadd (%p4420_p2), %s3937_s13, 4294965248  ;;  %s10440_s27 = sld [smem:[#allocation17_spill]]  ;;  %s10443_s24 = smov %s4841_s25 }
 0x52e   : > { %s10441_s22 = sld [smem:[#allocation16_spill]] }
 0x52f   : > { %s10442_s26 = sld [smem:[#allocation18_spill]] }
 0x533   : > { %p27_p9 = scmp.ge.s32.totalorder %s10440_s27, 6  }
 0x534   : > { %s10444_s25 = smov %s10441_s22 }
 0x535   :  { %29 = sbr.rel (!%p27_p9) target bundleno = 12 (0xc), region = 123 }
 0x53a   :  { %3942 = vsyncpa [#allocation3], 1 }
 0x53b   :  { %3944 = vsyncpa [#allocation3 + $0x1], 1 }
 0x53c   :  { %3945 = vsyncpa [#allocation6], 1 }
 0x53d   :  { %3947 = vsyncpa [#allocation6 + $0x1], 1 }
 0x53e   :  { %3948 = vsyncpa [#allocation4], 1 }
 0x53f   :  { %3950 = vsyncpa [#allocation4 + $0x1], 1 }
 0x540   :  { %3951 = vsyncpa [#allocation10], 1 }
 0x541   :  { %3953 = vsyncpa [#allocation10 + $0x1], 1 }

</bundles_post_ra>
